<compile_context>
chip_gen: v7x
topology: tpu7x:2x2x1
jax: 0.10.0
libtpu: 0.0.40
codegen_flags: <defaults>
</compile_context>

<pallas_src>
import math
from functools import partial

import jax
import jax.numpy as jnp
from jax.experimental import pallas as pl
from jax.experimental.pallas import tpu as pltpu

EPS = 1e-6  # matches LayerNormalization eps = 10**-6


# ----------------------------------------------------------------------------
# Fused decoder kernel: one grid step = (batch element b, layer l)
# ----------------------------------------------------------------------------

def _decoder_kernel(
    # per-batch activation / mask blocks
    x_ref, enc_ref, tmask_ref, smask_ref,
    # self-attention params (layer l)
    ln1a_ref, ln1b_ref, wqkv_s_ref, bqkv_s_ref, wo_s_ref, bo_s_ref,
    # cross-attention params (layer l)
    ln2a_ref, ln2b_ref, wq_c_ref, bq_c_ref, wkv_c_ref, bkv_c_ref,
    wo_c_ref, bo_c_ref,
    # feed-forward params (layer l)
    ln3a_ref, ln3b_ref, w1_ref, b1_ref, w2_ref, b2_ref,
    # final (shared) norm params
    fna_ref, fnb_ref,
    # resident output block (carries x across the layer axis)
    o_ref,
    *, h, d):
    dh = d // h
    scale = 1.0 / math.sqrt(dh)
    bf16 = jnp.bfloat16

    l = pl.program_id(1)
    n_layers = pl.num_programs(1)

    # Layer 0 starts from the embedding input; later layers read the resident
    # output block kept in VMEM across the "arbitrary" layer axis.
    @pl.when(l == 0)
    def _():
        o_ref[...] = x_ref[...]

    x = o_ref[...].astype(jnp.float32)        # (S, D)
    enc = enc_ref[...].astype(jnp.float32)    # (Sk, D)

    def layer_norm(v, a_ref, b_ref):
        mean = jnp.mean(v, axis=-1, keepdims=True)
        # PyTorch x.std(dim=-1) is the *unbiased* std (divide by D-1),
        # and eps is added to std (not var), matching the custom module.
        var = jnp.sum((v - mean) ** 2, axis=-1, keepdims=True) / (d - 1)
        inv = pl.reciprocal(jnp.sqrt(var) + EPS, approx=True)   # EUP
        return a_ref[...] * (v - mean) * inv + b_ref[...]

    def attend(q, k, v, mask, wo_ref, bo_ref):
        # q already scaled by 1/sqrt(dh); all heads handled in this step.
        valid = mask != 0.0                       # compare hoisted out of the head loop
        qb = q.astype(bf16)
        kb = k.astype(bf16)
        vb = v.astype(bf16)
        dn = (((1,), (1,)), ((), ()))             # q @ k^T without materializing K^T
        ctx_heads = []
        for head in range(h):                     # static unroll over heads
            sl = slice(head * dh, (head + 1) * dh)
            s = jax.lax.dot_general(qb[:, sl], kb[:, sl], dn,
                                    preferred_element_type=jnp.float32)
            s = jnp.where(valid, s, -1e9)         # masked_fill(mask == 0, -1e9)
            s = s - jnp.max(s, axis=-1, keepdims=True)
            p = jnp.exp(s)
            p = p * pl.reciprocal(jnp.sum(p, axis=-1, keepdims=True), approx=True)
            ctx_heads.append(
                jnp.dot(p.astype(bf16), vb[:, sl],
                        preferred_element_type=jnp.float32))
        # heads are contiguous lane slices -> single full-width Wo matmul (K = D)
        ctx = jnp.concatenate(ctx_heads, axis=-1)
        return (jnp.dot(ctx.astype(bf16), wo_ref[...],
                        preferred_element_type=jnp.float32) + bo_ref[...])

    # residual 1: pre-norm self-attention (fused QKV projection)
    xn = layer_norm(x, ln1a_ref, ln1b_ref).astype(bf16)
    qkv = jnp.dot(xn, wqkv_s_ref[...],
                  preferred_element_type=jnp.float32) + bqkv_s_ref[...]
    q = qkv[:, 0 * d:1 * d] * scale
    k = qkv[:, 1 * d:2 * d]
    v = qkv[:, 2 * d:3 * d]
    x = x + attend(q, k, v, tmask_ref[...], wo_s_ref, bo_s_ref)

    # residual 2: pre-norm cross-attention (fused KV projection of encoder out)
    xn = layer_norm(x, ln2a_ref, ln2b_ref).astype(bf16)
    q = (jnp.dot(xn, wq_c_ref[...],
                 preferred_element_type=jnp.float32) + bq_c_ref[...]) * scale
    kv = jnp.dot(enc.astype(bf16), wkv_c_ref[...],
                 preferred_element_type=jnp.float32) + bkv_c_ref[...]
    k = kv[:, 0 * d:1 * d]
    v = kv[:, 1 * d:2 * d]
    x = x + attend(q, k, v, smask_ref[...], wo_c_ref, bo_c_ref)

    # residual 3: pre-norm feed-forward (linear -> ReLU -> linear)
    xn = layer_norm(x, ln3a_ref, ln3b_ref).astype(bf16)
    f = jnp.maximum(
        jnp.dot(xn, w1_ref[...], preferred_element_type=jnp.float32) + b1_ref[...],
        0.0)
    x = x + jnp.dot(f.astype(bf16), w2_ref[...],
                    preferred_element_type=jnp.float32) + b2_ref[...]

    is_last = l == n_layers - 1

    @pl.when(is_last)
    def _():  # final custom LayerNorm fused into the last layer step
        o_ref[...] = layer_norm(x, fna_ref, fnb_ref).astype(o_ref.dtype)

    @pl.when(jnp.logical_not(is_last))
    def _():
        o_ref[...] = x.astype(o_ref.dtype)


# ----------------------------------------------------------------------------
# Wrapper: one pallas_call for the whole decoder
# ----------------------------------------------------------------------------

def decoder_forward(x, enc_out, src_mask, tgt_mask, params, *, h):
    B, S, D = x.shape
    Sk = enc_out.shape[1]
    L = params["wqkv_s"].shape[0]
    F = params["w1"].shape[2]

    def per_layer(shape):
        # weights stacked with a leading layer axis; block index follows l
        zeros = (0,) * len(shape)
        return pl.BlockSpec((None,) + tuple(shape), lambda b, l, _z=zeros: (l,) + _z)

    def shared(shape):
        zeros = (0,) * len(shape)
        return pl.BlockSpec(tuple(shape), lambda b, l, _z=zeros: _z)

    in_specs = [
        pl.BlockSpec((None, S, D), lambda b, l: (b, 0, 0)),            # x
        pl.BlockSpec((None, Sk, D), lambda b, l: (b, 0, 0)),           # encoder output
        pl.BlockSpec((None, None, S, S), lambda b, l: (b, 0, 0, 0)),   # target mask
        pl.BlockSpec((None, None, S, Sk), lambda b, l: (b, 0, 0, 0)),  # source mask
        per_layer((1, D)), per_layer((1, D)),                          # ln1 alpha/bias
        per_layer((D, 3 * D)), per_layer((1, 3 * D)),                  # Wqkv/bqkv (self)
        per_layer((D, D)), per_layer((1, D)),                          # Wo/bo (self)
        per_layer((1, D)), per_layer((1, D)),                          # ln2 alpha/bias
        per_layer((D, D)), per_layer((1, D)),                          # Wq/bq (cross)
        per_layer((D, 2 * D)), per_layer((1, 2 * D)),                  # Wkv/bkv (cross)
        per_layer((D, D)), per_layer((1, D)),                          # Wo/bo (cross)
        per_layer((1, D)), per_layer((1, D)),                          # ln3 alpha/bias
        per_layer((D, F)), per_layer((1, F)),                          # W1/b1
        per_layer((F, D)), per_layer((1, D)),                          # W2/b2
        shared((1, D)), shared((1, D)),                                # final norm a/b
    ]

    return pl.pallas_call(
        partial(_decoder_kernel, h=h, d=D),
        out_shape=jax.ShapeDtypeStruct((B, S, D), x.dtype),
        grid=(B, L),
        in_specs=in_specs,
        out_specs=pl.BlockSpec((None, S, D), lambda b, l: (b, 0, 0)),  # resident over l
        compiler_params=pltpu.CompilerParams(
            dimension_semantics=("parallel", "arbitrary"),
            vmem_limit_bytes=32 * 1024 * 1024),
    )(x, enc_out, tgt_mask, src_mask,
      params["ln1_a"], params["ln1_b"], params["wqkv_s"], params["bqkv_s"],
      params["wo_s"], params["bo_s"],
      params["ln2_a"], params["ln2_b"], params["wq_c"], params["bq_c"],
      params["wkv_c"], params["bkv_c"], params["wo_c"], params["bo_c"],
      params["ln3_a"], params["ln3_b"], params["w1"], params["b1"],
      params["w2"], params["b2"],
      params["norm_a"], params["norm_b"])


# ----------------------------------------------------------------------------
# Deterministic parameter initialization (stacked layers, bf16 matmul weights)
# ----------------------------------------------------------------------------

def init_decoder_params(key, n_layers, d_model, d_ff):
    ks = jax.random.split(key, 7)
    L = n_layers

    def w(k, i, o):  # matmul weights in bf16 (halves DMA volume / VMEM residency)
        return (jax.random.normal(k, (L, i, o), jnp.float32) * 0.02).astype(jnp.bfloat16)

    ones = lambda: jnp.ones((L, 1, d_model), jnp.float32)
    zeros = lambda n: jnp.zeros((L, 1, n), jnp.float32)

    return {
        "ln1_a": ones(), "ln1_b": zeros(d_model),
        "wqkv_s": w(ks[0], d_model, 3 * d_model), "bqkv_s": zeros(3 * d_model),
        "wo_s": w(ks[1], d_model, d_model), "bo_s": zeros(d_model),
        "ln2_a": ones(), "ln2_b": zeros(d_model),
        "wq_c": w(ks[2], d_model, d_model), "bq_c": zeros(d_model),
        "wkv_c": w(ks[3], d_model, 2 * d_model), "bkv_c": zeros(2 * d_model),
        "wo_c": w(ks[4], d_model, d_model), "bo_c": zeros(d_model),
        "ln3_a": ones(), "ln3_b": zeros(d_model),
        "w1": w(ks[5], d_model, d_ff), "b1": zeros(d_ff),
        "w2": w(ks[6], d_ff, d_model), "b2": zeros(d_model),
        "norm_a": jnp.ones((1, d_model), jnp.float32),
        "norm_b": jnp.zeros((1, d_model), jnp.float32),
    }


# ----------------------------------------------------------------------------
# Main
# ----------------------------------------------------------------------------

if __name__ == "__main__":
    # Lane-dense demo shapes (D multiple of 128) so stores/elementwise run at
    # full lane utilization.
    B, S_TGT, S_SRC, D_MODEL, H, D_FF, N_LAYERS = 2, 8, 8, 128, 4, 256, 2

    key = jax.random.PRNGKey(0)
    k_x, k_enc, k_params = jax.random.split(key, 3)

    x = jax.random.normal(k_x, (B, S_TGT, D_MODEL), jnp.float32)
    enc_out = jax.random.normal(k_enc, (B, S_SRC, D_MODEL), jnp.float32)

    # target mask: causal (B, 1, S, S); source mask: all-ones (B, 1, S, Sk)
    causal = jnp.tril(jnp.ones((S_TGT, S_TGT), jnp.float32))
    tgt_mask = jnp.broadcast_to(causal[None, None], (B, 1, S_TGT, S_TGT))
    src_mask = jnp.ones((B, 1, S_TGT, S_SRC), jnp.float32)

    params = init_decoder_params(k_params, N_LAYERS, D_MODEL, D_FF)

    fwd = jax.jit(partial(decoder_forward, h=H))
    out = jax.block_until_ready(fwd(x, enc_out, src_mask, tgt_mask, params))

    assert out.shape == (B, S_TGT, D_MODEL)
    assert bool(jnp.all(jnp.isfinite(out)))
    print("KERNEL_OK")
</pallas_src>

<mosaic_0001>
module attributes {stable_mosaic.version = 11 : i64} {
  func.func @_decoder_kernel(%arg0: i32, %arg1: i32, %arg2: memref<1x8x128xf32, #tpu.memory_space<vmem>>, %arg3: memref<1x8x128xf32, #tpu.memory_space<vmem>>, %arg4: memref<1x1x8x8xf32, #tpu.memory_space<vmem>>, %arg5: memref<1x1x8x8xf32, #tpu.memory_space<vmem>>, %arg6: memref<1x1x128xf32, #tpu.memory_space<vmem>>, %arg7: memref<1x1x128xf32, #tpu.memory_space<vmem>>, %arg8: memref<1x128x384xbf16, #tpu.memory_space<vmem>>, %arg9: memref<1x1x384xf32, #tpu.memory_space<vmem>>, %arg10: memref<1x128x128xbf16, #tpu.memory_space<vmem>>, %arg11: memref<1x1x128xf32, #tpu.memory_space<vmem>>, %arg12: memref<1x1x128xf32, #tpu.memory_space<vmem>>, %arg13: memref<1x1x128xf32, #tpu.memory_space<vmem>>, %arg14: memref<1x128x128xbf16, #tpu.memory_space<vmem>>, %arg15: memref<1x1x128xf32, #tpu.memory_space<vmem>>, %arg16: memref<1x128x256xbf16, #tpu.memory_space<vmem>>, %arg17: memref<1x1x256xf32, #tpu.memory_space<vmem>>, %arg18: memref<1x128x128xbf16, #tpu.memory_space<vmem>>, %arg19: memref<1x1x128xf32, #tpu.memory_space<vmem>>, %arg20: memref<1x1x128xf32, #tpu.memory_space<vmem>>, %arg21: memref<1x1x128xf32, #tpu.memory_space<vmem>>, %arg22: memref<1x128x256xbf16, #tpu.memory_space<vmem>>, %arg23: memref<1x1x256xf32, #tpu.memory_space<vmem>>, %arg24: memref<1x256x128xbf16, #tpu.memory_space<vmem>>, %arg25: memref<1x1x128xf32, #tpu.memory_space<vmem>>, %arg26: memref<1x128xf32, #tpu.memory_space<vmem>>, %arg27: memref<1x128xf32, #tpu.memory_space<vmem>>, %arg28: memref<1x8x128xf32, #tpu.memory_space<vmem>>) attributes {dimension_semantics = [#tpu.dimension_semantics<parallel>, #tpu.dimension_semantics<arbitrary>], iteration_bounds = array<i64: 2, 2>, scalar_prefetch = 0 : i64, scratch_operands = 0 : i64, tpu.core_type = #tpu.core_type<tc>, window_params = [{transform_indices = @transform_0, window_bounds = array<i64: 1, 8, 128>}, {transform_indices = @transform_1, window_bounds = array<i64: 1, 8, 128>}, {transform_indices = @transform_2, window_bounds = array<i64: 1, 1, 8, 8>}, {transform_indices = @transform_3, window_bounds = array<i64: 1, 1, 8, 8>}, {transform_indices = @transform_4, window_bounds = array<i64: 1, 1, 128>}, {transform_indices = @transform_5, window_bounds = array<i64: 1, 1, 128>}, {transform_indices = @transform_6, window_bounds = array<i64: 1, 128, 384>}, {transform_indices = @transform_7, window_bounds = array<i64: 1, 1, 384>}, {transform_indices = @transform_8, window_bounds = array<i64: 1, 128, 128>}, {transform_indices = @transform_9, window_bounds = array<i64: 1, 1, 128>}, {transform_indices = @transform_10, window_bounds = array<i64: 1, 1, 128>}, {transform_indices = @transform_11, window_bounds = array<i64: 1, 1, 128>}, {transform_indices = @transform_12, window_bounds = array<i64: 1, 128, 128>}, {transform_indices = @transform_13, window_bounds = array<i64: 1, 1, 128>}, {transform_indices = @transform_14, window_bounds = array<i64: 1, 128, 256>}, {transform_indices = @transform_15, window_bounds = array<i64: 1, 1, 256>}, {transform_indices = @transform_16, window_bounds = array<i64: 1, 128, 128>}, {transform_indices = @transform_17, window_bounds = array<i64: 1, 1, 128>}, {transform_indices = @transform_18, window_bounds = array<i64: 1, 1, 128>}, {transform_indices = @transform_19, window_bounds = array<i64: 1, 1, 128>}, {transform_indices = @transform_20, window_bounds = array<i64: 1, 128, 256>}, {transform_indices = @transform_21, window_bounds = array<i64: 1, 1, 256>}, {transform_indices = @transform_22, window_bounds = array<i64: 1, 256, 128>}, {transform_indices = @transform_23, window_bounds = array<i64: 1, 1, 128>}, {pipeline_mode = #tpu.pipeline_mode<synchronous>, transform_indices = @transform_24, window_bounds = array<i64: 1, 128>}, {pipeline_mode = #tpu.pipeline_mode<synchronous>, transform_indices = @transform_25, window_bounds = array<i64: 1, 128>}, {transform_indices = @transform_26, window_bounds = array<i64: 1, 8, 128>}]} {
    %c0_i32 = arith.constant 0 : i32
    %0 = arith.cmpi eq, %arg1, %c0_i32 : i32
    %1 = arith.extui %0 : i1 to i32
    %c0_i32_0 = arith.constant 0 : i32
    %2 = arith.cmpi ne, %1, %c0_i32_0 : i32
    scf.if %2 {
      %c0_142 = arith.constant 0 : index
      %c0_143 = arith.constant 0 : index
      %c0_144 = arith.constant 0 : index
      %324 = vector.load %arg2[%c0_142, %c0_143, %c0_144] : memref<1x8x128xf32, #tpu.memory_space<vmem>>, vector<1x8x128xf32>
      %325 = vector.shape_cast %324 : vector<1x8x128xf32> to vector<8x128xf32>
      %c0_145 = arith.constant 0 : index
      %c0_146 = arith.constant 0 : index
      %c0_147 = arith.constant 0 : index
      %326 = vector.load %arg28[%c0_145, %c0_146, %c0_147] : memref<1x8x128xf32, #tpu.memory_space<vmem>>, vector<1x8x128xf32>
      %327 = vector.shape_cast %326 : vector<1x8x128xf32> to vector<8x128xf32>
      %328 = vector.shape_cast %325 : vector<8x128xf32> to vector<1x8x128xf32>
      tpu.vector_store %arg28[%c0_145, %c0_146, %c0_147], %328 {strides = array<i32>} : memref<1x8x128xf32, #tpu.memory_space<vmem>>, vector<1x8x128xf32>,
    } else {
    }
    %c0 = arith.constant 0 : index
    %c0_1 = arith.constant 0 : index
    %c0_2 = arith.constant 0 : index
    %3 = vector.load %arg28[%c0, %c0_1, %c0_2] : memref<1x8x128xf32, #tpu.memory_space<vmem>>, vector<1x8x128xf32>
    %4 = vector.shape_cast %3 : vector<1x8x128xf32> to vector<8x128xf32>
    %c0_3 = arith.constant 0 : index
    %c0_4 = arith.constant 0 : index
    %c0_5 = arith.constant 0 : index
    %5 = vector.load %arg3[%c0_3, %c0_4, %c0_5] : memref<1x8x128xf32, #tpu.memory_space<vmem>>, vector<1x8x128xf32>
    %6 = vector.shape_cast %5 : vector<1x8x128xf32> to vector<8x128xf32>
    %cst = arith.constant dense<0.000000e+00> : vector<8xf32>
    %7 = vector.multi_reduction <add>, %4, %cst [1] : vector<8x128xf32> to vector<8xf32>
    %8 = vector.shape_cast %7 : vector<8xf32> to vector<8x1xf32>
    %cst_6 = arith.constant 1.280000e+02 : f32
    %9 = vector.broadcast %cst_6 : f32 to vector<8x1xf32>
    %10 = arith.divf %8, %9 : vector<8x1xf32>
    %11 = vector.broadcast %10 : vector<8x1xf32> to vector<8x128xf32>
    %12 = arith.subf %4, %11 : vector<8x128xf32>
    %13 = arith.mulf %12, %12 : vector<8x128xf32>
    %cst_7 = arith.constant dense<0.000000e+00> : vector<8xf32>
    %14 = vector.multi_reduction <add>, %13, %cst_7 [1] : vector<8x128xf32> to vector<8xf32>
    %15 = vector.shape_cast %14 : vector<8xf32> to vector<8x1xf32>
    %cst_8 = arith.constant 1.270000e+02 : f32
    %16 = vector.broadcast %cst_8 : f32 to vector<8x1xf32>
    %17 = arith.divf %15, %16 : vector<8x1xf32>
    %18 = math.sqrt %17 : vector<8x1xf32>
    %cst_9 = arith.constant 9.99999997E-7 : f32
    %19 = vector.broadcast %cst_9 : f32 to vector<8x1xf32>
    %20 = arith.addf %18, %19 : vector<8x1xf32>
    %21 = tpu.reciprocal %20 {approx = true} : vector<8x1xf32> -> vector<8x1xf32>
    %c0_10 = arith.constant 0 : index
    %c0_11 = arith.constant 0 : index
    %c0_12 = arith.constant 0 : index
    %22 = vector.load %arg6[%c0_10, %c0_11, %c0_12] : memref<1x1x128xf32, #tpu.memory_space<vmem>>, vector<1x1x128xf32>
    %23 = vector.shape_cast %22 : vector<1x1x128xf32> to vector<1x128xf32>
    %24 = vector.broadcast %10 : vector<8x1xf32> to vector<8x128xf32>
    %25 = arith.subf %4, %24 : vector<8x128xf32>
    %26 = vector.broadcast %23 : vector<1x128xf32> to vector<8x128xf32>
    %27 = arith.mulf %26, %25 : vector<8x128xf32>
    %28 = vector.broadcast %21 : vector<8x1xf32> to vector<8x128xf32>
    %29 = arith.mulf %27, %28 : vector<8x128xf32>
    %c0_13 = arith.constant 0 : index
    %c0_14 = arith.constant 0 : index
    %c0_15 = arith.constant 0 : index
    %30 = vector.load %arg7[%c0_13, %c0_14, %c0_15] : memref<1x1x128xf32, #tpu.memory_space<vmem>>, vector<1x1x128xf32>
    %31 = vector.shape_cast %30 : vector<1x1x128xf32> to vector<1x128xf32>
    %32 = vector.broadcast %31 : vector<1x128xf32> to vector<8x128xf32>
    %33 = arith.addf %29, %32 : vector<8x128xf32>
    %34 = arith.truncf %33 : vector<8x128xf32> to vector<8x128xbf16>
    %c0_16 = arith.constant 0 : index
    %c0_17 = arith.constant 0 : index
    %c0_18 = arith.constant 0 : index
    %35 = vector.load %arg8[%c0_16, %c0_17, %c0_18] : memref<1x128x384xbf16, #tpu.memory_space<vmem>>, vector<1x128x384xbf16>
    %36 = vector.shape_cast %35 : vector<1x128x384xbf16> to vector<128x384xbf16>
    %cst_19 = arith.constant dense<0.000000e+00> : vector<8x384xf32>
    %37 = tpu.matmul %34, %36, %cst_19 {dimension_numbers = #tpu.dot_dimension_numbers<[1], [0], [0], [1], [0, 0, 1, 1], [], []>} : vector<8x128xbf16>, vector<128x384xbf16>, vector<8x384xf32> -> vector<8x384xf32>
    %c0_20 = arith.constant 0 : index
    %c0_21 = arith.constant 0 : index
    %c0_22 = arith.constant 0 : index
    %38 = vector.load %arg9[%c0_20, %c0_21, %c0_22] : memref<1x1x384xf32, #tpu.memory_space<vmem>>, vector<1x1x384xf32>
    %39 = vector.shape_cast %38 : vector<1x1x384xf32> to vector<1x384xf32>
    %40 = vector.broadcast %39 : vector<1x384xf32> to vector<8x384xf32>
    %41 = arith.addf %37, %40 : vector<8x384xf32>
    %42 = vector.extract_strided_slice %41 {offsets = [0, 0], sizes = [8, 128], strides = [1, 1]} : vector<8x384xf32> to vector<8x128xf32>
    %cst_23 = arith.constant 0.176776692 : f32
    %43 = vector.broadcast %cst_23 : f32 to vector<8x128xf32>
    %44 = arith.mulf %42, %43 : vector<8x128xf32>
    %45 = vector.extract_strided_slice %41 {offsets = [0, 128], sizes = [8, 128], strides = [1, 1]} : vector<8x384xf32> to vector<8x128xf32>
    %46 = vector.extract_strided_slice %41 {offsets = [0, 256], sizes = [8, 128], strides = [1, 1]} : vector<8x384xf32> to vector<8x128xf32>
    %c0_24 = arith.constant 0 : index
    %c0_25 = arith.constant 0 : index
    %c0_26 = arith.constant 0 : index
    %c0_27 = arith.constant 0 : index
    %47 = vector.load %arg4[%c0_24, %c0_25, %c0_26, %c0_27] : memref<1x1x8x8xf32, #tpu.memory_space<vmem>>, vector<1x1x8x8xf32>
    %48 = vector.shape_cast %47 : vector<1x1x8x8xf32> to vector<8x8xf32>
    %cst_28 = arith.constant 0.000000e+00 : f32
    %49 = vector.broadcast %cst_28 : f32 to vector<8x8xf32>
    %50 = arith.cmpf one, %48, %49 : vector<8x8xf32>
    %51 = arith.truncf %44 : vector<8x128xf32> to vector<8x128xbf16>
    %52 = arith.truncf %45 : vector<8x128xf32> to vector<8x128xbf16>
    %53 = arith.truncf %46 : vector<8x128xf32> to vector<8x128xbf16>
    %54 = vector.extract_strided_slice %51 {offsets = [0, 0], sizes = [8, 32], strides = [1, 1]} : vector<8x128xbf16> to vector<8x32xbf16>
    %55 = vector.extract_strided_slice %52 {offsets = [0, 0], sizes = [8, 32], strides = [1, 1]} : vector<8x128xbf16> to vector<8x32xbf16>
    %cst_29 = arith.constant dense<0.000000e+00> : vector<8x8xf32>
    %56 = tpu.matmul %54, %55, %cst_29 {dimension_numbers = #tpu.dot_dimension_numbers<[1], [1], [0], [0], [0, 0, 1, 0], [], []>} : vector<8x32xbf16>, vector<8x32xbf16>, vector<8x8xf32> -> vector<8x8xf32>
    %cst_30 = arith.constant -1.000000e+09 : f32
    %57 = vector.broadcast %cst_30 : f32 to vector<8x8xf32>
    %58 = arith.select %50, %56, %57 : vector<8x8xi1>, vector<8x8xf32>
    %cst_31 = arith.constant dense<0xFF800000> : vector<8xf32>
    %59 = vector.multi_reduction <maximumf>, %58, %cst_31 [1] : vector<8x8xf32> to vector<8xf32>
    %60 = vector.shape_cast %59 : vector<8xf32> to vector<8x1xf32>
    %61 = vector.broadcast %60 : vector<8x1xf32> to vector<8x8xf32>
    %62 = arith.subf %58, %61 : vector<8x8xf32>
    %63 = math.exp %62 : vector<8x8xf32>
    %cst_32 = arith.constant dense<0.000000e+00> : vector<8xf32>
    %64 = vector.multi_reduction <add>, %63, %cst_32 [1] : vector<8x8xf32> to vector<8xf32>
    %65 = vector.shape_cast %64 : vector<8xf32> to vector<8x1xf32>
    %66 = tpu.reciprocal %65 {approx = true} : vector<8x1xf32> -> vector<8x1xf32>
    %67 = vector.broadcast %66 : vector<8x1xf32> to vector<8x8xf32>
    %68 = arith.mulf %63, %67 : vector<8x8xf32>
    %69 = arith.truncf %68 : vector<8x8xf32> to vector<8x8xbf16>
    %70 = vector.extract_strided_slice %53 {offsets = [0, 0], sizes = [8, 32], strides = [1, 1]} : vector<8x128xbf16> to vector<8x32xbf16>
    %cst_33 = arith.constant dense<0.000000e+00> : vector<8x32xf32>
    %71 = tpu.matmul %69, %70, %cst_33 {dimension_numbers = #tpu.dot_dimension_numbers<[1], [0], [0], [1], [0, 0, 1, 1], [], []>} : vector<8x8xbf16>, vector<8x32xbf16>, vector<8x32xf32> -> vector<8x32xf32>
    %72 = vector.extract_strided_slice %51 {offsets = [0, 32], sizes = [8, 32], strides = [1, 1]} : vector<8x128xbf16> to vector<8x32xbf16>
    %73 = vector.extract_strided_slice %52 {offsets = [0, 32], sizes = [8, 32], strides = [1, 1]} : vector<8x128xbf16> to vector<8x32xbf16>
    %cst_34 = arith.constant dense<0.000000e+00> : vector<8x8xf32>
    %74 = tpu.matmul %72, %73, %cst_34 {dimension_numbers = #tpu.dot_dimension_numbers<[1], [1], [0], [0], [0, 0, 1, 0], [], []>} : vector<8x32xbf16>, vector<8x32xbf16>, vector<8x8xf32> -> vector<8x8xf32>
    %cst_35 = arith.constant -1.000000e+09 : f32
    %75 = vector.broadcast %cst_35 : f32 to vector<8x8xf32>
    %76 = arith.select %50, %74, %75 : vector<8x8xi1>, vector<8x8xf32>
    %cst_36 = arith.constant dense<0xFF800000> : vector<8xf32>
    %77 = vector.multi_reduction <maximumf>, %76, %cst_36 [1] : vector<8x8xf32> to vector<8xf32>
    %78 = vector.shape_cast %77 : vector<8xf32> to vector<8x1xf32>
    %79 = vector.broadcast %78 : vector<8x1xf32> to vector<8x8xf32>
    %80 = arith.subf %76, %79 : vector<8x8xf32>
    %81 = math.exp %80 : vector<8x8xf32>
    %cst_37 = arith.constant dense<0.000000e+00> : vector<8xf32>
    %82 = vector.multi_reduction <add>, %81, %cst_37 [1] : vector<8x8xf32> to vector<8xf32>
    %83 = vector.shape_cast %82 : vector<8xf32> to vector<8x1xf32>
    %84 = tpu.reciprocal %83 {approx = true} : vector<8x1xf32> -> vector<8x1xf32>
    %85 = vector.broadcast %84 : vector<8x1xf32> to vector<8x8xf32>
    %86 = arith.mulf %81, %85 : vector<8x8xf32>
    %87 = arith.truncf %86 : vector<8x8xf32> to vector<8x8xbf16>
    %88 = vector.extract_strided_slice %53 {offsets = [0, 32], sizes = [8, 32], strides = [1, 1]} : vector<8x128xbf16> to vector<8x32xbf16>
    %cst_38 = arith.constant dense<0.000000e+00> : vector<8x32xf32>
    %89 = tpu.matmul %87, %88, %cst_38 {dimension_numbers = #tpu.dot_dimension_numbers<[1], [0], [0], [1], [0, 0, 1, 1], [], []>} : vector<8x8xbf16>, vector<8x32xbf16>, vector<8x32xf32> -> vector<8x32xf32>
    %90 = vector.extract_strided_slice %51 {offsets = [0, 64], sizes = [8, 32], strides = [1, 1]} : vector<8x128xbf16> to vector<8x32xbf16>
    %91 = vector.extract_strided_slice %52 {offsets = [0, 64], sizes = [8, 32], strides = [1, 1]} : vector<8x128xbf16> to vector<8x32xbf16>
    %cst_39 = arith.constant dense<0.000000e+00> : vector<8x8xf32>
    %92 = tpu.matmul %90, %91, %cst_39 {dimension_numbers = #tpu.dot_dimension_numbers<[1], [1], [0], [0], [0, 0, 1, 0], [], []>} : vector<8x32xbf16>, vector<8x32xbf16>, vector<8x8xf32> -> vector<8x8xf32>
    %cst_40 = arith.constant -1.000000e+09 : f32
    %93 = vector.broadcast %cst_40 : f32 to vector<8x8xf32>
    %94 = arith.select %50, %92, %93 : vector<8x8xi1>, vector<8x8xf32>
    %cst_41 = arith.constant dense<0xFF800000> : vector<8xf32>
    %95 = vector.multi_reduction <maximumf>, %94, %cst_41 [1] : vector<8x8xf32> to vector<8xf32>
    %96 = vector.shape_cast %95 : vector<8xf32> to vector<8x1xf32>
    %97 = vector.broadcast %96 : vector<8x1xf32> to vector<8x8xf32>
    %98 = arith.subf %94, %97 : vector<8x8xf32>
    %99 = math.exp %98 : vector<8x8xf32>
    %cst_42 = arith.constant dense<0.000000e+00> : vector<8xf32>
    %100 = vector.multi_reduction <add>, %99, %cst_42 [1] : vector<8x8xf32> to vector<8xf32>
    %101 = vector.shape_cast %100 : vector<8xf32> to vector<8x1xf32>
    %102 = tpu.reciprocal %101 {approx = true} : vector<8x1xf32> -> vector<8x1xf32>
    %103 = vector.broadcast %102 : vector<8x1xf32> to vector<8x8xf32>
    %104 = arith.mulf %99, %103 : vector<8x8xf32>
    %105 = arith.truncf %104 : vector<8x8xf32> to vector<8x8xbf16>
    %106 = vector.extract_strided_slice %53 {offsets = [0, 64], sizes = [8, 32], strides = [1, 1]} : vector<8x128xbf16> to vector<8x32xbf16>
    %cst_43 = arith.constant dense<0.000000e+00> : vector<8x32xf32>
    %107 = tpu.matmul %105, %106, %cst_43 {dimension_numbers = #tpu.dot_dimension_numbers<[1], [0], [0], [1], [0, 0, 1, 1], [], []>} : vector<8x8xbf16>, vector<8x32xbf16>, vector<8x32xf32> -> vector<8x32xf32>
    %108 = vector.extract_strided_slice %51 {offsets = [0, 96], sizes = [8, 32], strides = [1, 1]} : vector<8x128xbf16> to vector<8x32xbf16>
    %109 = vector.extract_strided_slice %52 {offsets = [0, 96], sizes = [8, 32], strides = [1, 1]} : vector<8x128xbf16> to vector<8x32xbf16>
    %cst_44 = arith.constant dense<0.000000e+00> : vector<8x8xf32>
    %110 = tpu.matmul %108, %109, %cst_44 {dimension_numbers = #tpu.dot_dimension_numbers<[1], [1], [0], [0], [0, 0, 1, 0], [], []>} : vector<8x32xbf16>, vector<8x32xbf16>, vector<8x8xf32> -> vector<8x8xf32>
    %cst_45 = arith.constant -1.000000e+09 : f32
    %111 = vector.broadcast %cst_45 : f32 to vector<8x8xf32>
    %112 = arith.select %50, %110, %111 : vector<8x8xi1>, vector<8x8xf32>
    %cst_46 = arith.constant dense<0xFF800000> : vector<8xf32>
    %113 = vector.multi_reduction <maximumf>, %112, %cst_46 [1] : vector<8x8xf32> to vector<8xf32>
    %114 = vector.shape_cast %113 : vector<8xf32> to vector<8x1xf32>
    %115 = vector.broadcast %114 : vector<8x1xf32> to vector<8x8xf32>
    %116 = arith.subf %112, %115 : vector<8x8xf32>
    %117 = math.exp %116 : vector<8x8xf32>
    %cst_47 = arith.constant dense<0.000000e+00> : vector<8xf32>
    %118 = vector.multi_reduction <add>, %117, %cst_47 [1] : vector<8x8xf32> to vector<8xf32>
    %119 = vector.shape_cast %118 : vector<8xf32> to vector<8x1xf32>
    %120 = tpu.reciprocal %119 {approx = true} : vector<8x1xf32> -> vector<8x1xf32>
    %121 = vector.broadcast %120 : vector<8x1xf32> to vector<8x8xf32>
    %122 = arith.mulf %117, %121 : vector<8x8xf32>
    %123 = arith.truncf %122 : vector<8x8xf32> to vector<8x8xbf16>
    %124 = vector.extract_strided_slice %53 {offsets = [0, 96], sizes = [8, 32], strides = [1, 1]} : vector<8x128xbf16> to vector<8x32xbf16>
    %cst_48 = arith.constant dense<0.000000e+00> : vector<8x32xf32>
    %125 = tpu.matmul %123, %124, %cst_48 {dimension_numbers = #tpu.dot_dimension_numbers<[1], [0], [0], [1], [0, 0, 1, 1], [], []>} : vector<8x8xbf16>, vector<8x32xbf16>, vector<8x32xf32> -> vector<8x32xf32>
    %126 = tpu.concatenate %71, %89, %107, %125 in 1 : vector<8x32xf32>, vector<8x32xf32>, vector<8x32xf32>, vector<8x32xf32> -> vector<8x128xf32>
    %127 = arith.truncf %126 : vector<8x128xf32> to vector<8x128xbf16>
    %c0_49 = arith.constant 0 : index
    %c0_50 = arith.constant 0 : index
    %c0_51 = arith.constant 0 : index
    %128 = vector.load %arg10[%c0_49, %c0_50, %c0_51] : memref<1x128x128xbf16, #tpu.memory_space<vmem>>, vector<1x128x128xbf16>
    %129 = vector.shape_cast %128 : vector<1x128x128xbf16> to vector<128x128xbf16>
    %cst_52 = arith.constant dense<0.000000e+00> : vector<8x128xf32>
    %130 = tpu.matmul %127, %129, %cst_52 {dimension_numbers = #tpu.dot_dimension_numbers<[1], [0], [0], [1], [0, 0, 1, 1], [], []>} : vector<8x128xbf16>, vector<128x128xbf16>, vector<8x128xf32> -> vector<8x128xf32>
    %c0_53 = arith.constant 0 : index
    %c0_54 = arith.constant 0 : index
    %c0_55 = arith.constant 0 : index
    %131 = vector.load %arg11[%c0_53, %c0_54, %c0_55] : memref<1x1x128xf32, #tpu.memory_space<vmem>>, vector<1x1x128xf32>
    %132 = vector.shape_cast %131 : vector<1x1x128xf32> to vector<1x128xf32>
    %133 = vector.broadcast %132 : vector<1x128xf32> to vector<8x128xf32>
    %134 = arith.addf %130, %133 : vector<8x128xf32>
    %135 = arith.addf %4, %134 : vector<8x128xf32>
    %cst_56 = arith.constant dense<0.000000e+00> : vector<8xf32>
    %136 = vector.multi_reduction <add>, %135, %cst_56 [1] : vector<8x128xf32> to vector<8xf32>
    %137 = vector.shape_cast %136 : vector<8xf32> to vector<8x1xf32>
    %cst_57 = arith.constant 1.280000e+02 : f32
    %138 = vector.broadcast %cst_57 : f32 to vector<8x1xf32>
    %139 = arith.divf %137, %138 : vector<8x1xf32>
    %140 = vector.broadcast %139 : vector<8x1xf32> to vector<8x128xf32>
    %141 = arith.subf %135, %140 : vector<8x128xf32>
    %142 = arith.mulf %141, %141 : vector<8x128xf32>
    %cst_58 = arith.constant dense<0.000000e+00> : vector<8xf32>
    %143 = vector.multi_reduction <add>, %142, %cst_58 [1] : vector<8x128xf32> to vector<8xf32>
    %144 = vector.shape_cast %143 : vector<8xf32> to vector<8x1xf32>
    %cst_59 = arith.constant 1.270000e+02 : f32
    %145 = vector.broadcast %cst_59 : f32 to vector<8x1xf32>
    %146 = arith.divf %144, %145 : vector<8x1xf32>
    %147 = math.sqrt %146 : vector<8x1xf32>
    %cst_60 = arith.constant 9.99999997E-7 : f32
    %148 = vector.broadcast %cst_60 : f32 to vector<8x1xf32>
    %149 = arith.addf %147, %148 : vector<8x1xf32>
    %150 = tpu.reciprocal %149 {approx = true} : vector<8x1xf32> -> vector<8x1xf32>
    %c0_61 = arith.constant 0 : index
    %c0_62 = arith.constant 0 : index
    %c0_63 = arith.constant 0 : index
    %151 = vector.load %arg12[%c0_61, %c0_62, %c0_63] : memref<1x1x128xf32, #tpu.memory_space<vmem>>, vector<1x1x128xf32>
    %152 = vector.shape_cast %151 : vector<1x1x128xf32> to vector<1x128xf32>
    %153 = vector.broadcast %139 : vector<8x1xf32> to vector<8x128xf32>
    %154 = arith.subf %135, %153 : vector<8x128xf32>
    %155 = vector.broadcast %152 : vector<1x128xf32> to vector<8x128xf32>
    %156 = arith.mulf %155, %154 : vector<8x128xf32>
    %157 = vector.broadcast %150 : vector<8x1xf32> to vector<8x128xf32>
    %158 = arith.mulf %156, %157 : vector<8x128xf32>
    %c0_64 = arith.constant 0 : index
    %c0_65 = arith.constant 0 : index
    %c0_66 = arith.constant 0 : index
    %159 = vector.load %arg13[%c0_64, %c0_65, %c0_66] : memref<1x1x128xf32, #tpu.memory_space<vmem>>, vector<1x1x128xf32>
    %160 = vector.shape_cast %159 : vector<1x1x128xf32> to vector<1x128xf32>
    %161 = vector.broadcast %160 : vector<1x128xf32> to vector<8x128xf32>
    %162 = arith.addf %158, %161 : vector<8x128xf32>
    %163 = arith.truncf %162 : vector<8x128xf32> to vector<8x128xbf16>
    %c0_67 = arith.constant 0 : index
    %c0_68 = arith.constant 0 : index
    %c0_69 = arith.constant 0 : index
    %164 = vector.load %arg14[%c0_67, %c0_68, %c0_69] : memref<1x128x128xbf16, #tpu.memory_space<vmem>>, vector<1x128x128xbf16>
    %165 = vector.shape_cast %164 : vector<1x128x128xbf16> to vector<128x128xbf16>
    %cst_70 = arith.constant dense<0.000000e+00> : vector<8x128xf32>
    %166 = tpu.matmul %163, %165, %cst_70 {dimension_numbers = #tpu.dot_dimension_numbers<[1], [0], [0], [1], [0, 0, 1, 1], [], []>} : vector<8x128xbf16>, vector<128x128xbf16>, vector<8x128xf32> -> vector<8x128xf32>
    %c0_71 = arith.constant 0 : index
    %c0_72 = arith.constant 0 : index
    %c0_73 = arith.constant 0 : index
    %167 = vector.load %arg15[%c0_71, %c0_72, %c0_73] : memref<1x1x128xf32, #tpu.memory_space<vmem>>, vector<1x1x128xf32>
    %168 = vector.shape_cast %167 : vector<1x1x128xf32> to vector<1x128xf32>
    %169 = vector.broadcast %168 : vector<1x128xf32> to vector<8x128xf32>
    %170 = arith.addf %166, %169 : vector<8x128xf32>
    %cst_74 = arith.constant 0.176776692 : f32
    %171 = vector.broadcast %cst_74 : f32 to vector<8x128xf32>
    %172 = arith.mulf %170, %171 : vector<8x128xf32>
    %173 = arith.truncf %6 : vector<8x128xf32> to vector<8x128xbf16>
    %c0_75 = arith.constant 0 : index
    %c0_76 = arith.constant 0 : index
    %c0_77 = arith.constant 0 : index
    %174 = vector.load %arg16[%c0_75, %c0_76, %c0_77] : memref<1x128x256xbf16, #tpu.memory_space<vmem>>, vector<1x128x256xbf16>
    %175 = vector.shape_cast %174 : vector<1x128x256xbf16> to vector<128x256xbf16>
    %cst_78 = arith.constant dense<0.000000e+00> : vector<8x256xf32>
    %176 = tpu.matmul %173, %175, %cst_78 {dimension_numbers = #tpu.dot_dimension_numbers<[1], [0], [0], [1], [0, 0, 1, 1], [], []>} : vector<8x128xbf16>, vector<128x256xbf16>, vector<8x256xf32> -> vector<8x256xf32>
    %c0_79 = arith.constant 0 : index
    %c0_80 = arith.constant 0 : index
    %c0_81 = arith.constant 0 : index
    %177 = vector.load %arg17[%c0_79, %c0_80, %c0_81] : memref<1x1x256xf32, #tpu.memory_space<vmem>>, vector<1x1x256xf32>
    %178 = vector.shape_cast %177 : vector<1x1x256xf32> to vector<1x256xf32>
    %179 = vector.broadcast %178 : vector<1x256xf32> to vector<8x256xf32>
    %180 = arith.addf %176, %179 : vector<8x256xf32>
    %181 = vector.extract_strided_slice %180 {offsets = [0, 0], sizes = [8, 128], strides = [1, 1]} : vector<8x256xf32> to vector<8x128xf32>
    %182 = vector.extract_strided_slice %180 {offsets = [0, 128], sizes = [8, 128], strides = [1, 1]} : vector<8x256xf32> to vector<8x128xf32>
    %c0_82 = arith.constant 0 : index
    %c0_83 = arith.constant 0 : index
    %c0_84 = arith.constant 0 : index
    %c0_85 = arith.constant 0 : index
    %183 = vector.load %arg5[%c0_82, %c0_83, %c0_84, %c0_85] : memref<1x1x8x8xf32, #tpu.memory_space<vmem>>, vector<1x1x8x8xf32>
    %184 = vector.shape_cast %183 : vector<1x1x8x8xf32> to vector<8x8xf32>
    %cst_86 = arith.constant 0.000000e+00 : f32
    %185 = vector.broadcast %cst_86 : f32 to vector<8x8xf32>
    %186 = arith.cmpf one, %184, %185 : vector<8x8xf32>
    %187 = arith.truncf %172 : vector<8x128xf32> to vector<8x128xbf16>
    %188 = arith.truncf %181 : vector<8x128xf32> to vector<8x128xbf16>
    %189 = arith.truncf %182 : vector<8x128xf32> to vector<8x128xbf16>
    %190 = vector.extract_strided_slice %187 {offsets = [0, 0], sizes = [8, 32], strides = [1, 1]} : vector<8x128xbf16> to vector<8x32xbf16>
    %191 = vector.extract_strided_slice %188 {offsets = [0, 0], sizes = [8, 32], strides = [1, 1]} : vector<8x128xbf16> to vector<8x32xbf16>
    %cst_87 = arith.constant dense<0.000000e+00> : vector<8x8xf32>
    %192 = tpu.matmul %190, %191, %cst_87 {dimension_numbers = #tpu.dot_dimension_numbers<[1], [1], [0], [0], [0, 0, 1, 0], [], []>} : vector<8x32xbf16>, vector<8x32xbf16>, vector<8x8xf32> -> vector<8x8xf32>
    %cst_88 = arith.constant -1.000000e+09 : f32
    %193 = vector.broadcast %cst_88 : f32 to vector<8x8xf32>
    %194 = arith.select %186, %192, %193 : vector<8x8xi1>, vector<8x8xf32>
    %cst_89 = arith.constant dense<0xFF800000> : vector<8xf32>
    %195 = vector.multi_reduction <maximumf>, %194, %cst_89 [1] : vector<8x8xf32> to vector<8xf32>
    %196 = vector.shape_cast %195 : vector<8xf32> to vector<8x1xf32>
    %197 = vector.broadcast %196 : vector<8x1xf32> to vector<8x8xf32>
    %198 = arith.subf %194, %197 : vector<8x8xf32>
    %199 = math.exp %198 : vector<8x8xf32>
    %cst_90 = arith.constant dense<0.000000e+00> : vector<8xf32>
    %200 = vector.multi_reduction <add>, %199, %cst_90 [1] : vector<8x8xf32> to vector<8xf32>
    %201 = vector.shape_cast %200 : vector<8xf32> to vector<8x1xf32>
    %202 = tpu.reciprocal %201 {approx = true} : vector<8x1xf32> -> vector<8x1xf32>
    %203 = vector.broadcast %202 : vector<8x1xf32> to vector<8x8xf32>
    %204 = arith.mulf %199, %203 : vector<8x8xf32>
    %205 = arith.truncf %204 : vector<8x8xf32> to vector<8x8xbf16>
    %206 = vector.extract_strided_slice %189 {offsets = [0, 0], sizes = [8, 32], strides = [1, 1]} : vector<8x128xbf16> to vector<8x32xbf16>
    %cst_91 = arith.constant dense<0.000000e+00> : vector<8x32xf32>
    %207 = tpu.matmul %205, %206, %cst_91 {dimension_numbers = #tpu.dot_dimension_numbers<[1], [0], [0], [1], [0, 0, 1, 1], [], []>} : vector<8x8xbf16>, vector<8x32xbf16>, vector<8x32xf32> -> vector<8x32xf32>
    %208 = vector.extract_strided_slice %187 {offsets = [0, 32], sizes = [8, 32], strides = [1, 1]} : vector<8x128xbf16> to vector<8x32xbf16>
    %209 = vector.extract_strided_slice %188 {offsets = [0, 32], sizes = [8, 32], strides = [1, 1]} : vector<8x128xbf16> to vector<8x32xbf16>
    %cst_92 = arith.constant dense<0.000000e+00> : vector<8x8xf32>
    %210 = tpu.matmul %208, %209, %cst_92 {dimension_numbers = #tpu.dot_dimension_numbers<[1], [1], [0], [0], [0, 0, 1, 0], [], []>} : vector<8x32xbf16>, vector<8x32xbf16>, vector<8x8xf32> -> vector<8x8xf32>
    %cst_93 = arith.constant -1.000000e+09 : f32
    %211 = vector.broadcast %cst_93 : f32 to vector<8x8xf32>
    %212 = arith.select %186, %210, %211 : vector<8x8xi1>, vector<8x8xf32>
    %cst_94 = arith.constant dense<0xFF800000> : vector<8xf32>
    %213 = vector.multi_reduction <maximumf>, %212, %cst_94 [1] : vector<8x8xf32> to vector<8xf32>
    %214 = vector.shape_cast %213 : vector<8xf32> to vector<8x1xf32>
    %215 = vector.broadcast %214 : vector<8x1xf32> to vector<8x8xf32>
    %216 = arith.subf %212, %215 : vector<8x8xf32>
    %217 = math.exp %216 : vector<8x8xf32>
    %cst_95 = arith.constant dense<0.000000e+00> : vector<8xf32>
    %218 = vector.multi_reduction <add>, %217, %cst_95 [1] : vector<8x8xf32> to vector<8xf32>
    %219 = vector.shape_cast %218 : vector<8xf32> to vector<8x1xf32>
    %220 = tpu.reciprocal %219 {approx = true} : vector<8x1xf32> -> vector<8x1xf32>
    %221 = vector.broadcast %220 : vector<8x1xf32> to vector<8x8xf32>
    %222 = arith.mulf %217, %221 : vector<8x8xf32>
    %223 = arith.truncf %222 : vector<8x8xf32> to vector<8x8xbf16>
    %224 = vector.extract_strided_slice %189 {offsets = [0, 32], sizes = [8, 32], strides = [1, 1]} : vector<8x128xbf16> to vector<8x32xbf16>
    %cst_96 = arith.constant dense<0.000000e+00> : vector<8x32xf32>
    %225 = tpu.matmul %223, %224, %cst_96 {dimension_numbers = #tpu.dot_dimension_numbers<[1], [0], [0], [1], [0, 0, 1, 1], [], []>} : vector<8x8xbf16>, vector<8x32xbf16>, vector<8x32xf32> -> vector<8x32xf32>
    %226 = vector.extract_strided_slice %187 {offsets = [0, 64], sizes = [8, 32], strides = [1, 1]} : vector<8x128xbf16> to vector<8x32xbf16>
    %227 = vector.extract_strided_slice %188 {offsets = [0, 64], sizes = [8, 32], strides = [1, 1]} : vector<8x128xbf16> to vector<8x32xbf16>
    %cst_97 = arith.constant dense<0.000000e+00> : vector<8x8xf32>
    %228 = tpu.matmul %226, %227, %cst_97 {dimension_numbers = #tpu.dot_dimension_numbers<[1], [1], [0], [0], [0, 0, 1, 0], [], []>} : vector<8x32xbf16>, vector<8x32xbf16>, vector<8x8xf32> -> vector<8x8xf32>
    %cst_98 = arith.constant -1.000000e+09 : f32
    %229 = vector.broadcast %cst_98 : f32 to vector<8x8xf32>
    %230 = arith.select %186, %228, %229 : vector<8x8xi1>, vector<8x8xf32>
    %cst_99 = arith.constant dense<0xFF800000> : vector<8xf32>
    %231 = vector.multi_reduction <maximumf>, %230, %cst_99 [1] : vector<8x8xf32> to vector<8xf32>
    %232 = vector.shape_cast %231 : vector<8xf32> to vector<8x1xf32>
    %233 = vector.broadcast %232 : vector<8x1xf32> to vector<8x8xf32>
    %234 = arith.subf %230, %233 : vector<8x8xf32>
    %235 = math.exp %234 : vector<8x8xf32>
    %cst_100 = arith.constant dense<0.000000e+00> : vector<8xf32>
    %236 = vector.multi_reduction <add>, %235, %cst_100 [1] : vector<8x8xf32> to vector<8xf32>
    %237 = vector.shape_cast %236 : vector<8xf32> to vector<8x1xf32>
    %238 = tpu.reciprocal %237 {approx = true} : vector<8x1xf32> -> vector<8x1xf32>
    %239 = vector.broadcast %238 : vector<8x1xf32> to vector<8x8xf32>
    %240 = arith.mulf %235, %239 : vector<8x8xf32>
    %241 = arith.truncf %240 : vector<8x8xf32> to vector<8x8xbf16>
    %242 = vector.extract_strided_slice %189 {offsets = [0, 64], sizes = [8, 32], strides = [1, 1]} : vector<8x128xbf16> to vector<8x32xbf16>
    %cst_101 = arith.constant dense<0.000000e+00> : vector<8x32xf32>
    %243 = tpu.matmul %241, %242, %cst_101 {dimension_numbers = #tpu.dot_dimension_numbers<[1], [0], [0], [1], [0, 0, 1, 1], [], []>} : vector<8x8xbf16>, vector<8x32xbf16>, vector<8x32xf32> -> vector<8x32xf32>
    %244 = vector.extract_strided_slice %187 {offsets = [0, 96], sizes = [8, 32], strides = [1, 1]} : vector<8x128xbf16> to vector<8x32xbf16>
    %245 = vector.extract_strided_slice %188 {offsets = [0, 96], sizes = [8, 32], strides = [1, 1]} : vector<8x128xbf16> to vector<8x32xbf16>
    %cst_102 = arith.constant dense<0.000000e+00> : vector<8x8xf32>
    %246 = tpu.matmul %244, %245, %cst_102 {dimension_numbers = #tpu.dot_dimension_numbers<[1], [1], [0], [0], [0, 0, 1, 0], [], []>} : vector<8x32xbf16>, vector<8x32xbf16>, vector<8x8xf32> -> vector<8x8xf32>
    %cst_103 = arith.constant -1.000000e+09 : f32
    %247 = vector.broadcast %cst_103 : f32 to vector<8x8xf32>
    %248 = arith.select %186, %246, %247 : vector<8x8xi1>, vector<8x8xf32>
    %cst_104 = arith.constant dense<0xFF800000> : vector<8xf32>
    %249 = vector.multi_reduction <maximumf>, %248, %cst_104 [1] : vector<8x8xf32> to vector<8xf32>
    %250 = vector.shape_cast %249 : vector<8xf32> to vector<8x1xf32>
    %251 = vector.broadcast %250 : vector<8x1xf32> to vector<8x8xf32>
    %252 = arith.subf %248, %251 : vector<8x8xf32>
    %253 = math.exp %252 : vector<8x8xf32>
    %cst_105 = arith.constant dense<0.000000e+00> : vector<8xf32>
    %254 = vector.multi_reduction <add>, %253, %cst_105 [1] : vector<8x8xf32> to vector<8xf32>
    %255 = vector.shape_cast %254 : vector<8xf32> to vector<8x1xf32>
    %256 = tpu.reciprocal %255 {approx = true} : vector<8x1xf32> -> vector<8x1xf32>
    %257 = vector.broadcast %256 : vector<8x1xf32> to vector<8x8xf32>
    %258 = arith.mulf %253, %257 : vector<8x8xf32>
    %259 = arith.truncf %258 : vector<8x8xf32> to vector<8x8xbf16>
    %260 = vector.extract_strided_slice %189 {offsets = [0, 96], sizes = [8, 32], strides = [1, 1]} : vector<8x128xbf16> to vector<8x32xbf16>
    %cst_106 = arith.constant dense<0.000000e+00> : vector<8x32xf32>
    %261 = tpu.matmul %259, %260, %cst_106 {dimension_numbers = #tpu.dot_dimension_numbers<[1], [0], [0], [1], [0, 0, 1, 1], [], []>} : vector<8x8xbf16>, vector<8x32xbf16>, vector<8x32xf32> -> vector<8x32xf32>
    %262 = tpu.concatenate %207, %225, %243, %261 in 1 : vector<8x32xf32>, vector<8x32xf32>, vector<8x32xf32>, vector<8x32xf32> -> vector<8x128xf32>
    %263 = arith.truncf %262 : vector<8x128xf32> to vector<8x128xbf16>
    %c0_107 = arith.constant 0 : index
    %c0_108 = arith.constant 0 : index
    %c0_109 = arith.constant 0 : index
    %264 = vector.load %arg18[%c0_107, %c0_108, %c0_109] : memref<1x128x128xbf16, #tpu.memory_space<vmem>>, vector<1x128x128xbf16>
    %265 = vector.shape_cast %264 : vector<1x128x128xbf16> to vector<128x128xbf16>
    %cst_110 = arith.constant dense<0.000000e+00> : vector<8x128xf32>
    %266 = tpu.matmul %263, %265, %cst_110 {dimension_numbers = #tpu.dot_dimension_numbers<[1], [0], [0], [1], [0, 0, 1, 1], [], []>} : vector<8x128xbf16>, vector<128x128xbf16>, vector<8x128xf32> -> vector<8x128xf32>
    %c0_111 = arith.constant 0 : index
    %c0_112 = arith.constant 0 : index
    %c0_113 = arith.constant 0 : index
    %267 = vector.load %arg19[%c0_111, %c0_112, %c0_113] : memref<1x1x128xf32, #tpu.memory_space<vmem>>, vector<1x1x128xf32>
    %268 = vector.shape_cast %267 : vector<1x1x128xf32> to vector<1x128xf32>
    %269 = vector.broadcast %268 : vector<1x128xf32> to vector<8x128xf32>
    %270 = arith.addf %266, %269 : vector<8x128xf32>
    %271 = arith.addf %135, %270 : vector<8x128xf32>
    %cst_114 = arith.constant dense<0.000000e+00> : vector<8xf32>
    %272 = vector.multi_reduction <add>, %271, %cst_114 [1] : vector<8x128xf32> to vector<8xf32>
    %273 = vector.shape_cast %272 : vector<8xf32> to vector<8x1xf32>
    %cst_115 = arith.constant 1.280000e+02 : f32
    %274 = vector.broadcast %cst_115 : f32 to vector<8x1xf32>
    %275 = arith.divf %273, %274 : vector<8x1xf32>
    %276 = vector.broadcast %275 : vector<8x1xf32> to vector<8x128xf32>
    %277 = arith.subf %271, %276 : vector<8x128xf32>
    %278 = arith.mulf %277, %277 : vector<8x128xf32>
    %cst_116 = arith.constant dense<0.000000e+00> : vector<8xf32>
    %279 = vector.multi_reduction <add>, %278, %cst_116 [1] : vector<8x128xf32> to vector<8xf32>
    %280 = vector.shape_cast %279 : vector<8xf32> to vector<8x1xf32>
    %cst_117 = arith.constant 1.270000e+02 : f32
    %281 = vector.broadcast %cst_117 : f32 to vector<8x1xf32>
    %282 = arith.divf %280, %281 : vector<8x1xf32>
    %283 = math.sqrt %282 : vector<8x1xf32>
    %cst_118 = arith.constant 9.99999997E-7 : f32
    %284 = vector.broadcast %cst_118 : f32 to vector<8x1xf32>
    %285 = arith.addf %283, %284 : vector<8x1xf32>
    %286 = tpu.reciprocal %285 {approx = true} : vector<8x1xf32> -> vector<8x1xf32>
    %c0_119 = arith.constant 0 : index
    %c0_120 = arith.constant 0 : index
    %c0_121 = arith.constant 0 : index
    %287 = vector.load %arg20[%c0_119, %c0_120, %c0_121] : memref<1x1x128xf32, #tpu.memory_space<vmem>>, vector<1x1x128xf32>
    %288 = vector.shape_cast %287 : vector<1x1x128xf32> to vector<1x128xf32>
    %289 = vector.broadcast %275 : vector<8x1xf32> to vector<8x128xf32>
    %290 = arith.subf %271, %289 : vector<8x128xf32>
    %291 = vector.broadcast %288 : vector<1x128xf32> to vector<8x128xf32>
    %292 = arith.mulf %291, %290 : vector<8x128xf32>
    %293 = vector.broadcast %286 : vector<8x1xf32> to vector<8x128xf32>
    %294 = arith.mulf %292, %293 : vector<8x128xf32>
    %c0_122 = arith.constant 0 : index
    %c0_123 = arith.constant 0 : index
    %c0_124 = arith.constant 0 : index
    %295 = vector.load %arg21[%c0_122, %c0_123, %c0_124] : memref<1x1x128xf32, #tpu.memory_space<vmem>>, vector<1x1x128xf32>
    %296 = vector.shape_cast %295 : vector<1x1x128xf32> to vector<1x128xf32>
    %297 = vector.broadcast %296 : vector<1x128xf32> to vector<8x128xf32>
    %298 = arith.addf %294, %297 : vector<8x128xf32>
    %299 = arith.truncf %298 : vector<8x128xf32> to vector<8x128xbf16>
    %c0_125 = arith.constant 0 : index
    %c0_126 = arith.constant 0 : index
    %c0_127 = arith.constant 0 : index
    %300 = vector.load %arg22[%c0_125, %c0_126, %c0_127] : memref<1x128x256xbf16, #tpu.memory_space<vmem>>, vector<1x128x256xbf16>
    %301 = vector.shape_cast %300 : vector<1x128x256xbf16> to vector<128x256xbf16>
    %cst_128 = arith.constant dense<0.000000e+00> : vector<8x256xf32>
    %302 = tpu.matmul %299, %301, %cst_128 {dimension_numbers = #tpu.dot_dimension_numbers<[1], [0], [0], [1], [0, 0, 1, 1], [], []>} : vector<8x128xbf16>, vector<128x256xbf16>, vector<8x256xf32> -> vector<8x256xf32>
    %c0_129 = arith.constant 0 : index
    %c0_130 = arith.constant 0 : index
    %c0_131 = arith.constant 0 : index
    %303 = vector.load %arg23[%c0_129, %c0_130, %c0_131] : memref<1x1x256xf32, #tpu.memory_space<vmem>>, vector<1x1x256xf32>
    %304 = vector.shape_cast %303 : vector<1x1x256xf32> to vector<1x256xf32>
    %305 = vector.broadcast %304 : vector<1x256xf32> to vector<8x256xf32>
    %306 = arith.addf %302, %305 : vector<8x256xf32>
    %cst_132 = arith.constant 0.000000e+00 : f32
    %307 = vector.broadcast %cst_132 : f32 to vector<8x256xf32>
    %308 = arith.maximumf %306, %307 : vector<8x256xf32>
    %309 = arith.truncf %308 : vector<8x256xf32> to vector<8x256xbf16>
    %c0_133 = arith.constant 0 : index
    %c0_134 = arith.constant 0 : index
    %c0_135 = arith.constant 0 : index
    %310 = vector.load %arg24[%c0_133, %c0_134, %c0_135] : memref<1x256x128xbf16, #tpu.memory_space<vmem>>, vector<1x256x128xbf16>
    %311 = vector.shape_cast %310 : vector<1x256x128xbf16> to vector<256x128xbf16>
    %cst_136 = arith.constant dense<0.000000e+00> : vector<8x128xf32>
    %312 = tpu.matmul %309, %311, %cst_136 {dimension_numbers = #tpu.dot_dimension_numbers<[1], [0], [0], [1], [0, 0, 1, 1], [], []>} : vector<8x256xbf16>, vector<256x128xbf16>, vector<8x128xf32> -> vector<8x128xf32>
    %313 = arith.addf %271, %312 : vector<8x128xf32>
    %c0_137 = arith.constant 0 : index
    %c0_138 = arith.constant 0 : index
    %c0_139 = arith.constant 0 : index
    %314 = vector.load %arg25[%c0_137, %c0_138, %c0_139] : memref<1x1x128xf32, #tpu.memory_space<vmem>>, vector<1x1x128xf32>
    %315 = vector.shape_cast %314 : vector<1x1x128xf32> to vector<1x128xf32>
    %316 = vector.broadcast %315 : vector<1x128xf32> to vector<8x128xf32>
    %317 = arith.addf %313, %316 : vector<8x128xf32>
    %c1_i32 = arith.constant 1 : i32
    %318 = arith.cmpi eq, %arg1, %c1_i32 : i32
    %319 = arith.extui %318 : i1 to i32
    %c0_i32_140 = arith.constant 0 : i32
    %320 = arith.cmpi ne, %319, %c0_i32_140 : i32
    scf.if %320 {
      %cst_142 = arith.constant dense<0.000000e+00> : vector<8xf32>
      %324 = vector.multi_reduction <add>, %317, %cst_142 [1] : vector<8x128xf32> to vector<8xf32>
      %325 = vector.shape_cast %324 : vector<8xf32> to vector<8x1xf32>
      %cst_143 = arith.constant 1.280000e+02 : f32
      %326 = vector.broadcast %cst_143 : f32 to vector<8x1xf32>
      %327 = arith.divf %325, %326 : vector<8x1xf32>
      %328 = vector.broadcast %327 : vector<8x1xf32> to vector<8x128xf32>
      %329 = arith.subf %317, %328 : vector<8x128xf32>
      %330 = arith.mulf %329, %329 : vector<8x128xf32>
      %cst_144 = arith.constant dense<0.000000e+00> : vector<8xf32>
      %331 = vector.multi_reduction <add>, %330, %cst_144 [1] : vector<8x128xf32> to vector<8xf32>
      %332 = vector.shape_cast %331 : vector<8xf32> to vector<8x1xf32>
      %cst_145 = arith.constant 1.270000e+02 : f32
      %333 = vector.broadcast %cst_145 : f32 to vector<8x1xf32>
      %334 = arith.divf %332, %333 : vector<8x1xf32>
      %335 = math.sqrt %334 : vector<8x1xf32>
      %cst_146 = arith.constant 9.99999997E-7 : f32
      %336 = vector.broadcast %cst_146 : f32 to vector<8x1xf32>
      %337 = arith.addf %335, %336 : vector<8x1xf32>
      %338 = tpu.reciprocal %337 {approx = true} : vector<8x1xf32> -> vector<8x1xf32>
      %c0_147 = arith.constant 0 : index
      %c0_148 = arith.constant 0 : index
      %339 = vector.load %arg26[%c0_147, %c0_148] : memref<1x128xf32, #tpu.memory_space<vmem>>, vector<1x128xf32>
      %340 = vector.broadcast %327 : vector<8x1xf32> to vector<8x128xf32>
      %341 = arith.subf %317, %340 : vector<8x128xf32>
      %342 = vector.broadcast %339 : vector<1x128xf32> to vector<8x128xf32>
      %343 = arith.mulf %342, %341 : vector<8x128xf32>
      %344 = vector.broadcast %338 : vector<8x1xf32> to vector<8x128xf32>
      %345 = arith.mulf %343, %344 : vector<8x128xf32>
      %c0_149 = arith.constant 0 : index
      %c0_150 = arith.constant 0 : index
      %346 = vector.load %arg27[%c0_149, %c0_150] : memref<1x128xf32, #tpu.memory_space<vmem>>, vector<1x128xf32>
      %347 = vector.broadcast %346 : vector<1x128xf32> to vector<8x128xf32>
      %348 = arith.addf %345, %347 : vector<8x128xf32>
      %c0_151 = arith.constant 0 : index
      %c0_152 = arith.constant 0 : index
      %c0_153 = arith.constant 0 : index
      %349 = vector.load %arg28[%c0_151, %c0_152, %c0_153] : memref<1x8x128xf32, #tpu.memory_space<vmem>>, vector<1x8x128xf32>
      %350 = vector.shape_cast %349 : vector<1x8x128xf32> to vector<8x128xf32>
      %351 = vector.shape_cast %348 : vector<8x128xf32> to vector<1x8x128xf32>
      tpu.vector_store %arg28[%c0_151, %c0_152, %c0_153], %351 {strides = array<i32>} : memref<1x8x128xf32, #tpu.memory_space<vmem>>, vector<1x8x128xf32>,
    } else {
    }
    %true = arith.constant true
    %321 = arith.xori %318, %true : i1
    %322 = arith.extui %321 : i1 to i32
    %c0_i32_141 = arith.constant 0 : i32
    %323 = arith.cmpi ne, %322, %c0_i32_141 : i32
    scf.if %323 {
      %c0_142 = arith.constant 0 : index
      %c0_143 = arith.constant 0 : index
      %c0_144 = arith.constant 0 : index
      %324 = vector.load %arg28[%c0_142, %c0_143, %c0_144] : memref<1x8x128xf32, #tpu.memory_space<vmem>>, vector<1x8x128xf32>
      %325 = vector.shape_cast %324 : vector<1x8x128xf32> to vector<8x128xf32>
      %326 = vector.shape_cast %317 : vector<8x128xf32> to vector<1x8x128xf32>
      tpu.vector_store %arg28[%c0_142, %c0_143, %c0_144], %326 {strides = array<i32>} : memref<1x8x128xf32, #tpu.memory_space<vmem>>, vector<1x8x128xf32>,
    } else {
    }
    return
  }
  func.func @transform_0(%arg0: i32, %arg1: i32) -> (i32, i32, i32) {
    %c0_i32 = arith.constant 0 : i32
    %c0_i32_0 = arith.constant 0 : i32
    %c0_i32_1 = arith.constant 0 : i32
    return %arg0, %c0_i32, %c0_i32_0 : i32, i32, i32
  }
  func.func @transform_1(%arg0: i32, %arg1: i32) -> (i32, i32, i32) {
    %c0_i32 = arith.constant 0 : i32
    %c0_i32_0 = arith.constant 0 : i32
    %c0_i32_1 = arith.constant 0 : i32
    return %arg0, %c0_i32, %c0_i32_0 : i32, i32, i32
  }
  func.func @transform_2(%arg0: i32, %arg1: i32) -> (i32, i32, i32, i32) {
    %c0_i32 = arith.constant 0 : i32
    %c0_i32_0 = arith.constant 0 : i32
    %c0_i32_1 = arith.constant 0 : i32
    %c0_i32_2 = arith.constant 0 : i32
    return %arg0, %c0_i32, %c0_i32_0, %c0_i32_1 : i32, i32, i32, i32
  }
  func.func @transform_3(%arg0: i32, %arg1: i32) -> (i32, i32, i32, i32) {
    %c0_i32 = arith.constant 0 : i32
    %c0_i32_0 = arith.constant 0 : i32
    %c0_i32_1 = arith.constant 0 : i32
    %c0_i32_2 = arith.constant 0 : i32
    return %arg0, %c0_i32, %c0_i32_0, %c0_i32_1 : i32, i32, i32, i32
  }
  func.func @transform_4(%arg0: i32, %arg1: i32) -> (i32, i32, i32) {
    %c0_i32 = arith.constant 0 : i32
    %c0_i32_0 = arith.constant 0 : i32
    %c0_i32_1 = arith.constant 0 : i32
    return %arg1, %c0_i32, %c0_i32_0 : i32, i32, i32
  }
  func.func @transform_5(%arg0: i32, %arg1: i32) -> (i32, i32, i32) {
    %c0_i32 = arith.constant 0 : i32
    %c0_i32_0 = arith.constant 0 : i32
    %c0_i32_1 = arith.constant 0 : i32
    return %arg1, %c0_i32, %c0_i32_0 : i32, i32, i32
  }
  func.func @transform_6(%arg0: i32, %arg1: i32) -> (i32, i32, i32) {
    %c0_i32 = arith.constant 0 : i32
    %c0_i32_0 = arith.constant 0 : i32
    %c0_i32_1 = arith.constant 0 : i32
    return %arg1, %c0_i32, %c0_i32_0 : i32, i32, i32
  }
  func.func @transform_7(%arg0: i32, %arg1: i32) -> (i32, i32, i32) {
    %c0_i32 = arith.constant 0 : i32
    %c0_i32_0 = arith.constant 0 : i32
    %c0_i32_1 = arith.constant 0 : i32
    return %arg1, %c0_i32, %c0_i32_0 : i32, i32, i32
  }
  func.func @transform_8(%arg0: i32, %arg1: i32) -> (i32, i32, i32) {
    %c0_i32 = arith.constant 0 : i32
    %c0_i32_0 = arith.constant 0 : i32
    %c0_i32_1 = arith.constant 0 : i32
    return %arg1, %c0_i32, %c0_i32_0 : i32, i32, i32
  }
  func.func @transform_9(%arg0: i32, %arg1: i32) -> (i32, i32, i32) {
    %c0_i32 = arith.constant 0 : i32
    %c0_i32_0 = arith.constant 0 : i32
    %c0_i32_1 = arith.constant 0 : i32
    return %arg1, %c0_i32, %c0_i32_0 : i32, i32, i32
  }
  func.func @transform_10(%arg0: i32, %arg1: i32) -> (i32, i32, i32) {
    %c0_i32 = arith.constant 0 : i32
    %c0_i32_0 = arith.constant 0 : i32
    %c0_i32_1 = arith.constant 0 : i32
    return %arg1, %c0_i32, %c0_i32_0 : i32, i32, i32
  }
  func.func @transform_11(%arg0: i32, %arg1: i32) -> (i32, i32, i32) {
    %c0_i32 = arith.constant 0 : i32
    %c0_i32_0 = arith.constant 0 : i32
    %c0_i32_1 = arith.constant 0 : i32
    return %arg1, %c0_i32, %c0_i32_0 : i32, i32, i32
  }
  func.func @transform_12(%arg0: i32, %arg1: i32) -> (i32, i32, i32) {
    %c0_i32 = arith.constant 0 : i32
    %c0_i32_0 = arith.constant 0 : i32
    %c0_i32_1 = arith.constant 0 : i32
    return %arg1, %c0_i32, %c0_i32_0 : i32, i32, i32
  }
  func.func @transform_13(%arg0: i32, %arg1: i32) -> (i32, i32, i32) {
    %c0_i32 = arith.constant 0 : i32
    %c0_i32_0 = arith.constant 0 : i32
    %c0_i32_1 = arith.constant 0 : i32
    return %arg1, %c0_i32, %c0_i32_0 : i32, i32, i32
  }
  func.func @transform_14(%arg0: i32, %arg1: i32) -> (i32, i32, i32) {
    %c0_i32 = arith.constant 0 : i32
    %c0_i32_0 = arith.constant 0 : i32
    %c0_i32_1 = arith.constant 0 : i32
    return %arg1, %c0_i32, %c0_i32_0 : i32, i32, i32
  }
  func.func @transform_15(%arg0: i32, %arg1: i32) -> (i32, i32, i32) {
    %c0_i32 = arith.constant 0 : i32
    %c0_i32_0 = arith.constant 0 : i32
    %c0_i32_1 = arith.constant 0 : i32
    return %arg1, %c0_i32, %c0_i32_0 : i32, i32, i32
  }
  func.func @transform_16(%arg0: i32, %arg1: i32) -> (i32, i32, i32) {
    %c0_i32 = arith.constant 0 : i32
    %c0_i32_0 = arith.constant 0 : i32
    %c0_i32_1 = arith.constant 0 : i32
    return %arg1, %c0_i32, %c0_i32_0 : i32, i32, i32
  }
  func.func @transform_17(%arg0: i32, %arg1: i32) -> (i32, i32, i32) {
    %c0_i32 = arith.constant 0 : i32
    %c0_i32_0 = arith.constant 0 : i32
    %c0_i32_1 = arith.constant 0 : i32
    return %arg1, %c0_i32, %c0_i32_0 : i32, i32, i32
  }
  func.func @transform_18(%arg0: i32, %arg1: i32) -> (i32, i32, i32) {
    %c0_i32 = arith.constant 0 : i32
    %c0_i32_0 = arith.constant 0 : i32
    %c0_i32_1 = arith.constant 0 : i32
    return %arg1, %c0_i32, %c0_i32_0 : i32, i32, i32
  }
  func.func @transform_19(%arg0: i32, %arg1: i32) -> (i32, i32, i32) {
    %c0_i32 = arith.constant 0 : i32
    %c0_i32_0 = arith.constant 0 : i32
    %c0_i32_1 = arith.constant 0 : i32
    return %arg1, %c0_i32, %c0_i32_0 : i32, i32, i32
  }
  func.func @transform_20(%arg0: i32, %arg1: i32) -> (i32, i32, i32) {
    %c0_i32 = arith.constant 0 : i32
    %c0_i32_0 = arith.constant 0 : i32
    %c0_i32_1 = arith.constant 0 : i32
    return %arg1, %c0_i32, %c0_i32_0 : i32, i32, i32
  }
  func.func @transform_21(%arg0: i32, %arg1: i32) -> (i32, i32, i32) {
    %c0_i32 = arith.constant 0 : i32
    %c0_i32_0 = arith.constant 0 : i32
    %c0_i32_1 = arith.constant 0 : i32
    return %arg1, %c0_i32, %c0_i32_0 : i32, i32, i32
  }
  func.func @transform_22(%arg0: i32, %arg1: i32) -> (i32, i32, i32) {
    %c0_i32 = arith.constant 0 : i32
    %c0_i32_0 = arith.constant 0 : i32
    %c0_i32_1 = arith.constant 0 : i32
    return %arg1, %c0_i32, %c0_i32_0 : i32, i32, i32
  }
  func.func @transform_23(%arg0: i32, %arg1: i32) -> (i32, i32, i32) {
    %c0_i32 = arith.constant 0 : i32
    %c0_i32_0 = arith.constant 0 : i32
    %c0_i32_1 = arith.constant 0 : i32
    return %arg1, %c0_i32, %c0_i32_0 : i32, i32, i32
  }
  func.func @transform_24(%arg0: i32, %arg1: i32) -> (i32, i32) {
    %c0_i32 = arith.constant 0 : i32
    %c0_i32_0 = arith.constant 0 : i32
    %c0_i32_1 = arith.constant 0 : i32
    return %c0_i32, %c0_i32_0 : i32, i32
  }
  func.func @transform_25(%arg0: i32, %arg1: i32) -> (i32, i32) {
    %c0_i32 = arith.constant 0 : i32
    %c0_i32_0 = arith.constant 0 : i32
    %c0_i32_1 = arith.constant 0 : i32
    return %c0_i32, %c0_i32_0 : i32, i32
  }
  func.func @transform_26(%arg0: i32, %arg1: i32) -> (i32, i32, i32) {
    %c0_i32 = arith.constant 0 : i32
    %c0_i32_0 = arith.constant 0 : i32
    %c0_i32_1 = arith.constant 0 : i32
    return %arg0, %c0_i32, %c0_i32_0 : i32, i32, i32
  }
}

</mosaic_0001>

<bundles_post_ra>
// kernel: decoder_forward.1
= control target key start
LH: loop header
LB: loop body
LE: loop exit
PB: predicated region body
PF: predicated region fallthrough
CT: control target
= control target key end

     0   :  { %s6648_s0 = inlined_call_operand.hbm [shape: f32[2,8,128], index: 0, kind: input, shape index: {}]   ;;  %s6649_s1 = inlined_call_operand.hbm [shape: f32[2,8,128], index: 1, kind: input, shape index: {}]   ;;  %s6650_s2 = inlined_call_operand.hbm [shape: f32[2,1,8,8], index: 2, kind: input, shape index: {}]   ;;  %s6651_s3 = inlined_call_operand.hbm [shape: f32[2,1,8,8], index: 3, kind: input, shape index: {}]   ;;  %s6652_s4 = inlined_call_operand.vmem [shape: f32[2,1,128], index: 4, kind: input, shape index: {}]   ;;  %s6653_s5 = inlined_call_operand.vmem [shape: f32[2,1,128], index: 5, kind: input, shape index: {}]   ;;  %s6654_s6 = inlined_call_operand.hbm [shape: bf16[2,128,384], index: 6, kind: input, shape index: {}]   ;;  %s6655_s7 = inlined_call_operand.vmem [shape: f32[2,1,384], index: 7, kind: input, shape index: {}]   ;;  %s6656_s8 = inlined_call_operand.hbm [shape: bf16[2,128,128], index: 8, kind: input, shape index: {}]   ;;  %s6657_s9 = inlined_call_operand.vmem [shape: f32[2,1,128], index: 9, kind: input, shape index: {}]   ;;  %s6658_s10 = inlined_call_operand.vmem [shape: f32[2,1,128], index: 10, kind: input, shape index: {}]   ;;  %s6659_s11 = inlined_call_operand.vmem [shape: f32[2,1,128], index: 11, kind: input, shape index: {}]   ;;  %s6660_s12 = inlined_call_operand.hbm [shape: bf16[2,128,128], index: 12, kind: input, shape index: {}]   ;;  %s6661_s13 = inlined_call_operand.vmem [shape: f32[2,1,128], index: 13, kind: input, shape index: {}]   ;;  %s6662_s14 = inlined_call_operand.hbm [shape: bf16[2,128,256], index: 14, kind: input, shape index: {}]   ;;  %s6663_s15 = inlined_call_operand.vmem [shape: f32[2,1,256], index: 15, kind: input, shape index: {}]   ;;  %s6664_s16 = inlined_call_operand.hbm [shape: bf16[2,128,128], index: 16, kind: input, shape index: {}]   ;;  %s6665_s17 = inlined_call_operand.hbm [shape: f32[2,1,128], index: 17, kind: input, shape index: {}]   ;;  %s6666_s18 = inlined_call_operand.vmem [shape: f32[2,1,128], index: 18, kind: input, shape index: {}]   ;;  %s6667_s19 = inlined_call_operand.vmem [shape: f32[2,1,128], index: 19, kind: input, shape index: {}]   ;;  %s6668_s20 = inlined_call_operand.hbm [shape: bf16[2,128,256], index: 20, kind: input, shape index: {}]   ;;  %s6669_s21 = inlined_call_operand.vmem [shape: f32[2,1,256], index: 21, kind: input, shape index: {}]   ;;  %s6670_s22 = inlined_call_operand.hbm [shape: bf16[2,256,128], index: 22, kind: input, shape index: {}]   ;;  %s6671_s23 = inlined_call_operand.hbm [shape: f32[2,1,128], index: 23, kind: input, shape index: {}]   ;;  %s6672_s24 = inlined_call_operand.vmem [shape: f32[1,128], index: 24, kind: input, shape index: {}]   ;;  %s6673_s25 = inlined_call_operand.vmem [shape: f32[1,128], index: 25, kind: input, shape index: {}]   ;;  %s6674_s26 = inlined_call_operand.hbm [shape: f32[2,8,128], index: 26, kind: output, shape index: {}]  }
   0x1   :  { %6732 = sst [smem:[#allocation55_spill]] %s6648_s0 }
   0x2   :  { %6733 = sst [smem:[#allocation56_spill]] %s6649_s1 }
   0x3   :  { %6734 = sst [smem:[#allocation57_spill]] %s6650_s2 }
   0x4   :  { %6735 = sst [smem:[#allocation58_spill]] %s6651_s3 }
   0x5   :  { %6736 = sst [smem:[#allocation59_spill]] %s6652_s4 }
   0x6   :  { %6737 = sst [smem:[#allocation60_spill]] %s6653_s5 }
   0x7   :  { %6738 = sst [smem:[#allocation61_spill]] %s6654_s6 }
   0x8   :  { %6739 = sst [smem:[#allocation62_spill]] %s6655_s7 }
   0x9   :  { %6740 = sst [smem:[#allocation63_spill]] %s6656_s8 }
   0xa   :  { %6741 = sst [smem:[#allocation64_spill]] %s6657_s9 }
   0xb   :  { %6742 = sst [smem:[#allocation65_spill]] %s6658_s10 }
   0xc   :  { %6743 = sst [smem:[#allocation66_spill]] %s6659_s11 }
   0xd   :  { %6744 = sst [smem:[#allocation67_spill]] %s6660_s12 }
   0xe   :  { %6745 = sst [smem:[#allocation68_spill]] %s6661_s13 }
   0xf   :  { %6746 = sst [smem:[#allocation69_spill]] %s6662_s14 }
  0x10   :  { %6747 = sst [smem:[#allocation70_spill]] %s6663_s15 }
  0x11   :  { %6748 = sst [smem:[#allocation71_spill]] %s6664_s16 }
  0x12   :  { %6749 = sst [smem:[#allocation72_spill]] %s6665_s17 }
  0x13   :  { %6750 = sst [smem:[#allocation73_spill]] %s6666_s18 }
  0x14   :  { %6751 = sst [smem:[#allocation74_spill]] %s6667_s19 }
  0x15   :  { %6752 = sst [smem:[#allocation75_spill]] %s6668_s20 }
  0x16   :  { %6753 = sst [smem:[#allocation76_spill]] %s6669_s21 }
  0x17   :  { %6754 = sst [smem:[#allocation77_spill]] %s6670_s22 }
  0x18   :  { %6755 = sst [smem:[#allocation78_spill]] %s6671_s23 }
  0x19   :  { %6756 = sst [smem:[#allocation79_spill]] %s6672_s24 }
  0x1a   :  { %6757 = sst [smem:[#allocation80_spill]] %s6673_s25 }
  0x1b   :  { %6758 = sst [smem:[#allocation81_spill]] %s6674_s26 }
  0x1c   :  { %31 = vsyncpa [#allocation3], 0 }
  0x1d   :  { %33 = vsyncpa [#allocation3 + $0x1], 0 }
  0x1e   :  { %34 = vsyncpa [#allocation6], 0 }
  0x1f   :  { %36 = vsyncpa [#allocation6 + $0x1], 0 }
  0x20   :  { %37 = vsyncpa [#allocation9], 0 }
  0x21   :  { %39 = vsyncpa [#allocation9 + $0x1], 0 }
  0x22   :  { %40 = vsyncpa [#allocation12], 0 }
  0x23   :  { %42 = vsyncpa [#allocation12 + $0x1], 0 }
  0x24   :  { %43 = vsyncpa [#allocation15], 0 }
  0x25   :  { %45 = vsyncpa [#allocation15 + $0x1], 0 }
  0x26   :  { %46 = vsyncpa [#allocation18], 0 }
  0x27   :  { %48 = vsyncpa [#allocation18 + $0x1], 0 }
  0x28   :  { %49 = vsyncpa [#allocation21], 0 }
  0x29   :  { %51 = vsyncpa [#allocation21 + $0x1], 0 }
  0x2a   :  { %52 = vsyncpa [#allocation4], 0 }
  0x2b   :  { %54 = vsyncpa [#allocation4 + $0x1], 0  ;;  %s5474_s27 = smov 0   ;;  %s5476_s3 = smov 0  }
  0x2c   :  { %s5478_s7 = smov 0   ;;  %s5480_s28 = smov 0  }
  0x2d   :  { %s5482_s8 = smov 0   ;;  %s5484_s4 = smov 0  }
  0x2e   :  { %s5486_s29 = smov 0   ;;  %s5488_s0 = smov 0  }
  0x2f   :  { %s5490_s9 = smov 0   ;;  %s5492_s30 = smov 0  }
  0x30   :  { %s5494_s2 = smov 0  }
  0x31 LB: > { %6759 = sst [smem:[#allocation33_spill]] %s5275_s3  ;;  %s5530_s5 = sadd.s32 4294967295, %s5311_s2   ;;  %s5311_s2 = sphi %s5494_s2, %s60_s2   ;;  %s5307_s30 = sphi %s5492_s30, %s6882_s30   ;;  %s5303_s9 = sphi %s5490_s9, %s6881_s9   ;;  %s5299_s0 = sphi %s5488_s0, %s6880_s0   ;;  %s5295_s29 = sphi %s5486_s29, %s6879_s29   ;;  %s5291_s4 = sphi %s5484_s4, %s6878_s4   ;;  %s5287_s8 = sphi %s5482_s8, %s6877_s8   ;;  %s5283_s28 = sphi %s5480_s28, %s6876_s28   ;;  %s5279_s7 = sphi %s5478_s7, %s6875_s7   ;;  %s5275_s3 = sphi %s5476_s3, %s6874_s3   ;;  %s5271_s27 = sphi %s5474_s27, %s6873_s27  }
  0x32   : > { %6760 = sst [smem:[#allocation34_spill]] %s5279_s7  ;;  %s4043_s10 = sadd.s32 4294967294, %s5311_s2  }
  0x33   : > { %6761 = sst [smem:[#allocation35_spill]] %s5283_s28  ;;  %s69_s6 = sadd.s32 1, %s5303_s9 }
  0x34   : > { %6762 = sst [smem:[#allocation36_spill]] %s5287_s8  ;;  %s72_s1 = sadd.s32 1, %s5307_s30 }
  0x35   : > { %6763 = sst [smem:[#allocation37_spill]] %s5291_s4  ;;  %p70_p0 = scmp.ge.s32.totalorder %s69_s6, 2 }
  0x36   : > { %6764 = sst [smem:[#allocation38_spill]] %s5295_s29  ;;  %s79_s26 = sadd.s32 1, %s5291_s4 }
  0x37   : > { %6765 = sst [smem:[#allocation39_spill]] %s5299_s0  ;;  %p86_p1 = scmp.ne.s32.totalorder %s5291_s4, %s5287_s8 }
  0x38   : > { %6766 = sst [smem:[#allocation40_spill]] %s5303_s9  ;;  %p87_p2 = scmp.eq.s32.totalorder %s5311_s2, 0 }
  0x39   : > { %6767 = sst [smem:[#allocation41_spill]] %s5307_s30  ;;  %s6884_s6 = smov (%p70_p0, %s69_s6), 0 }
  0x3a   : > { %6768 = sst [smem:[#allocation42_spill]] %s5311_s2  ;;  %s6886_s1 = smov (!%p70_p0, %s72_s1), %s5307_s30 }
  0x3b   : > { %6769 = sst [smem:[#allocation43_spill]] %s5530_s5  ;;  %p5547_p3 = por %p87_p2, %p86_p1 }
  0x3c   : > { %6770 = sst [smem:[#allocation44_spill]] %s6884_s6  ;;  %p6683_p4 = scmp.ne.s32.totalorder %s5287_s8, %s5283_s28 }
  0x3d   : > { %s6771_s0 = scalar_select %p5547_p3, 1, 0 }
  0x3e   : > { %p74_p5 = scmp.ge.s32.totalorder %s6886_s1, 2  ;;  %p93_p6 = scmp.eq.s32.totalorder %s5530_s5, 0 }
  0x3f   : > { %s232_s25 = ssub.s32 %s5303_s9, %s6884_s6  ;;  %s235_s24 = sadd.s32 1, %s5279_s7 }
  0x40   : > { %s6888_s1 = smov (%p74_p5, %s6886_s1), 0  ;;  %p5564_p7 = por %p93_p6, %p6683_p4 }
  0x41   : > { %6772 = sst [smem:[#allocation45_spill]] %s6888_s1  ;;  %p233_p8 = scmp.eq.s32.totalorder %s232_s25, 0 }
  0x42   : > { %s6773_s21 = scalar_select %p5564_p7, 1, 0 }
  0x43   : > { %s76_s19 = ssub.s32 %s5307_s30, %s6888_s1  ;;  %p242_p9 = scmp.ne.s32.totalorder %s5279_s7, %s5275_s3 }
  0x44   : > { %6774 = sst [smem:[#allocation46_spill]] %s6773_s21  ;;  %p77_p10 = scmp.eq.s32.totalorder %s76_s19, 0 }
  0x45   : > { %p248_p11 = scmp.ne.s32.totalorder %s5275_s3, %s5271_s27  ;;  %p5582_p12 = por %p242_p9, %p87_p2 }
  0x46   : > { %s5575_s15 = scalar_select %p233_p8, %s5279_s7, %s235_s24  }
  0x47   : > { %s5578_s6 = scalar_select %p77_p10, %s5291_s4, %s79_s26  }
  0x48   : > { %6775 = sst [smem:[#allocation47_spill]] %s5575_s15  ;;  %p5588_p13 = por %p248_p11, %p93_p6 }
  0x49   : > { %6776 = sst [smem:[#allocation48_spill]] %s5578_s6  ;;  %p756_p0 = scmp.eq.s32.totalorder %s5530_s5, 3 }
  0x4a   : > { %s6777_s18 = scalar_select %p5582_p12, 1, 0 }
  0x4b   : > { %s6778_s13 = scalar_select %p5588_p13, 1, 0 }
  0x4c   : > { %p762_p5 = scmp.eq.s32.totalorder %s4043_s10, 3  ;;  %p5596_p4 = por %p756_p0, %p86_p1 }
  0x4d   : > { %6779 = sst [smem:[#allocation49_spill]] %s6778_s13  ;;  %p6782_p8 = scmp.ne.s32.totalorder %s5287_s8, %s5283_s28 }
  0x4e   : > { %s6780_s19 = scalar_select %p5596_p4, 1, 0 }
  0x4f   : > { %p5603_p10 = por %p762_p5, %p6782_p8  ;;  %p4045_p2 = scmp.ge.s32.totalorder %s5311_s2, 4 }
  0x50   : > { %6781 = sst [smem:[#allocation50_spill]] %s6780_s19  ;;  %s6690_s25 = sand.u32 (!%p4045_p2), 1, %s5291_s4  }
  0x51   : > { %s6783_s24 = scalar_select %p5603_p10, 1, 0 }
  0x52   : > { %784 = sbr.rel (%p4045_p2) target bundleno = 455 (0x1c7), region = 24  ;;  %s5610_s26 = sshll.u32 (!%p4045_p2), %s5307_s30, 7 }
  0x53   : > { %6784 = sst [smem:[#allocation51_spill]] %s6783_s24  ;;  %s5614_s27 = sshll.u32 (!%p4045_p2), %s6690_s25, 3 }
  0x54   : > { %s5617_s10 = sand.u32 (!%p4045_p2), 1, %s5311_s2   ;;  %s6785_s15 = sld [smem:[#allocation56_spill]] (!%p4045_p2) }
  0x55   : > { %s810_s28 = scalar_lea.vmem (!%p4045_p2), [#allocation5], %s5614_s27 }
  0x56   : > { %s817_s30 = sshll.u32 (!%p4045_p2), %s810_s28, 4  ;;  %s818_s30 = int_to_ptr.vmem [resolvable:$true] %s817_s30 }
  0x5a   : > { %s5623_s24 = scalar_lea.hbm %s6785_s15, %s5610_s26  ;;  %s4801_s6 = scalar_lea.hbm %s6785_s15, 256 }
  0x5b   : > { %s4797_s11 = scalar_lea.hbm %s5623_s24, 128  ;;  %p4802_p11 = scmp.lt.u32.totalorder %s5623_s24, %s6785_s15 }
  0x5c   : > { %p4798_p1 = scmp.ne.s32.totalorder %s5623_s24, %s4797_s11  ;;  %p4803_p0 = scmp.lt.u32.totalorder %s4801_s6, %s4797_s11 }
  0x5d   : > { %p4805_p8 = scmp.lt.u32.totalorder %s4797_s11, %s5623_s24 }
  0x5e   : > { %p4799_p6 = pnand %p4798_p1, %p5547_p3  ;;  %p4804_p5 = por %p4803_p0, %p4802_p11 }
  0x60   : > { %p4800_p9 = pneg %p4799_p6  ;;  %p4806_p2 = por %p4805_p8, %p4804_p5 }
  0x62   : > { %p4807_p10 = pnand %p4806_p2, %p4800_p9 }
  0x64   : > { %4810 = shalt.err (!%p4807_p10)
}
  0x65   : > { %s4811_s28 = scalar_lea.vmem %s818_s30, 128  ;;  %s5313_s19 = smov [#allocation5]  }
  0x66   : > { %p4812_p4 = scmp.ne.s32.totalorder %s818_s30, %s4811_s28  ;;  %s4815_s3 = sshll.u32 %s5313_s19, 4  ;;  %s4816_s3 = int_to_ptr.vmem [resolvable:$false] %s4815_s3 }
  0x67   : > { %s4817_s29 = scalar_lea.vmem %s4816_s3, 256  ;;  %p4818_p13 = scmp.lt.s32.totalorder %s818_s30, %s4816_s3 }
  0x68   : > { %p4813_p1 = pnand %p4812_p4, %p5547_p3  ;;  %p4819_p7 = scmp.lt.s32.totalorder %s4817_s29, %s4811_s28 }
  0x6a   : > { %p4814_p6 = pneg %p4813_p1  ;;  %p4820_p12 = por %p4819_p7, %p4818_p13 }
  0x6c   : > { %p4821_p0 = pnand %p4820_p12, %p4814_p6 }
  0x6e   : > { %4824 = shalt.err (!%p4821_p0)
}
  0x6f   : > { %s6786_s11 = scalar_lea.sflag [#allocation6], %s5617_s10  ;;  %s6787_s25 = sld [smem:[#allocation58_spill]] }
  0x70   : > { %4497 = dma.hbm_to_vmem [thread:$0]  (%p5547_p3), %s5623_s24, 128, %s818_s30, %s6786_s11  }
  0x71   : > { %s846_s3 = scalar_lea.vmem [#allocation8], %s5614_s27  ;;  %s5654_s28 = sand.u32 1, %s5279_s7  }
  0x72   : > { %s853_s1 = sshll.u32 %s846_s3, 4  ;;  %s854_s1 = int_to_ptr.vmem [resolvable:$true] %s853_s1 }
  0x75   : > { %s5650_s6 = scalar_lea.hbm %s6787_s25, %s5610_s26  ;;  %s4829_s11 = scalar_lea.hbm %s6787_s25, 256 }
  0x76   : > { %s4825_s15 = scalar_lea.hbm %s5650_s6, 128  ;;  %p4830_p13 = scmp.lt.u32.totalorder %s5650_s6, %s6787_s25 }
  0x77   : > { %p4826_p4 = scmp.ne.s32.totalorder %s5650_s6, %s4825_s15  ;;  %p4831_p10 = scmp.lt.u32.totalorder %s4829_s11, %s4825_s15 }
  0x78   : > { %p4833_p11 = scmp.lt.u32.totalorder %s4825_s15, %s5650_s6 }
  0x79   : > { %p4827_p7 = pnand %p4826_p4, %p5547_p3  ;;  %p4832_p9 = por %p4831_p10, %p4830_p13 }
  0x7b   : > { %p4828_p12 = pneg %p4827_p7  ;;  %p4834_p5 = por %p4833_p11, %p4832_p9 }
  0x7d   : > { %p4835_p8 = pnand %p4834_p5, %p4828_p12 }
  0x7f   : > { %4838 = shalt.err (!%p4835_p8)
}
  0x80   : > { %s4839_s3 = scalar_lea.vmem %s854_s1, 128  ;;  %s5314_s29 = smov [#allocation8]  }
  0x81   : > { %p4840_p2 = scmp.ne.s32.totalorder %s854_s1, %s4839_s3  ;;  %s4843_s7 = sshll.u32 %s5314_s29, 4  ;;  %s4844_s7 = int_to_ptr.vmem [resolvable:$false] %s4843_s7 }
  0x82   : > { %s4845_s30 = scalar_lea.vmem %s4844_s7, 256  ;;  %p4846_p0 = scmp.lt.s32.totalorder %s854_s1, %s4844_s7 }
  0x83   : > { %p4841_p1 = pnand %p4840_p2, %p5547_p3  ;;  %p4847_p4 = scmp.lt.s32.totalorder %s4845_s30, %s4839_s3 }
  0x85   : > { %p4842_p6 = pneg %p4841_p1  ;;  %p4848_p7 = por %p4847_p4, %p4846_p0 }
  0x87   : > { %p4849_p10 = pnand %p4848_p7, %p4842_p6 }
  0x89   : > { %4852 = shalt.err (!%p4849_p10)
}
  0x8a   : > { %s6788_s15 = scalar_lea.sflag [#allocation9], %s5617_s10  ;;  %s5677_s24 = sshll.u32 %s5654_s28, 6 }
  0x8b   : > { %4499 = dma.hbm_to_vmem [thread:$0]  (%p5547_p3), %s5650_s6, 128, %s854_s1, %s6788_s15  }
  0x8c   : > { %s5680_s29 = sshll.u32 %s5303_s9, 10  ;;  %s6789_s13 = sld [smem:[#allocation63_spill]] }
  0x8d   : > { %s904_s3 = scalar_lea.vmem [#allocation11], %s5677_s24  ;;  %s6706_s6 = scalar_lea.sflag [#allocation12], %s5617_s10 }
  0x8e   : > { %s911_s30 = sshll.u32 %s904_s3, 4  ;;  %p6790_p13 = scmp.ne.s32.totalorder %s6777_s18, 0  ;;  %s5689_s30 = int_to_ptr.vmem [resolvable:$true] %s911_s30 }
  0x92   : > { %s5686_s19 = scalar_lea.hbm %s6789_s13, %s5680_s29  ;;  %s4857_s7 = scalar_lea.hbm %s6789_s13, 2048 }
  0x93   : > { %s4853_s1 = scalar_lea.hbm %s5686_s19, 1024  ;;  %p4858_p5 = scmp.lt.u32.totalorder %s5686_s19, %s6789_s13 }
  0x94   : > { %p4854_p12 = scmp.ne.s32.totalorder %s5686_s19, %s4853_s1  ;;  %p4859_p8 = scmp.lt.u32.totalorder %s4857_s7, %s4853_s1 }
  0x95   : > { %p4861_p1 = scmp.lt.u32.totalorder %s4853_s1, %s5686_s19 }
  0x96   : > { %p4855_p9 = pnand %p4854_p12, %p6790_p13  ;;  %p4860_p2 = por %p4859_p8, %p4858_p5 }
  0x98   : > { %p4856_p11 = pneg %p4855_p9  ;;  %p4862_p6 = por %p4861_p1, %p4860_p2 }
  0x9a   : > { %p4863_p0 = pnand %p4862_p6, %p4856_p11 }
  0x9c   : > { %4866 = shalt.err (!%p4863_p0)
}
  0x9d   : > { %s4867_s3 = scalar_lea.vmem %s5689_s30, 1024  ;;  %s5315_s25 = smov [#allocation11]  }
  0x9e   : > { %p4868_p4 = scmp.ne.s32.totalorder %s5689_s30, %s4867_s3  ;;  %s4871_s15 = sshll.u32 %s5315_s25, 4  ;;  %s4872_s15 = int_to_ptr.vmem [resolvable:$false] %s4871_s15 }
  0x9f   : > { %s4873_s5 = scalar_lea.vmem %s4872_s15, 2048  ;;  %p4874_p12 = scmp.lt.s32.totalorder %s5689_s30, %s4872_s15 }
  0xa0   : > { %p4869_p7 = pnand %p4868_p4, %p6790_p13  ;;  %p4875_p9 = scmp.lt.s32.totalorder %s4873_s5, %s4867_s3 }
  0xa2   : > { %p4870_p10 = pneg %p4869_p7  ;;  %p4876_p5 = por %p4875_p9, %p4874_p12 }
  0xa4   : > { %p4877_p8 = pnand %p4876_p5, %p4870_p10 }
  0xa6   : > { %4880 = shalt.err (!%p4877_p8)
}
  0xa7   : > { %s6707_s1 = smov 64   ;;  %s6709_s7 = smov 4  }
  0xa8   : > { %4501 = dma.hbm_to_vmem [thread:$0]  (%p6790_p13), %s5686_s19, 1024, %s5689_s30, %s6706_s6, %s6707_s1, %s6707_s1, %s6709_s7  }
  0xa9   : > { %s5719_s11 = sshll.u32 %s5654_s28, 7  ;;  %s5722_s3 = sshll.u32 %s5303_s9, 11 }
  0xaa   : > { %s6791_s14 = sld [smem:[#allocation69_spill]]  ;;  %s970_s13 = scalar_lea.vmem [#allocation14], %s5719_s11 }
  0xab   : > { %s977_s21 = sshll.u32 %s970_s13, 4  ;;  %s6721_s19 = scalar_lea.sflag [#allocation15], %s5617_s10  ;;  %s5731_s21 = int_to_ptr.vmem [resolvable:$true] %s977_s21 }
  0xb0   : > { %s5728_s5 = scalar_lea.hbm %s6791_s14, %s5722_s3  ;;  %s4885_s25 = scalar_lea.hbm %s6791_s14, 4096 }
  0xb1   : > { %s4881_s30 = scalar_lea.hbm %s5728_s5, 2048  ;;  %p4886_p6 = scmp.lt.u32.totalorder %s5728_s5, %s6791_s14 }
  0xb2   : > { %p4882_p11 = scmp.ne.s32.totalorder %s5728_s5, %s4881_s30  ;;  %p4887_p0 = scmp.lt.u32.totalorder %s4885_s25, %s4881_s30 }
  0xb3   : > { %p4889_p7 = scmp.lt.u32.totalorder %s4881_s30, %s5728_s5 }
  0xb4   : > { %p4883_p2 = pnand %p4882_p11, %p6790_p13  ;;  %p4888_p4 = por %p4887_p0, %p4886_p6 }
  0xb6   : > { %p4884_p1 = pneg %p4883_p2  ;;  %p4890_p10 = por %p4889_p7, %p4888_p4 }
  0xb8   : > { %p4891_p12 = pnand %p4890_p10, %p4884_p1 }
  0xba   : > { %4894 = shalt.err (!%p4891_p12)
}
  0xbb   : > { %s4895_s13 = scalar_lea.vmem %s5731_s21, 2048  ;;  %s5318_s6 = smov [#allocation14]  }
  0xbc   : > { %p4896_p9 = scmp.ne.s32.totalorder %s5731_s21, %s4895_s13  ;;  %s4899_s1 = sshll.u32 %s5318_s6, 4  ;;  %s4900_s1 = int_to_ptr.vmem [resolvable:$false] %s4899_s1 }
  0xbd   : > { %s4901_s7 = scalar_lea.vmem %s4900_s1, 4096  ;;  %p4902_p11 = scmp.lt.s32.totalorder %s5731_s21, %s4900_s1 }
  0xbe   : > { %p4897_p5 = pnand %p4896_p9, %p6790_p13  ;;  %p4903_p2 = scmp.lt.s32.totalorder %s4901_s7, %s4895_s13 }
  0xc0   : > { %p4898_p8 = pneg %p4897_p5  ;;  %p4904_p6 = por %p4903_p2, %p4902_p11 }
  0xc2   : > { %p4905_p0 = pnand %p4904_p6, %p4898_p8 }
  0xc4   : > { %4908 = shalt.err (!%p4905_p0)
}
  0xc5   : > { %s6715_s30 = smov 128   ;;  %s6717_s25 = smov 8  }
  0xc6   : > { %4503 = dma.hbm_to_vmem [thread:$0]  (%p6790_p13), %s5728_s5, 2048, %s5731_s21, %s6721_s19, %s6715_s30, %s6715_s30, %s6717_s25  }
  0xc7   : > { %s6716_s15 = sshll.u32 %s5303_s9, 4  ;;  %s6792_s17 = sld [smem:[#allocation72_spill]] }
  0xc8   : > { %s1018_s7 = scalar_lea.vmem [#allocation17], %s5654_s28  ;;  %s6720_s8 = scalar_lea.sflag [#allocation18], %s5617_s10 }
  0xc9   : > { %s1025_s14 = sshll.u32 %s1018_s7, 4  ;;  %s1026_s14 = int_to_ptr.vmem [resolvable:$true] %s1025_s14 }
  0xcd   : > { %s5766_s1 = scalar_lea.hbm %s6792_s17, %s6716_s15  ;;  %s4913_s30 = scalar_lea.hbm %s6792_s17, 32 }
  0xce   : > { %s4909_s2 = scalar_lea.hbm %s5766_s1, 16  ;;  %p4914_p10 = scmp.lt.u32.totalorder %s5766_s1, %s6792_s17 }
  0xcf   : > { %p4910_p1 = scmp.ne.s32.totalorder %s5766_s1, %s4909_s2  ;;  %p4915_p12 = scmp.lt.u32.totalorder %s4913_s30, %s4909_s2 }
  0xd0   : > { %p4917_p5 = scmp.lt.u32.totalorder %s4909_s2, %s5766_s1 }
  0xd1   : > { %p4911_p4 = pnand %p4910_p1, %p6790_p13  ;;  %p4916_p9 = por %p4915_p12, %p4914_p10 }
  0xd3   : > { %p4912_p7 = pneg %p4911_p4  ;;  %p4918_p8 = por %p4917_p5, %p4916_p9 }
  0xd5   : > { %p4919_p11 = pnand %p4918_p8, %p4912_p7 }
  0xd7   : > { %4922 = shalt.err (!%p4919_p11)
}
  0xd8   : > { %s4923_s7 = scalar_lea.vmem %s1026_s14, 16  ;;  %s5321_s15 = smov [#allocation17]  }
  0xd9   : > { %p4924_p2 = scmp.ne.s32.totalorder %s1026_s14, %s4923_s7  ;;  %s4927_s25 = sshll.u32 %s5321_s15, 4  ;;  %s4928_s25 = int_to_ptr.vmem [resolvable:$false] %s4927_s25 }
  0xda   : > { %s4929_s21 = scalar_lea.vmem %s4928_s25, 32  ;;  %p4930_p1 = scmp.lt.s32.totalorder %s1026_s14, %s4928_s25 }
  0xdb   : > { %p4925_p6 = pnand %p4924_p2, %p6790_p13  ;;  %p4931_p4 = scmp.lt.s32.totalorder %s4929_s21, %s4923_s7 }
  0xdd   : > { %p4926_p0 = pneg %p4925_p6  ;;  %p4932_p3 = por %p4931_p4, %p4930_p1 }
  0xdf   : > { %p4933_p10 = pnand %p4932_p3, %p4926_p0 }
  0xe1   : > { %4936 = shalt.err (!%p4933_p10)
}
  0xe2   : > { %4505 = dma.hbm_to_vmem [thread:$0]  (%p6790_p13), %s5766_s1, 16, %s1026_s14, %s6720_s8  }
  0xe3   : > { %s6793_s22 = sld [smem:[#allocation77_spill]]  ;;  %s1076_s25 = scalar_lea.vmem [#allocation20], %s5719_s11 }
  0xe4   : > { %s1083_s5 = sshll.u32 %s1076_s25, 4  ;;  %s6722_s13 = scalar_lea.sflag [#allocation21], %s5617_s10  ;;  %s5796_s5 = int_to_ptr.vmem [resolvable:$true] %s1083_s5 }
  0xe9   : > { %s5793_s15 = scalar_lea.hbm %s6793_s22, %s5722_s3  ;;  %s4941_s7 = scalar_lea.hbm %s6793_s22, 4096 }
  0xea   : > { %s4937_s6 = scalar_lea.hbm %s5793_s15, 2048  ;;  %p4942_p9 = scmp.lt.u32.totalorder %s5793_s15, %s6793_s22 }
  0xeb   : > { %p4938_p3 = scmp.ne.s32.totalorder %s5793_s15, %s4937_s6  ;;  %p4943_p5 = scmp.lt.u32.totalorder %s4941_s7, %s4937_s6 }
  0xec   : > { %p4945_p11 = scmp.lt.u32.totalorder %s4937_s6, %s5793_s15 }
  0xed   : > { %p4939_p7 = pnand %p4938_p3, %p6790_p13  ;;  %p4944_p8 = por %p4943_p5, %p4942_p9 }
  0xef   : > { %p4940_p12 = pneg %p4939_p7  ;;  %p4946_p2 = por %p4945_p11, %p4944_p8 }
  0xf1   : > { %p4947_p6 = pnand %p4946_p2, %p4940_p12 }
  0xf3   : > { %4950 = shalt.err (!%p4947_p6)
}
  0xf4   : > { %s4951_s30 = scalar_lea.vmem %s5796_s5, 2048  ;;  %s5322_s25 = smov [#allocation20]  }
  0xf5   : > { %p4952_p0 = scmp.ne.s32.totalorder %s5796_s5, %s4951_s30  ;;  %s4955_s14 = sshll.u32 %s5322_s25, 4  ;;  %s4956_s14 = int_to_ptr.vmem [resolvable:$false] %s4955_s14 }
  0xf6   : > { %s4957_s1 = scalar_lea.vmem %s4956_s14, 4096  ;;  %p4958_p10 = scmp.lt.s32.totalorder %s5796_s5, %s4956_s14 }
  0xf7   : > { %p4953_p1 = pnand %p4952_p0, %p6790_p13  ;;  %p4959_p3 = scmp.lt.s32.totalorder %s4957_s1, %s4951_s30 }
  0xf9   : > { %p4954_p4 = pneg %p4953_p1  ;;  %p4960_p7 = por %p4959_p3, %p4958_p10 }
  0xfb   : > { %p4961_p9 = pnand %p4960_p7, %p4954_p4 }
  0xfd   : > { %4964 = shalt.err (!%p4961_p9)
}
  0xfe   : > { %s6794_s6 = smov 4   ;;  %s6795_s7 = smov 64  }
  0xff   : > { %4507 = dma.hbm_to_vmem [thread:$0]  (%p6790_p13), %s5793_s15, 2048, %s5796_s5, %s6722_s13, %s6795_s7, %s6795_s7, %s6794_s6  }
 0x100   : > { %s6796_s30 = sld [smem:[#allocation55_spill]]  ;;  %s792_s1 = scalar_lea.vmem [#allocation2], %s5614_s27 }
 0x101   : > { %s799_s8 = sshll.u32 %s792_s1, 4  ;;  %s6798_s19 = sand.u32 1, %s5291_s4   ;;  %s800_s8 = int_to_ptr.vmem [resolvable:$true] %s799_s8 }
 0x102   : > { %s789_s17 = scalar_lea.sflag [#allocation3], %s6798_s19  ;;  %p6799_p5 = scmp.ne.s32.totalorder %s6771_s0, 0 }
 0x106   : > { %s6797_s25 = smov %s6796_s30  ;;  %s5829_s14 = scalar_lea.hbm %s6796_s30, %s5610_s26 }
 0x107   : > { %s4965_s22 = scalar_lea.hbm %s5829_s14, 128  ;;  %s4969_s21 = scalar_lea.hbm %s6797_s25, 256 }
 0x108   : > { %p4966_p12 = scmp.ne.s32.totalorder %s5829_s14, %s4965_s22  ;;  %p4970_p2 = scmp.lt.u32.totalorder %s5829_s14, %s6797_s25 }
 0x109   : > { %p4971_p6 = scmp.lt.u32.totalorder %s4969_s21, %s4965_s22  ;;  %p4973_p1 = scmp.lt.u32.totalorder %s4965_s22, %s5829_s14 }
 0x10a   : > { %p4967_p8 = pnand %p4966_p12, %p6799_p5 }
 0x10b   : > { %p4972_p0 = por %p4971_p6, %p4970_p2 }
 0x10c   : > { %p4968_p11 = pneg %p4967_p8 }
 0x10d   : > { %p4974_p4 = por %p4973_p1, %p4972_p0 }
 0x10f   : > { %p4975_p10 = pnand %p4974_p4, %p4968_p11 }
 0x111   : > { %4978 = shalt.err (!%p4975_p10)
}
 0x112   : > { %s4979_s19 = scalar_lea.vmem %s800_s8, 128  ;;  %s5323_s1 = smov [#allocation2]  }
 0x113   : > { %p4980_p3 = scmp.ne.s32.totalorder %s800_s8, %s4979_s19  ;;  %s4983_s13 = sshll.u32 %s5323_s1, 4  ;;  %s4984_s13 = int_to_ptr.vmem [resolvable:$false] %s4983_s13 }
 0x114   : > { %s4985_s15 = scalar_lea.vmem %s4984_s13, 256  ;;  %p4986_p12 = scmp.lt.s32.totalorder %s800_s8, %s4984_s13 }
 0x115   : > { %p4981_p7 = pnand %p4980_p3, %p6799_p5  ;;  %p4987_p8 = scmp.lt.s32.totalorder %s4985_s15, %s4979_s19 }
 0x117   : > { %p4982_p9 = pneg %p4981_p7  ;;  %p4988_p13 = por %p4987_p8, %p4986_p12 }
 0x119   : > { %p4989_p2 = pnand %p4988_p13, %p4982_p9 }
 0x11b   : > { %4992 = shalt.err (!%p4989_p2)
}
 0x11c   : > { %4496 = dma.hbm_to_vmem [thread:$0]  (%p6799_p5), %s5829_s14, 128, %s800_s8, %s789_s17  }
 0x11d   : > { %s6800_s21 = sld [smem:[#allocation57_spill]]  ;;  %s828_s13 = scalar_lea.vmem [#allocation7], %s5614_s27 }
 0x11e   : > { %s835_s30 = sshll.u32 %s828_s13, 4  ;;  %s4492_s19 = smul.u32 192, %s5654_s28  ;;  %s836_s30 = int_to_ptr.vmem [resolvable:$true] %s835_s30 }
 0x123   : > { %s5855_s2 = scalar_lea.hbm %s6800_s21, %s5610_s26  ;;  %s4997_s8 = scalar_lea.hbm %s6800_s21, 256 }
 0x124   : > { %s4993_s1 = scalar_lea.hbm %s5855_s2, 128  ;;  %p4998_p0 = scmp.lt.u32.totalorder %s5855_s2, %s6800_s21 }
 0x125   : > { %p4994_p13 = scmp.ne.s32.totalorder %s5855_s2, %s4993_s1  ;;  %p4999_p1 = scmp.lt.u32.totalorder %s4997_s8, %s4993_s1 }
 0x126   : > { %p5001_p10 = scmp.lt.u32.totalorder %s4993_s1, %s5855_s2 }
 0x127   : > { %p4995_p11 = pnand %p4994_p13, %p6799_p5  ;;  %p5000_p4 = por %p4999_p1, %p4998_p0 }
 0x129   : > { %p4996_p6 = pneg %p4995_p11  ;;  %p5002_p3 = por %p5001_p10, %p5000_p4 }
 0x12b   : > { %p5003_p7 = pnand %p5002_p3, %p4996_p6 }
 0x12d   : > { %5006 = shalt.err (!%p5003_p7)
}
 0x12e   : > { %s5007_s27 = scalar_lea.vmem %s836_s30, 128  ;;  %s5324_s22 = smov [#allocation7]  }
 0x12f   : > { %p5008_p9 = scmp.ne.s32.totalorder %s836_s30, %s5007_s27  ;;  %s5011_s5 = sshll.u32 %s5324_s22, 4  ;;  %s5012_s5 = int_to_ptr.vmem [resolvable:$false] %s5011_s5 }
 0x130   : > { %s5013_s13 = scalar_lea.vmem %s5012_s5, 256  ;;  %p5014_p2 = scmp.lt.s32.totalorder %s836_s30, %s5012_s5 }
 0x131   : > { %p5009_p12 = pnand %p5008_p9, %p6799_p5  ;;  %p5015_p13 = scmp.lt.s32.totalorder %s5013_s13, %s5007_s27 }
 0x133   : > { %p5010_p8 = pneg %p5009_p12  ;;  %p5016_p11 = por %p5015_p13, %p5014_p2 }
 0x135   : > { %p5017_p0 = pnand %p5016_p11, %p5010_p8 }
 0x137   : > { %5020 = shalt.err (!%p5017_p0)
}
 0x138   : > { %s6801_s1 = scalar_lea.sflag [#allocation6], %s5617_s10  ;;  %s4493_s15 = smul.u32 3072, %s5303_s9 }
 0x139   : > { %4498 = dma.hbm_to_vmem [thread:$0]  (%p6799_p5), %s5855_s2, 128, %s836_s30, %s6801_s1  }
 0x13a   : > { %s876_s17 = scalar_lea.vmem [#allocation10], %s4492_s19  ;;  %s6802_s22 = sld [smem:[#allocation61_spill]] }
 0x13b   : > { %s883_s8 = sshll.u32 %s876_s17, 4  ;;  %p6803_p1 = scmp.ne.s32.totalorder %s6777_s18, 0  ;;  %s5884_s8 = int_to_ptr.vmem [resolvable:$true] %s883_s8 }
 0x140   : > { %s5882_s21 = scalar_lea.hbm %s6802_s22, %s4493_s15  ;;  %s5025_s19 = scalar_lea.hbm %s6802_s22, 6144 }
 0x141   : > { %s5021_s0 = scalar_lea.hbm %s5882_s21, 3072  ;;  %p5026_p5 = scmp.lt.u32.totalorder %s5882_s21, %s6802_s22 }
 0x142   : > { %p5022_p6 = scmp.ne.s32.totalorder %s5882_s21, %s5021_s0  ;;  %p5027_p3 = scmp.lt.u32.totalorder %s5025_s19, %s5021_s0 }
 0x143   : > { %p5029_p9 = scmp.lt.u32.totalorder %s5021_s0, %s5882_s21 }
 0x144   : > { %p5023_p4 = pnand %p5022_p6, %p6803_p1  ;;  %p5028_p7 = por %p5027_p3, %p5026_p5 }
 0x146   : > { %p5024_p10 = pneg %p5023_p4  ;;  %p5030_p12 = por %p5029_p9, %p5028_p7 }
 0x148   : > { %p5031_p8 = pnand %p5030_p12, %p5024_p10 }
 0x14a   : > { %5034 = shalt.err (!%p5031_p8)
}
 0x14b   : > { %s5035_s13 = scalar_lea.vmem %s5884_s8, 3072  ;;  %s5325_s1 = smov [#allocation10]  }
 0x14c   : > { %p5036_p2 = scmp.ne.s32.totalorder %s5884_s8, %s5035_s13  ;;  %s5039_s15 = sshll.u32 %s5325_s1, 4  ;;  %s5040_s15 = int_to_ptr.vmem [resolvable:$false] %s5039_s15 }
 0x14d   : > { %s5041_s17 = scalar_lea.vmem %s5040_s15, 6144  ;;  %p5042_p0 = scmp.lt.s32.totalorder %s5884_s8, %s5040_s15 }
 0x14e   : > { %p5037_p13 = pnand %p5036_p2, %p6803_p1  ;;  %p5043_p6 = scmp.lt.s32.totalorder %s5041_s17, %s5035_s13 }
 0x150   : > { %p5038_p11 = pneg %p5037_p13  ;;  %p5044_p4 = por %p5043_p6, %p5042_p0 }
 0x152   : > { %p5045_p5 = pnand %p5044_p4, %p5038_p11 }
 0x154   : > { %5048 = shalt.err (!%p5045_p5)
}
 0x155   : > { %s5326_s14 = smov 192   ;;  %s5327_s26 = smov 12  }
 0x156   : > { %s6804_s0 = scalar_lea.sflag [#allocation9], %s5617_s10  ;;  %s6805_s12 = sld [smem:[#allocation67_spill]] }
 0x157   : > { %4500 = dma.hbm_to_vmem [thread:$0]  (%p6803_p1), %s5882_s21, 3072, %s5884_s8, %s6804_s0, %s5326_s14, %s5326_s14, %s5327_s26  }
 0x158   : > { %s943_s27 = scalar_lea.vmem [#allocation13], %s5677_s24 }
 0x159   : > { %s950_s5 = sshll.u32 %s943_s27, 4  ;;  %s5916_s5 = int_to_ptr.vmem [resolvable:$true] %s950_s5 }
 0x15c   : > { %s5913_s19 = scalar_lea.hbm %s6805_s12, %s5680_s29  ;;  %s5053_s8 = scalar_lea.hbm %s6805_s12, 2048 }
 0x15d   : > { %s5049_s13 = scalar_lea.hbm %s5913_s19, 1024  ;;  %p5054_p9 = scmp.lt.u32.totalorder %s5913_s19, %s6805_s12 }
 0x15e   : > { %p5050_p10 = scmp.ne.s32.totalorder %s5913_s19, %s5049_s13  ;;  %p5055_p12 = scmp.lt.u32.totalorder %s5053_s8, %s5049_s13 }
 0x15f   : > { %p5057_p2 = scmp.lt.u32.totalorder %s5049_s13, %s5913_s19 }
 0x160   : > { %p5051_p3 = pnand %p5050_p10, %p6803_p1  ;;  %p5056_p8 = por %p5055_p12, %p5054_p9 }
 0x162   : > { %p5052_p7 = pneg %p5051_p3  ;;  %p5058_p13 = por %p5057_p2, %p5056_p8 }
 0x164   : > { %p5059_p11 = pnand %p5058_p13, %p5052_p7 }
 0x166   : > { %5062 = shalt.err (!%p5059_p11)
}
 0x167   : > { %s5063_s14 = scalar_lea.vmem %s5916_s5, 1024  ;;  %s5328_s26 = smov [#allocation13]  }
 0x168   : > { %p5064_p0 = scmp.ne.s32.totalorder %s5916_s5, %s5063_s14  ;;  %s5067_s0 = sshll.u32 %s5328_s26, 4  ;;  %s5068_s0 = int_to_ptr.vmem [resolvable:$false] %s5067_s0 }
 0x169   : > { %s5069_s2 = scalar_lea.vmem %s5068_s0, 2048  ;;  %p5070_p5 = scmp.lt.s32.totalorder %s5916_s5, %s5068_s0 }
 0x16a   : > { %p5065_p6 = pnand %p5064_p0, %p6803_p1  ;;  %p5071_p10 = scmp.lt.s32.totalorder %s5069_s2, %s5063_s14 }
 0x16c   : > { %p5066_p4 = pneg %p5065_p6  ;;  %p5072_p3 = por %p5071_p10, %p5070_p5 }
 0x16e   : > { %p5073_p9 = pnand %p5072_p3, %p5066_p4 }
 0x170   : > { %5076 = shalt.err (!%p5073_p9)
}
 0x171   : > { %s6806_s30 = scalar_lea.sflag [#allocation12], %s5617_s10  ;;  %s6807_s16 = sld [smem:[#allocation71_spill]] }
 0x172   : > { %4502 = dma.hbm_to_vmem [thread:$0]  (%p6803_p1), %s5913_s19, 1024, %s5916_s5, %s6806_s30, %s6795_s7, %s6795_s7, %s6794_s6  }
 0x173   : > { %s998_s21 = scalar_lea.vmem [#allocation16], %s5677_s24 }
 0x174   : > { %s1005_s8 = sshll.u32 %s998_s21, 4  ;;  %s5951_s8 = int_to_ptr.vmem [resolvable:$true] %s1005_s8 }
 0x177   : > { %s5948_s1 = scalar_lea.hbm %s6807_s16, %s5680_s29  ;;  %s5081_s5 = scalar_lea.hbm %s6807_s16, 2048 }
 0x178   : > { %s5077_s15 = scalar_lea.hbm %s5948_s1, 1024  ;;  %p5082_p2 = scmp.lt.u32.totalorder %s5948_s1, %s6807_s16 }
 0x179   : > { %p5078_p7 = scmp.ne.s32.totalorder %s5948_s1, %s5077_s15  ;;  %p5083_p13 = scmp.lt.u32.totalorder %s5081_s5, %s5077_s15 }
 0x17a   : > { %p5085_p0 = scmp.lt.u32.totalorder %s5077_s15, %s5948_s1 }
 0x17b   : > { %p5079_p12 = pnand %p5078_p7, %p6803_p1  ;;  %p5084_p11 = por %p5083_p13, %p5082_p2 }
 0x17d   : > { %p5080_p8 = pneg %p5079_p12  ;;  %p5086_p6 = por %p5085_p0, %p5084_p11 }
 0x17f   : > { %p5087_p4 = pnand %p5086_p6, %p5080_p8 }
 0x181   : > { %5090 = shalt.err (!%p5087_p4)
}
 0x182   : > { %s5091_s24 = scalar_lea.vmem %s5951_s8, 1024  ;;  %s5329_s26 = smov [#allocation16]  }
 0x183   : > { %p5092_p5 = scmp.ne.s32.totalorder %s5951_s8, %s5091_s24  ;;  %s5095_s0 = sshll.u32 %s5329_s26, 4  ;;  %s5096_s0 = int_to_ptr.vmem [resolvable:$false] %s5095_s0 }
 0x184   : > { %s5097_s2 = scalar_lea.vmem %s5096_s0, 2048  ;;  %p5098_p9 = scmp.lt.s32.totalorder %s5951_s8, %s5096_s0 }
 0x185   : > { %p5093_p10 = pnand %p5092_p5, %p6803_p1  ;;  %p5099_p7 = scmp.lt.s32.totalorder %s5097_s2, %s5091_s24 }
 0x187   : > { %p5094_p3 = pneg %p5093_p10  ;;  %p5100_p12 = por %p5099_p7, %p5098_p9 }
 0x189   : > { %p5101_p2 = pnand %p5100_p12, %p5094_p3 }
 0x18b   : > { %5104 = shalt.err (!%p5101_p2)
}
 0x18c   : > { %s6808_s30 = scalar_lea.sflag [#allocation15], %s5617_s10  ;;  %s6809_s20 = sld [smem:[#allocation75_spill]] }
 0x18d   : > { %4504 = dma.hbm_to_vmem [thread:$0]  (%p6803_p1), %s5948_s1, 1024, %s5951_s8, %s6808_s30, %s6795_s7, %s6795_s7, %s6794_s6  }
 0x18e   : > { %s1048_s15 = scalar_lea.vmem [#allocation19], %s5719_s11 }
 0x18f   : > { %s1055_s17 = sshll.u32 %s1048_s15, 4  ;;  %s5986_s17 = int_to_ptr.vmem [resolvable:$true] %s1055_s17 }
 0x192   : > { %s5983_s21 = scalar_lea.hbm %s6809_s20, %s5722_s3  ;;  %s5109_s7 = scalar_lea.hbm %s6809_s20, 4096 }
 0x193   : > { %s5105_s19 = scalar_lea.hbm %s5983_s21, 2048  ;;  %p5110_p0 = scmp.lt.u32.totalorder %s5983_s21, %s6809_s20 }
 0x194   : > { %p5106_p8 = scmp.ne.s32.totalorder %s5983_s21, %s5105_s19  ;;  %p5111_p6 = scmp.lt.u32.totalorder %s5109_s7, %s5105_s19 }
 0x195   : > { %p5113_p5 = scmp.lt.u32.totalorder %s5105_s19, %s5983_s21 }
 0x196   : > { %p5107_p13 = pnand %p5106_p8, %p6803_p1  ;;  %p5112_p4 = por %p5111_p6, %p5110_p0 }
 0x198   : > { %p5108_p11 = pneg %p5107_p13  ;;  %p5114_p10 = por %p5113_p5, %p5112_p4 }
 0x19a   : > { %p5115_p3 = pnand %p5114_p10, %p5108_p11 }
 0x19c   : > { %5118 = shalt.err (!%p5115_p3)
}
 0x19d   : > { %s5119_s11 = scalar_lea.vmem %s5986_s17, 2048  ;;  %s5330_s8 = smov [#allocation19]  }
 0x19e   : > { %p5120_p9 = scmp.ne.s32.totalorder %s5986_s17, %s5119_s11  ;;  %s5123_s14 = sshll.u32 %s5330_s8, 4  ;;  %s5124_s14 = int_to_ptr.vmem [resolvable:$false] %s5123_s14 }
 0x19f   : > { %s5125_s29 = scalar_lea.vmem %s5124_s14, 4096  ;;  %p5126_p2 = scmp.lt.s32.totalorder %s5986_s17, %s5124_s14 }
 0x1a0   : > { %p5121_p7 = pnand %p5120_p9, %p6803_p1  ;;  %p5127_p8 = scmp.lt.s32.totalorder %s5125_s29, %s5119_s11 }
 0x1a2   : > { %p5122_p12 = pneg %p5121_p7  ;;  %p5128_p13 = por %p5127_p8, %p5126_p2 }
 0x1a4   : > { %p5129_p0 = pnand %p5128_p13, %p5122_p12 }
 0x1a6   : > { %5132 = shalt.err (!%p5129_p0)
}
 0x1a7   : > { %s6810_s24 = smov 8   ;;  %s6811_s26 = smov 128  }
 0x1a8   : > { %s6812_s0 = scalar_lea.sflag [#allocation18], %s5617_s10  ;;  %s6813_s2 = sshll.u32 %s5303_s9, 4 }
 0x1a9   : > { %4506 = dma.hbm_to_vmem [thread:$0]  (%p6803_p1), %s5983_s21, 2048, %s5986_s17, %s6812_s0, %s6811_s26, %s6811_s26, %s6810_s24  }
 0x1aa   : > { %s6814_s23 = sld [smem:[#allocation78_spill]]  ;;  %s1096_s15 = scalar_lea.vmem [#allocation22], %s5654_s28 }
 0x1ab   : > { %s1103_s19 = sshll.u32 %s1096_s15, 4  ;;  %s1104_s19 = int_to_ptr.vmem [resolvable:$true] %s1103_s19 }
 0x1b0   : > { %s6019_s13 = scalar_lea.hbm %s6814_s23, %s6813_s2  ;;  %s5137_s17 = scalar_lea.hbm %s6814_s23, 32 }
 0x1b1   : > { %s5133_s5 = scalar_lea.hbm %s6019_s13, 16  ;;  %p5138_p5 = scmp.lt.u32.totalorder %s6019_s13, %s6814_s23 }
 0x1b2   : > { %p5134_p11 = scmp.ne.s32.totalorder %s6019_s13, %s5133_s5  ;;  %p5139_p10 = scmp.lt.u32.totalorder %s5137_s17, %s5133_s5 }
 0x1b3   : > { %p5141_p9 = scmp.lt.u32.totalorder %s5133_s5, %s6019_s13 }
 0x1b4   : > { %p5135_p6 = pnand %p5134_p11, %p6803_p1  ;;  %p5140_p3 = por %p5139_p10, %p5138_p5 }
 0x1b6   : > { %p5136_p4 = pneg %p5135_p6  ;;  %p5142_p7 = por %p5141_p9, %p5140_p3 }
 0x1b8   : > { %p5143_p12 = pnand %p5142_p7, %p5136_p4 }
 0x1ba   : > { %5146 = shalt.err (!%p5143_p12)
}
 0x1bb   : > { %s5147_s28 = scalar_lea.vmem %s1104_s19, 16  ;;  %s5331_s3 = smov [#allocation22]  }
 0x1bc   : > { %p5148_p2 = scmp.ne.s32.totalorder %s1104_s19, %s5147_s28  ;;  %s5151_s11 = sshll.u32 %s5331_s3, 4  ;;  %s5152_s11 = int_to_ptr.vmem [resolvable:$false] %s5151_s11 }
 0x1bd   : > { %s5153_s8 = scalar_lea.vmem %s5152_s11, 32  ;;  %p5154_p0 = scmp.lt.s32.totalorder %s1104_s19, %s5152_s11 }
 0x1be   : > { %p5149_p8 = pnand %p5148_p2, %p6803_p1  ;;  %p5155_p11 = scmp.lt.s32.totalorder %s5153_s8, %s5147_s28 }
 0x1c0   : > { %p5150_p13 = pneg %p5149_p8  ;;  %p5156_p6 = por %p5155_p11, %p5154_p0 }
 0x1c2   : > { %p5157_p5 = pnand %p5156_p6, %p5150_p13 }
 0x1c4   : > { %5160 = shalt.err (!%p5157_p5)
}
 0x1c5   : > { %s6815_s14 = scalar_lea.sflag [#allocation21], %s5617_s10 }
 0x1c6   : > { %4508 = dma.hbm_to_vmem [thread:$0]  (%p6803_p1), %s6019_s13, 16, %s1104_s19, %s6815_s14  }
 0x1c7 PF: > { %s6816_s29 = sld [smem:[#allocation42_spill]] }
 0x1cd   : > { %p4075_p4 = scmp.ge.s32.totalorder %s6816_s29, 1  ;;  %p1108_p10 = scmp.lt.s32.totalorder %s6816_s29, 5 }
 0x1cf   : > { %p1109_p3 = pnand %p4075_p4, %p1108_p10 }
 0x1d1   : > { %1112 = sbr.rel (%p1109_p3) target bundleno = 6025 (0x1789), region = 124 }
 0x1d8   : > { %s6817_s24 = sld [smem:[#allocation36_spill]]  ;;  %s6818_s26 = sld [smem:[#allocation46_spill]] }
 0x1de   : > { %s6044_s0 = sand.u32 1, %s6817_s24   ;;  %p6820_p9 = scmp.ne.s32.totalorder %s6818_s26, 0 }
 0x1df   : > { %6819 = sst [smem:[#allocation52_spill]] %s6044_s0  ;;  %s6047_s2 = sshll.u32 %s6044_s0, 3 }
 0x1e0   : > { %s1115_s18 = scalar_lea.sflag [#allocation3], %s6044_s0 }
 0x1e1   : > { %5234 = dma.done.wait (%p6820_p9), %s1115_s18, 128  }
 0x1e2   : > { %5236 = vsyncadd (%p6820_p9), %s1115_s18, 4294967168  ;;  %s6821_s30 = sld [smem:[#allocation43_spill]] }
 0x1e8   : > { %s6056_s27 = sand.u32 1, %s6821_s30  }
 0x1e9   : > { %s1124_s13 = scalar_lea.sflag [#allocation6], %s6056_s27 }
 0x1ea   : > { %5238 = dma.done.wait (%p6820_p9), %s1124_s13, 256  }
 0x1eb   : > { %5240 = vsyncadd (%p6820_p9), %s1124_s13, 4294967040  ;;  %s1142_s5 = scalar_lea.sflag [#allocation9], %s6056_s27 }
 0x1ec   : > { %5242 = dma.done.wait (%p6820_p9), %s1142_s5, 128  }
 0x1ed   : > { %5244 = vsyncadd (%p6820_p9), %s1142_s5, 4294967168  ;;  %s6822_s21 = sld [smem:[#allocation33_spill]] }
 0x1ee   : > { %s6823_s17 = sld [smem:[#allocation49_spill]] }
 0x1f3   : > { %s6072_s7 = sand.u32 1, %s6822_s21  }
 0x1f4   : > { %s4494_s1 = smul.u32 192, %s6072_s7  ;;  %p6824_p1 = scmp.ne.s32.totalorder %s6823_s17, 0 }
 0x1f6   : > { %s6075_s28 = scalar_lea.vmem [#allocation10], %s4494_s1 }
 0x1f7   : > { %5246 = dma.done.wait (%p6824_p1), %s1142_s5, 3072  }
 0x1f8   : > { %5248 = vsyncadd (%p6824_p1), %s1142_s5, 4294964224  ;;  %s4080_s3 = sshll.u32 %s6072_s7, 6  ;;  %s1160_s11 = scalar_lea.sflag [#allocation12], %s6056_s27 }
 0x1f9   : > { %s6083_s8 = scalar_lea.vmem [#allocation11], %s4080_s3 }
 0x1fa   : > { %5250 = dma.done.wait (%p6824_p1), %s1160_s11, 2048  }
 0x1fb   : > { %5252 = vsyncadd (%p6824_p1), %s1160_s11, 4294965248  ;;  %s4082_s14 = sshll.u32 %s6072_s7, 7  ;;  %s6090_s29 = scalar_lea.vmem [#allocation13], %s4080_s3 }
 0x1fc   : > { %s1178_s24 = scalar_lea.sflag [#allocation15], %s6056_s27  ;;  %s6093_s26 = scalar_lea.vmem [#allocation14], %s4082_s14 }
 0x1fd   : > { %5254 = dma.done.wait (%p6824_p1), %s1178_s24, 3072  }
 0x1fe   : > { %5256 = vsyncadd (%p6824_p1), %s1178_s24, 4294964224  ;;  %s6099_s18 = scalar_lea.vmem [#allocation16], %s4080_s3  ;;  %s1196_s30 = scalar_lea.sflag [#allocation18], %s6056_s27 }
 0x1ff   : > { %5258 = dma.done.wait (%p6824_p1), %s1196_s30, 2064  }
 0x200   : > { %5260 = vsyncadd (%p6824_p1), %s1196_s30, 4294965232  ;;  %s6107_s5 = scalar_lea.vmem [#allocation19], %s4082_s14  ;;  %s1213_s21 = scalar_lea.sflag [#allocation21], %s6056_s27 }
 0x201   : > { %6825 = sst [smem:[#allocation53_spill]] %s6107_s5  ;;  %s6110_s1 = scalar_lea.vmem [#allocation20], %s4082_s14 }
 0x202   : > { %6826 = sst [smem:[#allocation54_spill]] %s6110_s1 }
 0x203   : > { %5262 = dma.done.wait (%p6824_p1), %s1213_s21, 2064  }
 0x204   : > { %5264 = vsyncadd (%p6824_p1), %s1213_s21, 4294965232  ;;  %s6827_s3 = sld [smem:[#allocation38_spill]]  ;;  %s6833_s13 = sld [smem:[#allocation62_spill]] }
 0x205   : > { %s6834_s21 = sld [smem:[#allocation68_spill]]  ;;  %s6835_s19 = sld [smem:[#allocation73_spill]] }
 0x206   : > { %s6836_s30 = sld [smem:[#allocation70_spill]]  ;;  %s6837_s25 = sld [smem:[#allocation74_spill]] }
 0x207   : > { %s1224_s17 = scalar_lea.vmem [#allocation22], %s6072_s7  ;;  %s6171_s14 = scalar_lea.vmem [#allocation23], %s6047_s2 }
 0x20a   : > { %p1387_p7 = scmp.lt.s32.totalorder %s6827_s3, 1  ;;  %p4089_p12 = scmp.ne.s32.totalorder %s6827_s3, 0 }
 0x20c   : > { %s6118_s11 = scalar_select %p1387_p7, %s6827_s3, 1 }
 0x20e   : > { %s4495_s15 = smul.u32 3, %s6118_s11  ;;  %s1408_s6 = scalar_lea.vmem %s6834_s21, %s6118_s11 }
 0x20f   : > { %s4087_s5 = sshll.u32 %s6118_s11, 1  ;;  %s1415_s16 = scalar_lea.vmem %s6835_s19, %s6118_s11 }
 0x210   : > { %s6144_s27 = scalar_lea.vmem %s6833_s13, %s4495_s15  ;;  %s6158_s22 = scalar_lea.vmem %s6836_s30, %s4087_s5 }
 0x211   : > { %s1418_s0 = scalar_lea.vmem %s6837_s25, %s6118_s11  ;;  %s6838_s13 = sld [smem:[#allocation76_spill]] }
 0x212   : > { %1427 = sbr.rel (%p4089_p12) target bundleno = 537 (0x219), region = 180  ;;  %s6839_s21 = scalar_lea.vmem (!%p4089_p12), [#allocation2], %s6047_s2 }
 0x213   : > { %v1428_v0 = vld [vmem:[%s6839_s21] sm:$0xff] (!%p4089_p12) }
 0x214   : > { %1429 = vst [vmem:[%s6171_s14] sm:$0xff] (!%p4089_p12), %v1428_v0 }
 0x217   : > { %s6167_s4 = scalar_lea.vmem %s6838_s13, %s4087_s5 }
 0x219 PF: > { %v4629_v6 = vld [vmem:[%s6075_s28 + $0x4] ss:$12 sps:$4 sm:$0xff]   ;;  %v4631_v7 = vld [vmem:[%s6075_s28] ss:$12 sps:$4 sm:$0xff]   ;;  %v4632_v8 = vld [vmem:[%s6075_s28 + $0x8] ss:$12 sps:$4 sm:$0xff]   ;;  %v1503_v47 = vlaneseq }
 0x21a   : > { %1646 = vmatprep.subr.bf16.mxu0 %v4629_v6  ;;  %v5332_v9 = vmov 0.0   ;;  %v4633_v10 = vld [vmem:[%s6075_s28 + $0x1c] ss:$12 sps:$4 sm:$0xff]   ;;  %v4635_v11 = vld [vmem:[%s6075_s28 + $0x18] ss:$12 sps:$4 sm:$0xff]   ;;  %v5333_v23 = vmov 0  }
 0x21b   : > { %v6178_v1 = vld [vmem:[%s6171_s14] sm:$0xff]  ;;  %4316 = vmatprep.subr.bf16.mxu1 %v5332_v9  ;;  %1647 = vmatpush1.bf16.msra.mxu0 %v4631_v7  ;;  %v4637_v13 = vld [vmem:[%s6075_s28 + $0x34] ss:$12 sps:$4 sm:$0xff]   ;;  %vm5334_vm0 = vmmov 0   ;;  %s6840_s3 = sld [smem:[#allocation59_spill]]  ;;  %s6842_s24 = sld [smem:[#allocation60_spill]] }
 0x21c   : > { %1432 = vadd.xlane.f32.xlu0 %v6178_v1  ;;  %4317 = vmatpush3.bf16.msra.mxu1 %v4632_v8  ;;  %v4636_v12 = vld [vmem:[%s6075_s28 + $0x20] ss:$12 sps:$4 sm:$0xff]   ;;  %v4639_v14 = vld [vmem:[%s6075_s28 + $0x30] ss:$12 sps:$4 sm:$0xff]   ;;  %v4640_v15 = vld [vmem:[%s6075_s28 + $0x38] ss:$12 sps:$4 sm:$0xff]  }
 0x21d   : > { %4318 = vmatprep.subr.bf16.mxu1 %v5332_v9  ;;  %1648 = vmatprep.subr.bf16.mxu0 %v4633_v10  ;;  %v4641_v16 = vld [vmem:[%s6075_s28 + $0x4c] ss:$12 sps:$4 sm:$0xff]   ;;  %v4643_v17 = vld [vmem:[%s6075_s28 + $0x48] ss:$12 sps:$4 sm:$0xff]   ;;  %v4644_v18 = vld [vmem:[%s6075_s28 + $0x50] ss:$12 sps:$4 sm:$0xff]  }
 0x21e   : > { %v4645_v19 = vld [vmem:[%s6075_s28 + $0x64] ss:$12 sps:$4 sm:$0xff]   ;;  %v4647_v20 = vld [vmem:[%s6075_s28 + $0x60] ss:$12 sps:$4 sm:$0xff]   ;;  %v4648_v21 = vld [vmem:[%s6075_s28 + $0x68] ss:$12 sps:$4 sm:$0xff]   ;;  %1678 = vmatprep.mubr.bf16.mxu0 %v5333_v23  ;;  %4332 = vmatprep.mubr.msk.bf16.mxu1 %vm5334_vm0, %v5332_v9 }
 0x21f   : > { %1649 = vmatpush1.bf16.msra.mxu0 %v4635_v11  ;;  %v4649_v22 = vld [vmem:[%s6075_s28 + $0x7c] ss:$12 sps:$4 sm:$0xff]   ;;  %v4651_v24 = vld [vmem:[%s6075_s28 + $0x78] ss:$12 sps:$4 sm:$0xff]   ;;  %v4652_v25 = vld [vmem:[%s6075_s28 + $0x80] ss:$12 sps:$4 sm:$0xff]  }
 0x220   : > { %4319 = vmatpush3.bf16.msra.mxu1 %v4636_v12  ;;  %1650 = vmatprep.subr.bf16.mxu0 %v4637_v13  ;;  %v4653_v26 = vld [vmem:[%s6075_s28 + $0x94] ss:$12 sps:$4 sm:$0xff]   ;;  %v4655_v27 = vld [vmem:[%s6075_s28 + $0x90] ss:$12 sps:$4 sm:$0xff]   ;;  %v4656_v28 = vld [vmem:[%s6075_s28 + $0x98] ss:$12 sps:$4 sm:$0xff]  }
 0x221   : > { %4320 = vmatprep.subr.bf16.mxu1 %v5332_v9  ;;  %v4657_v29 = vld [vmem:[%s6075_s28 + $0xac] ss:$12 sps:$4 sm:$0xff]   ;;  %v4659_v30 = vld [vmem:[%s6075_s28 + $0xa8] ss:$12 sps:$4 sm:$0xff]   ;;  %v4660_v31 = vld [vmem:[%s6075_s28 + $0xb0] ss:$12 sps:$4 sm:$0xff]   ;;  %s6841_s10 = scalar_lea.vmem %s6840_s3, %s6118_s11  ;;  %s6843_s20 = scalar_lea.vmem %s6842_s24, %s6118_s11 }
 0x222   : > { %v4090_v40 = vld [vmem:[%s6841_s10] ss:$0 sm:$0xff]  ;;  %v1504_v48 = vshrl.u32 %v1503_v47, 7  ;;  %vm1733_vm3 = vcmask 261120   ;;  %s5336_s30 = smov 32   ;;  %vm1797_vm4 = vcmask 1043456  }
 0x223   : > { %1651 = vmatpush1.bf16.msra.mxu0 %v4639_v14  ;;  %v4091_v43 = vld [vmem:[%s6843_s20] ss:$0 sm:$0xff]  ;;  %s6844_s23 = scalar_lea.vmem [#allocation7], %s6047_s2  ;;  %vm1781_vm6 = vcmask 64512   ;;  %s5337_s9 = smov 64   ;;  %vm2190_vm7 = vcmask 523264  }
 0x224   : > { %4321 = vmatpush3.bf16.msra.mxu1 %v4640_v15  ;;  %1652 = vmatprep.subr.bf16.mxu0 %v4641_v16  ;;  %v6238_v49 = vsub.s32 1, %v1504_v48  ;;  %v1501_v50 = vld [vmem:[%s6144_s27] sm:$0x7]  ;;  %v6241_v51 = vsub.s32 0, %v1504_v48  ;;  %v1513_v52 = vsub.s32 2, %v1504_v48  ;;  %s5335_s27 = smov 96  }
 0x225   : > { %4322 = vmatprep.subr.bf16.mxu1 %v5332_v9  ;;  %v6259_v11 = vld [vmem:[%s6844_s23] sm:$0xff]  ;;  %vm2192_vm8 = vcmask 785408   ;;  %s6845_s15 = sld [smem:[#allocation64_spill]]  ;;  %s6847_s13 = scalar_lea.vmem [#allocation5], %s6047_s2 }
 0x226   : > { %v1510_v53 = vrot.slane %v1501_v50, %v6238_v49  ;;  %v1506_v54 = vrot.slane %v1501_v50, %v6241_v51  ;;  %v1514_v59 = vrot.slane %v1501_v50, %v1513_v52  ;;  %vm1729_vm5 = vcmp.ne.f32.partialorder %v6259_v11, 0.0  ;;  %s6848_s21 = sld [smem:[#allocation65_spill]]  ;;  %s6850_s10 = sld [smem:[#allocation66_spill]] }
 0x227   : > { %1653 = vmatpush1.bf16.msra.mxu0 %v4643_v17 }
 0x228   : > { %4323 = vmatpush3.bf16.msra.mxu1 %v4644_v18  ;;  %1654 = vmatprep.subr.bf16.mxu0 %v4645_v19 }
 0x229   : > { %4324 = vmatprep.subr.bf16.mxu1 %v5332_v9 }
 0x22b   : > { %1655 = vmatpush1.bf16.msra.mxu0 %v4647_v20  ;;  %s6846_s1 = scalar_lea.vmem %s6845_s15, %s6118_s11 }
 0x22c   : > { %4325 = vmatpush3.bf16.msra.mxu1 %v4648_v21  ;;  %1656 = vmatprep.subr.bf16.mxu0 %v4649_v22  ;;  %s6849_s28 = scalar_lea.vmem %s6848_s21, %s6118_s11  ;;  %s6851_s12 = scalar_lea.vmem %s6850_s10, %s6118_s11 }
 0x22d   : > { %4326 = vmatprep.subr.bf16.mxu1 %v5332_v9 }
 0x22f   : > { %1657 = vmatpush1.bf16.msra.mxu0 %v4651_v24 }
 0x230   : > { %4327 = vmatpush3.bf16.msra.mxu1 %v4652_v25  ;;  %1658 = vmatprep.subr.bf16.mxu0 %v4653_v26 }
 0x231   : > { %4328 = vmatprep.subr.bf16.mxu1 %v5332_v9 }
 0x233   : > { %1659 = vmatpush1.bf16.msra.mxu0 %v4655_v27 }
 0x234   : > { %4329 = vmatpush3.bf16.msra.mxu1 %v4656_v28  ;;  %1660 = vmatprep.subr.bf16.mxu0 %v4657_v29 }
 0x235   : > { %4330 = vmatprep.subr.bf16.mxu1 %v5332_v9 }
 0x237   : > { %1661 = vmatpush1.bf16.msra.mxu0 %v4659_v30 }
 0x238   : > { %4331 = vmatpush3.bf16.msra.mxu1 %v4660_v31  ;;  %4360 = vmatprep.subr.bf16.mxu0 %v5332_v9 }
 0x239   : > { %4336 = vmatprep.subr.bf16.mxu1 %v5332_v9 }
 0x2a9   : > { %v1433_v2 = vpop.xlane.xlu0 %1432 }
 0x2aa   : > { %v1435_v3 = vmul.f32 0.0078125, %v1433_v2 }
 0x2ac   : > { %v6182_v4 = vsub.f32 %v6178_v1, %v1435_v3 }
 0x2ae   : > { %v1437_v5 = vmul.f32 %v6182_v4, %v6182_v4  ;;  %v1458_v41 = vmul.f32 %v4090_v40, %v6182_v4 }
 0x2b0   : > { %1438 = vadd.xlane.f32.xlu0 %v1437_v5 }
 0x33d   : > { %v1439_v32 = vpop.xlane.xlu0 %1438 }
 0x33e   : > { %v1441_v33 = vmul.f32 0.007874016, %v1439_v32 }
 0x340   : > { %4749 = vrsqrt.f32 %v1441_v33  ;;  %vm1444_vm1 = vcmp.eq.f32.partialorder %v1441_v33, inf  ;;  %v1447_v36 = vand.u32 2147483648, %v1441_v33  ;;  %vm1446_vm2 = vcmp.eq.f32.partialorder %v1441_v33, 0.0 }
 0x34a   : > { %v4750_v34 = vpop.eup %4749 }
 0x34b   : > { %v1443_v35 = vmul.f32 %v4750_v34, %v1441_v33 }
 0x34d   : > { %v1445_v37 = vsel %vm1444_vm1, %v1441_v33, %v1443_v35 }
 0x34e   : > { %v1448_v38 = vsel %vm1446_vm2, %v1447_v36, %v1445_v37 }
 0x34f   : > { %v1449_v39 = vadd.f32 1e-06, %v1448_v38 }
 0x351   : > { %4751 = vrcp.f32 %v1449_v39 }
 0x35b   : > { %v4752_v42 = vpop.eup %4751 }
 0x35c   : > { %v1459_v44 = vmul.f32 %v4752_v42, %v1458_v41 }
 0x35e   : > { %v1467_v45 = vadd.f32 %v4091_v43, %v1459_v44 }
 0x360   : > { %v1468_v46 = vpack.c.bf16 %v1467_v45, %v1467_v45 }
 0x362   : > { %1679 = vmatmul.mubr.bf16.vlgmr.msra.gmra.mrb[0].mxu0 %v1468_v46  ;;  %4333 = vmatmul.mubr.bf16.vlgmr.msra.gmra.mrb[0].mxu1 %v1468_v46 }
 0x363   : > { %4338 = vmatprep.mubr.msk.bf16.mxu1 %vm5334_vm0, %v5332_v9  ;;  %4362 = vmatprep.mubr.msk.bf16.mxu0 %vm5334_vm0, %v5332_v9 }
 0x435   : > { %v1680_v55 = vpop.f32.mrb[0].mxu0  ;;  %v1721_v56 = vpop.f32.mrb[0].mxu1 }
 0x436   : > { %v1682_v57 = vpop.f32.mrb[1].mxu0  ;;  %v4334_v58 = vpop.f32.mrb[1].mxu1  ;;  %v1681_v2 = vadd.f32 %v1680_v55, %v1506_v54  ;;  %v1722_v4 = vadd.f32 %v1721_v56, %v1514_v59 }
 0x437   : > { %v1683_v60 = vadd.f32 %v1682_v57, %v1510_v53  ;;  %v1684_v61 = vpop.f32.mrb[2].mxu0  ;;  %v1724_v62 = vpop.f32.mrb[2].mxu1 }
 0x438   : > { %v1685_v63 = vpop.f32.mrb[3].mxu0  ;;  %v4335_v0 = vpop.f32.mrb[3].mxu1  ;;  %v1727_v6 = vmul.f32 0.17677669, %v1681_v2  ;;  %v6248_v7 = vpack.c.bf16 %v1722_v4, %v1722_v4 }
 0x439   : > { %v1731_v3 = vpack.c.bf16 %v1683_v60, %v1683_v60 }
 0x43a   : > { %v1730_v8 = vpack.c.bf16 %v1727_v6, %v1727_v6  ;;  %v1799_v10 = vsel %vm1797_vm4, %v6248_v7, 0 }
 0x43b   : > { %1845 = vrot.lane.b32.xlu0 %v1731_v3, %s5335_s27  ;;  %v1738_v5 = vsel %vm1733_vm3, %v1731_v3, 0 }
 0x43c   : > { %4337 = vmatpush3.bf16.xpose.msra.mxu1 %v1738_v5 }
 0x43d   : > { %4342 = vmatprep.subr.bf16.mxu1 %v5332_v9 }
 0x43f   : > { %2068 = vrot.lane.b32.xlu0 %v1731_v3, %s5336_s30 }
 0x443   : > { %4339 = vmatmul.mubr.msk.bf16.vlgmr.msra.gmra.mrb[4].mxu1 %vm1733_vm3, %v1730_v8 }
 0x444   : > { %4343 = vmatpush3.bf16.msra.mxu1 %v1799_v10  ;;  %4344 = vmatprep.mubr.msk.bf16.mxu1 %vm5334_vm0, %v5332_v9 }
 0x445   : > { %4348 = vmatprep.subr.bf16.mxu1 %v5332_v9 }
 0x4ad   : > { %v1846_v26 = vpop.permute.xlu0 %1845 }
 0x4ae   : > { %v1851_v33 = vsel %vm1733_vm3, %v1846_v26, 0 }
 0x4b1   : > { %v2069_v31 = vpop.permute.xlu0 %2068 }
 0x4b2   : > { %v2074_v35 = vsel %vm1733_vm3, %v2069_v31, 0 }
 0x516   : > { %v1774_v12 = vpop.f32.mrb[4].mxu1 }
 0x517   : > { %v1780_v13 = vsel %vm1729_vm5, %v1774_v12, -1e+09  ;;  %v4340_v14 = vpop.f32.mrb[5].mxu1 }
 0x518   : > { %v1777_v15 = vpop.f32.mrb[6].mxu1  ;;  %v1782_v16 = vsel %vm1781_vm6, %v1780_v13, -inf }
 0x519   : > { %1783 = vmax.xlane.f32.xlu1 %v1782_v16  ;;  %v4341_v17 = vpop.f32.mrb[7].mxu1 }
 0x5a6   : > { %v1784_v18 = vpop.xlane.xlu1 %1783 }
 0x5a7   : > { %v1785_v19 = vsub.f32 %v1780_v13, %v1784_v18 }
 0x5a9   : > { %v1786_v20 = vmul.f32 1.442695, %v1785_v19 }
 0x5ab   : > { %4753 = vpow2.f32 %v1786_v20 }
 0x5b5   : > { %v4754_v21 = vpop.eup %4753 }
 0x5b6   : > { %v1788_v22 = vsel %vm1781_vm6, %v4754_v21, 0.0 }
 0x5b7   : > { %1789 = vadd.xlane.f32.xlu1 %v1788_v22 }
 0x5c8   : > { %1842 = vrot.lane.b32.xlu1 %v1730_v8, %s5335_s27 }
 0x5cc   : > { %1957 = vrot.lane.b32.xlu1 %v1731_v3, %s5337_s9 }
 0x5d0   : > { %1955 = vrot.lane.b32.xlu1 %v1730_v8, %s5337_s9 }
 0x5d4   : > { %2066 = vrot.lane.b32.xlu1 %v1730_v8, %s5336_s30 }
 0x644   : > { %v1790_v24 = vpop.xlane.xlu1 %1789 }
 0x645   : > { %4755 = vrcp.f32 %v1790_v24 }
 0x648   : > { %v1843_v25 = vpop.permute.xlu1 %1842 }
 0x64c   : > { %v1958_v27 = vpop.permute.xlu1 %1957 }
 0x64d   : > { %v1963_v28 = vsel %vm1733_vm3, %v1958_v27, 0 }
 0x64e   : > { %4361 = vmatpush3.bf16.xpose.msra.mxu0 %v1963_v28 }
 0x64f   : > { %v4756_v29 = vpop.eup %4755  ;;  %4372 = vmatprep.subr.bf16.mxu0 %v5332_v9 }
 0x650   : > { %v1792_v30 = vmul.f32 %v4756_v29, %v4754_v21  ;;  %v1956_v34 = vpop.permute.xlu1 %1955 }
 0x652   : > { %v1793_v32 = vpack.c.bf16 %v1792_v30, %v1792_v30 }
 0x654   : > { %4345 = vmatmul.mubr.msk.bf16.vlgmr.msra.gmra.mrb[8].mxu1 %vm1781_vm6, %v1793_v32  ;;  %v2067_v36 = vpop.permute.xlu1 %2066 }
 0x655   : > { %4349 = vmatpush3.bf16.xpose.msra.mxu1 %v1851_v33  ;;  %4363 = vmatmul.mubr.msk.bf16.vlgmr.msra.gmra.mrb[4].mxu0 %vm1733_vm3, %v1956_v34  ;;  %v4661_v33 = vld [vmem:[%s6083_s8] sm:$0xff]   ;;  %v4662_v34 = vld [vmem:[%s6083_s8 + $0x8] sm:$0xff]  }
 0x656   : > { %4373 = vmatpush3.bf16.xpose.msra.mxu0 %v2074_v35  ;;  %4350 = vmatprep.mubr.msk.bf16.mxu1 %vm5334_vm0, %v5332_v9  ;;  %v4663_v35 = vld [vmem:[%s6083_s8 + $0x10] sm:$0xff]  }
 0x657   : > { %4374 = vmatprep.mubr.msk.bf16.mxu0 %vm5334_vm0, %v5332_v9  ;;  %4354 = vmatprep.subr.bf16.mxu1 %v5332_v9 }
 0x658   : > { %4384 = vmatprep.subr.bf16.mxu0 %v5332_v9 }
 0x65c   : > { %4351 = vmatmul.mubr.msk.bf16.vlgmr.msra.gmra.mrb[12].mxu1 %vm1733_vm3, %v1843_v25 }
 0x65d   : > { %4375 = vmatmul.mubr.msk.bf16.vlgmr.msra.gmra.mrb[8].mxu0 %vm1733_vm3, %v2067_v36  ;;  %4356 = vmatprep.mubr.msk.bf16.mxu1 %vm5334_vm0, %v5332_v9  ;;  %v4664_v36 = vld [vmem:[%s6083_s8 + $0x18] sm:$0xff]  }
 0x65e   : > { %4400 = vmatprep.mubr.msk.bf16.mxu0 %vm5334_vm0, %v5332_v9  ;;  %4385 = vmatpush3.bf16.msra.mxu0 %v4661_v33  ;;  %v4698_v33 = vld [vmem:[%s6090_s29 + $0x28] sm:$0xff]  }
 0x65f   : > { %4386 = vmatprep.subr.bf16.mxu0 %v5332_v9 }
 0x662   : > { %4387 = vmatpush3.bf16.msra.mxu0 %v4662_v34 }
 0x663   : > { %4388 = vmatprep.subr.bf16.mxu0 %v5332_v9 }
 0x666   : > { %4389 = vmatpush3.bf16.msra.mxu0 %v4663_v35  ;;  %v4699_v35 = vld [vmem:[%s6090_s29 + $0x30] sm:$0xff]  }
 0x667   : > { %4390 = vmatprep.subr.bf16.mxu0 %v5332_v9 }
 0x66a   : > { %4391 = vmatpush3.bf16.msra.mxu0 %v4664_v36  ;;  %v4700_v36 = vld [vmem:[%s6090_s29 + $0x38] sm:$0xff]  }
 0x66b   : > { %4392 = vmatprep.subr.bf16.mxu0 %v5332_v9 }
 0x727   : > { %v6288_v37 = vpop.f32.mrb[8].mxu1 }
 0x728   : > { %v4346_v38 = vpop.f32.mrb[9].mxu1  ;;  %v1999_v39 = vpop.f32.mrb[4].mxu0 }
 0x729   : > { %v2005_v40 = vsel %vm1729_vm5, %v1999_v39, -1e+09  ;;  %v1838_v41 = vpop.f32.mrb[10].mxu1  ;;  %v4364_v42 = vpop.f32.mrb[5].mxu0  ;;  %v4665_v38 = vld [vmem:[%s6083_s8 + $0x20] sm:$0xff]   ;;  %v4666_v39 = vld [vmem:[%s6083_s8 + $0x28] sm:$0xff]  }
 0x72a   : > { %v4347_v43 = vpop.f32.mrb[11].mxu1  ;;  %v2002_v44 = vpop.f32.mrb[6].mxu0  ;;  %v2006_v45 = vsel %vm1781_vm6, %v2005_v40, -inf  ;;  %4393 = vmatpush3.bf16.msra.mxu0 %v4665_v38 }
 0x72b   : > { %2007 = vmax.xlane.f32.xlu1 %v2006_v45  ;;  %v4365_v46 = vpop.f32.mrb[7].mxu0  ;;  %4394 = vmatprep.subr.bf16.mxu0 %v5332_v9  ;;  %v4668_v45 = vld [vmem:[%s6083_s8 + $0x38] sm:$0xff]  }
 0x72e   : > { %4395 = vmatpush3.bf16.msra.mxu0 %v4666_v39 }
 0x72f   : > { %v1887_v47 = vpop.f32.mrb[12].mxu1  ;;  %4396 = vmatprep.subr.bf16.mxu0 %v5332_v9 }
 0x730   : > { %v1893_v48 = vsel %vm1729_vm5, %v1887_v47, -1e+09  ;;  %v4352_v50 = vpop.f32.mrb[13].mxu1  ;;  %v2110_v52 = vpop.f32.mrb[8].mxu0 }
 0x731   : > { %v1890_v53 = vpop.f32.mrb[14].mxu1  ;;  %v4376_v54 = vpop.f32.mrb[9].mxu0  ;;  %v1894_v55 = vsel %vm1781_vm6, %v1893_v48, -inf  ;;  %v2116_v56 = vsel %vm1729_vm5, %v2110_v52, -1e+09 }
 0x732   : > { %v2113_v57 = vpop.f32.mrb[10].mxu0  ;;  %1895 = vmax.xlane.f32.xlu0 %v1894_v55  ;;  %v4353_v58 = vpop.f32.mrb[15].mxu1  ;;  %v2117_v60 = vsel %vm1781_vm6, %v2116_v56, -inf }
 0x733   : > { %v4377_v59 = vpop.f32.mrb[11].mxu0 }
 0x736   : > { %2118 = vmax.xlane.f32.xlu0 %v2117_v60 }
 0x7b8   : > { %v2008_v61 = vpop.xlane.xlu1 %2007 }
 0x7b9   : > { %v2009_v62 = vsub.f32 %v2005_v40, %v2008_v61  ;;  %v4667_v40 = vld [vmem:[%s6083_s8 + $0x30] sm:$0xff]  }
 0x7ba   : > { %4397 = vmatpush3.bf16.msra.mxu0 %v4667_v40 }
 0x7bb   : > { %v2010_v63 = vmul.f32 1.442695, %v2009_v62  ;;  %4398 = vmatprep.subr.bf16.mxu0 %v5332_v9 }
 0x7bd   : > { %4757 = vpow2.f32 %v2010_v63  ;;  %v4124_v63 = vld [vmem:[%s6846_s1] ss:$0 sm:$0xff] }
 0x7be   : > { %4399 = vmatpush3.bf16.msra.mxu0 %v4668_v45 }
 0x7bf   : > { %v1896_v0 = vpop.xlane.xlu0 %1895 }
 0x7c0   : > { %v1897_v2 = vsub.f32 %v1893_v48, %v1896_v0 }
 0x7c2   : > { %v1898_v3 = vmul.f32 1.442695, %v1897_v2 }
 0x7c3   : > { %v2119_v4 = vpop.xlane.xlu0 %2118 }
 0x7c4   : > { %4759 = vpow2.f32 %v1898_v3  ;;  %v2120_v5 = vsub.f32 %v2116_v56, %v2119_v4 }
 0x7c6   : > { %v2121_v6 = vmul.f32 1.442695, %v2120_v5 }
 0x7c7   : > { %v4758_v8 = vpop.eup %4757 }
 0x7c8   : > { %4761 = vpow2.f32 %v2121_v6  ;;  %v2012_v10 = vsel %vm1781_vm6, %v4758_v8, 0.0  ;;  %v4669_v6 = vld [vmem:[%s6093_s26] ss:$8 sps:$4 sm:$0xff]  }
 0x7c9   : > { %2013 = vadd.xlane.f32.xlu0 %v2012_v10  ;;  %v4674_v10 = vld [vmem:[%s6093_s26 + $0x14] ss:$8 sps:$4 sm:$0xff]  }
 0x7ce   : > { %v4760_v11 = vpop.eup %4759 }
 0x7cf   : > { %v1900_v12 = vsel %vm1781_vm6, %v4760_v11, 0.0 }
 0x7d0   : > { %1901 = vadd.xlane.f32.xlu0 %v1900_v12 }
 0x7d2   : > { %v4762_v13 = vpop.eup %4761 }
 0x7d3   : > { %v2123_v14 = vsel %vm1781_vm6, %v4762_v13, 0.0 }
 0x7d4   : > { %2124 = vadd.xlane.f32.xlu1 %v2123_v14 }
 0x7e5   : > { %2018 = vrot.lane.b32.xlu1 %v6248_v7, %s5337_s9 }
 0x7e6   : > { %1907 = vrot.lane.b32.xlu0 %v6248_v7, %s5335_s27 }
 0x7e9   : > { %2129 = vrot.lane.b32.xlu1 %v6248_v7, %s5336_s30 }
 0x856   : > { %v2014_v15 = vpop.xlane.xlu0 %2013 }
 0x85d   : > { %v1902_v16 = vpop.xlane.xlu0 %1901 }
 0x85e   : > { %4763 = vrcp.f32 %v1902_v16  ;;  %v4675_v16 = vld [vmem:[%s6093_s26 + $0x20] ss:$8 sps:$4 sm:$0xff]  }
 0x85f   : > { %4765 = vrcp.f32 %v2014_v15  ;;  %v4677_v15 = vld [vmem:[%s6093_s26 + $0x24] ss:$8 sps:$4 sm:$0xff]  }
 0x861   : > { %v1908_v17 = vpop.permute.xlu0 %1907  ;;  %v2125_v19 = vpop.xlane.xlu1 %2124 }
 0x862   : > { %v1913_v18 = vsel %vm1797_vm4, %v1908_v17, 0  ;;  %4767 = vrcp.f32 %v2125_v19  ;;  %v4678_v17 = vld [vmem:[%s6090_s29] sm:$0xff]   ;;  %v4679_v19 = vld [vmem:[%s6093_s26 + $0x30] ss:$8 sps:$4 sm:$0xff]  }
 0x863   : > { %4355 = vmatpush3.bf16.msra.mxu1 %v1913_v18  ;;  %v4681_v18 = vld [vmem:[%s6093_s26 + $0x34] ss:$8 sps:$4 sm:$0xff]  }
 0x864   : > { %4366 = vmatprep.subr.bf16.mxu1 %v5332_v9 }
 0x865   : > { %v2019_v22 = vpop.permute.xlu1 %2018 }
 0x866   : > { %v2024_v26 = vsel %vm1797_vm4, %v2019_v22, 0  ;;  %v4683_v22 = vld [vmem:[%s6093_s26 + $0x40] ss:$8 sps:$4 sm:$0xff]  }
 0x868   : > { %v4764_v20 = vpop.eup %4763 }
 0x869   : > { %v1904_v21 = vmul.f32 %v4764_v20, %v4760_v11  ;;  %v4766_v25 = vpop.eup %4765  ;;  %v2130_v27 = vpop.permute.xlu1 %2129  ;;  %v4672_v11 = vld [vmem:[%s6093_s26 + $0x10] ss:$8 sps:$4 sm:$0xff]   ;;  %v4682_v20 = vld [vmem:[%s6090_s29 + $0x8] sm:$0xff]  }
 0x86a   : > { %v2016_v7 = vmul.f32 %v4766_v25, %v4758_v8  ;;  %v2135_v30 = vsel %vm1797_vm4, %v2130_v27, 0  ;;  %v4671_v8 = vld [vmem:[%s6093_s26 + $0x4] ss:$8 sps:$4 sm:$0xff]   ;;  %v4689_v25 = vld [vmem:[%s6093_s26 + $0x54] ss:$8 sps:$4 sm:$0xff]  }
 0x86b   : > { %v1905_v24 = vpack.c.bf16 %v1904_v21, %v1904_v21  ;;  %2563 = vmatprep.subr.bf16.mxu0 %v4671_v8  ;;  %v4685_v21 = vld [vmem:[%s6093_s26 + $0x44] ss:$8 sps:$4 sm:$0xff]   ;;  %v4691_v27 = vld [vmem:[%s6093_s26 + $0x60] ss:$8 sps:$4 sm:$0xff]  }
 0x86c   : > { %v2017_v28 = vpack.c.bf16 %v2016_v7, %v2016_v7  ;;  %v4768_v29 = vpop.eup %4767  ;;  %v4690_v7 = vld [vmem:[%s6090_s29 + $0x18] sm:$0xff]  }
 0x86d   : > { %4357 = vmatmul.mubr.msk.bf16.vlgmr.msra.gmra.mrb[16].mxu1 %vm1781_vm6, %v1905_v24  ;;  %v2127_v31 = vmul.f32 %v4768_v29, %v4762_v13  ;;  %v4686_v24 = vld [vmem:[%s6090_s29 + $0x10] sm:$0xff]   ;;  %v4694_v29 = vld [vmem:[%s6090_s29 + $0x20] sm:$0xff]  }
 0x86e   : > { %4367 = vmatpush3.bf16.msra.mxu1 %v2024_v26  ;;  %4368 = vmatprep.mubr.msk.bf16.mxu1 %vm5334_vm0, %v5332_v9  ;;  %v4687_v26 = vld [vmem:[%s6093_s26 + $0x50] ss:$8 sps:$4 sm:$0xff]  }
 0x86f   : > { %4378 = vmatprep.subr.bf16.mxu1 %v5332_v9  ;;  %v2128_v32 = vpack.c.bf16 %v2127_v31, %v2127_v31  ;;  %v4695_v31 = vld [vmem:[%s6093_s26 + $0x70] ss:$8 sps:$4 sm:$0xff]  }
 0x875   : > { %4369 = vmatmul.mubr.msk.bf16.vlgmr.msra.gmra.mrb[20].mxu1 %vm1781_vm6, %v2017_v28  ;;  %v4693_v28 = vld [vmem:[%s6093_s26 + $0x64] ss:$8 sps:$4 sm:$0xff]  }
 0x876   : > { %4379 = vmatpush3.bf16.msra.mxu1 %v2135_v30  ;;  %4380 = vmatprep.mubr.msk.bf16.mxu1 %vm5334_vm0, %v5332_v9  ;;  %v4697_v30 = vld [vmem:[%s6093_s26 + $0x74] ss:$8 sps:$4 sm:$0xff]  }
 0x877   : > { %4404 = vmatprep.subr.bf16.mxu1 %v5332_v9 }
 0x87d   : > { %4381 = vmatmul.mubr.msk.bf16.vlgmr.msra.gmra.mrb[24].mxu1 %vm1781_vm6, %v2128_v32  ;;  %v1431_v32 = vld [vmem:[%s6847_s13] sm:$0xff] }
 0x87e   : > { %4420 = vmatprep.mubr.msk.bf16.mxu1 %vm5334_vm0, %v5332_v9  ;;  %4405 = vmatpush3.bf16.msra.mxu1 %v4678_v17  ;;  %v2454_v34 = vpack.c.bf16 %v1431_v32, %v1431_v32 }
 0x87f   : > { %4406 = vmatprep.subr.bf16.mxu1 %v5332_v9 }
 0x882   : > { %4407 = vmatpush3.bf16.msra.mxu1 %v4682_v20 }
 0x883   : > { %4408 = vmatprep.subr.bf16.mxu1 %v5332_v9 }
 0x886   : > { %4409 = vmatpush3.bf16.msra.mxu1 %v4686_v24 }
 0x887   : > { %4410 = vmatprep.subr.bf16.mxu1 %v5332_v9 }
 0x88a   : > { %4411 = vmatpush3.bf16.msra.mxu1 %v4690_v7 }
 0x88b   : > { %4412 = vmatprep.subr.bf16.mxu1 %v5332_v9 }
 0x88e   : > { %4413 = vmatpush3.bf16.msra.mxu1 %v4694_v29 }
 0x88f   : > { %4414 = vmatprep.subr.bf16.mxu1 %v5332_v9 }
 0x892   : > { %4415 = vmatpush3.bf16.msra.mxu1 %v4698_v33 }
 0x893   : > { %4416 = vmatprep.subr.bf16.mxu1 %v5332_v9 }
 0x896   : > { %4417 = vmatpush3.bf16.msra.mxu1 %v4699_v35 }
 0x897   : > { %4418 = vmatprep.subr.bf16.mxu1 %v5332_v9 }
 0x89a   : > { %4419 = vmatpush3.bf16.msra.mxu1 %v4700_v36 }
 0x89b   : > { %4424 = vmatprep.subr.bf16.mxu1 %v5332_v9 }
 0x940   : > { %v1949_v41 = vpop.f32.mrb[16].mxu1 }
 0x941   : > { %2178 = vrot.lane.b32.xlu1 %v1949_v41, %s5336_s30  ;;  %v4358_v42 = vpop.f32.mrb[17].mxu1 }
 0x942   : > { %v1952_v43 = vpop.f32.mrb[18].mxu1 }
 0x943   : > { %v4359_v44 = vpop.f32.mrb[19].mxu1 }
 0x948   : > { %v2060_v46 = vpop.f32.mrb[20].mxu1 }
 0x949   : > { %2182 = vrot.lane.b32.xlu0 %v2060_v46, %s5337_s9  ;;  %v4370_v47 = vpop.f32.mrb[21].mxu1  ;;  %v4133_v46 = vld [vmem:[%s6849_s28] ss:$0 sm:$0xff] }
 0x94a   : > { %v2063_v48 = vpop.f32.mrb[22].mxu1 }
 0x94b   : > { %v4371_v50 = vpop.f32.mrb[23].mxu1 }
 0x94c   : > { %v4134_v50 = vld [vmem:[%s6851_s12] ss:$0 sm:$0xff] }
 0x950   : > { %v2171_v52 = vpop.f32.mrb[24].mxu1 }
 0x951   : > { %2186 = vrot.lane.b32.xlu1 %v2171_v52, %s5335_s27  ;;  %v4382_v53 = vpop.f32.mrb[25].mxu1 }
 0x952   : > { %v2174_v54 = vpop.f32.mrb[26].mxu1 }
 0x953   : > { %v4383_v55 = vpop.f32.mrb[27].mxu1 }
 0x954   : > { %v2471_v55 = vld [vmem:[%s6158_s22] sm:$0x3]  ;;  %s6853_s22 = scalar_lea.vmem [#allocation8], %s6047_s2  ;;  %s6854_s2 = sld [smem:[#allocation53_spill]] }
 0x9b3   : > { %v2179_v56 = vpop.permute.xlu1 %2178 }
 0x9b4   : > { %v2189_v58 = vsel %vm1733_vm3, %v6288_v37, %v2179_v56  ;;  %v2476_v56 = vrot.slane %v2471_v55, %v6241_v51 }
 0x9bb   : > { %v2183_v57 = vpop.permute.xlu0 %2182 }
 0x9bc   : > { %v2191_v59 = vsel %vm2190_vm7, %v2189_v58, %v2183_v57 }
 0x9c3   : > { %v2187_v60 = vpop.permute.xlu1 %2186 }
 0x9c4   : > { %v2193_v61 = vsel %vm2192_vm8, %v2191_v59, %v2187_v60 }
 0x9c5   : > { %v2194_v62 = vpack.c.bf16 %v2193_v61, %v2193_v61 }
 0x9c7   : > { %4401 = vmatmul.mubr.bf16.vlgmr.msra.gmra.mrb[12].mxu0 %v2194_v62 }
 0x9c8   : > { %2595 = vmatprep.mubr.bf16.mxu0 %v5333_v23  ;;  %2564 = vmatpush1.bf16.msra.mxu0 %v4669_v6 }
 0x9c9   : > { %2565 = vmatprep.subr.bf16.mxu0 %v4674_v10 }
 0x9cc   : > { %2566 = vmatpush1.bf16.msra.mxu0 %v4672_v11 }
 0x9cd   : > { %2567 = vmatprep.subr.bf16.mxu0 %v4677_v15 }
 0x9d0   : > { %2568 = vmatpush1.bf16.msra.mxu0 %v4675_v16 }
 0x9d1   : > { %2569 = vmatprep.subr.bf16.mxu0 %v4681_v18  ;;  %v6439_v18 = vld [vmem:[%s6853_s22] sm:$0xff] }
 0x9d2   : > { %vm2605_vm11 = vcmp.ne.f32.partialorder %v6439_v18, 0.0 }
 0x9d4   : > { %2570 = vmatpush1.bf16.msra.mxu0 %v4679_v19 }
 0x9d5   : > { %2571 = vmatprep.subr.bf16.mxu0 %v4685_v21 }
 0x9d8   : > { %2572 = vmatpush1.bf16.msra.mxu0 %v4683_v22 }
 0x9d9   : > { %2573 = vmatprep.subr.bf16.mxu0 %v4689_v25 }
 0x9dc   : > { %2574 = vmatpush1.bf16.msra.mxu0 %v4687_v26 }
 0x9dd   : > { %2575 = vmatprep.subr.bf16.mxu0 %v4693_v28 }
 0x9e0   : > { %2576 = vmatpush1.bf16.msra.mxu0 %v4691_v27 }
 0x9e1   : > { %2577 = vmatprep.subr.bf16.mxu0 %v4697_v30 }
 0x9e4   : > { %2578 = vmatpush1.bf16.msra.mxu0 %v4695_v31 }
 0x9e5   : > { %4448 = vmatprep.subr.bf16.mxu0 %v5332_v9 }
 0x9e7   : > { %2596 = vmatmul.mubr.bf16.vlgmr.msra.gmra.mrb[16].mxu0 %v2454_v34 }
 0x9e8   : > { %4450 = vmatprep.mubr.msk.bf16.mxu0 %vm5334_vm0, %v5332_v9 }
 0xa9a   : > { %v2300_v0 = vpop.f32.mrb[12].mxu0 }
 0xa9b   : > { %v2301_v2 = vadd.f32 %v4124_v63, %v2300_v0  ;;  %v4402_v37 = vpop.f32.mrb[13].mxu0  ;;  %v2480_v0 = vrot.slane %v2471_v55, %v6238_v49 }
 0xa9c   : > { %v2303_v3 = vpop.f32.mrb[14].mxu0 }
 0xa9d   : > { %v6352_v4 = vadd.f32 %v2301_v2, %v6178_v1  ;;  %v4403_v5 = vpop.f32.mrb[15].mxu0  ;;  %v4135_v2 = vld [vmem:[%s1408_s6] ss:$0 sm:$0xff]  ;;  %s6855_s6 = scalar_lea.vmem [#allocation17], %s6072_s7 }
 0xa9f   : > { %2307 = vadd.xlane.f32.xlu0 %v6352_v4 }
 0xaba   : > { %v2597_v57 = vpop.f32.mrb[16].mxu0 }
 0xabb   : > { %v2598_v58 = vadd.f32 %v2597_v57, %v2476_v56  ;;  %v2599_v59 = vpop.f32.mrb[17].mxu0 }
 0xabc   : > { %v2601_v60 = vpop.f32.mrb[18].mxu0  ;;  %v2600_v37 = vadd.f32 %v2599_v59, %v2480_v0 }
 0xabd   : > { %v2607_v61 = vpack.c.bf16 %v2598_v58, %v2598_v58  ;;  %v2602_v62 = vpop.f32.mrb[19].mxu0 }
 0xabe   : > { %v6420_v10 = vpack.c.bf16 %v2600_v37, %v2600_v37 }
 0xabf   : > { %v2613_v63 = vsel %vm1733_vm3, %v2607_v61, 0 }
 0xb2c   : > { %v2308_v12 = vpop.xlane.xlu0 %2307 }
 0xb2d   : > { %v2309_v1 = vmul.f32 0.0078125, %v2308_v12 }
 0xb2f   : > { %v6360_v13 = vsub.f32 %v6352_v4, %v2309_v1 }
 0xb31   : > { %v2311_v14 = vmul.f32 %v6360_v13, %v6360_v13  ;;  %v2331_v47 = vmul.f32 %v4133_v46, %v6360_v13  ;;  %v2672_v13 = vsel %vm1797_vm4, %v6420_v10, 0 }
 0xb33   : > { %2312 = vadd.xlane.f32.xlu1 %v2311_v14 }
 0xbc0   : > { %v2313_v38 = vpop.xlane.xlu1 %2312 }
 0xbc1   : > { %v2314_v39 = vmul.f32 0.007874016, %v2313_v38 }
 0xbc3   : > { %4769 = vrsqrt.f32 %v2314_v39  ;;  %vm2317_vm9 = vcmp.eq.f32.partialorder %v2314_v39, inf  ;;  %v2320_v42 = vand.u32 2147483648, %v2314_v39  ;;  %vm2319_vm10 = vcmp.eq.f32.partialorder %v2314_v39, 0.0 }
 0xbcd   : > { %v4770_v40 = vpop.eup %4769 }
 0xbce   : > { %v2316_v41 = vmul.f32 %v4770_v40, %v2314_v39 }
 0xbd0   : > { %v2318_v43 = vsel %vm2317_vm9, %v2314_v39, %v2316_v41 }
 0xbd1   : > { %v2321_v44 = vsel %vm2319_vm10, %v2320_v42, %v2318_v43 }
 0xbd2   : > { %v2322_v45 = vadd.f32 1e-06, %v2321_v44 }
 0xbd4   : > { %4771 = vrcp.f32 %v2322_v45 }
 0xbde   : > { %v4772_v48 = vpop.eup %4771 }
 0xbdf   : > { %v2332_v52 = vmul.f32 %v4772_v48, %v2331_v47 }
 0xbe1   : > { %v2340_v53 = vadd.f32 %v4134_v50, %v2332_v52 }
 0xbe3   : > { %v2341_v54 = vpack.c.bf16 %v2340_v53, %v2340_v53 }
 0xbe5   : > { %4421 = vmatmul.mubr.bf16.vlgmr.msra.gmra.mrb[28].mxu1 %v2341_v54 }
 0xbe6   : > { %4426 = vmatprep.mubr.msk.bf16.mxu1 %vm5334_vm0, %v5332_v9  ;;  %4425 = vmatpush3.bf16.xpose.msra.mxu1 %v2613_v63 }
 0xbe7   : > { %4430 = vmatprep.subr.bf16.mxu1 %v5332_v9 }
 0xcb8   : > { %v2447_v3 = vpop.f32.mrb[28].mxu1 }
 0xcb9   : > { %v2448_v5 = vadd.f32 %v4135_v2, %v2447_v3  ;;  %v4422_v6 = vpop.f32.mrb[29].mxu1 }
 0xcba   : > { %v2450_v8 = vpop.f32.mrb[30].mxu1 }
 0xcbb   : > { %v2453_v11 = vmul.f32 0.17677669, %v2448_v5  ;;  %v4423_v12 = vpop.f32.mrb[31].mxu1 }
 0xcbd   : > { %v2606_v1 = vpack.c.bf16 %v2453_v11, %v2453_v11 }
 0xcbf   : > { %2715 = vrot.lane.b32.xlu1 %v2606_v1, %s5335_s27  ;;  %4427 = vmatmul.mubr.msk.bf16.vlgmr.msra.gmra.mrb[32].mxu1 %vm1733_vm3, %v2606_v1 }
 0xcc0   : > { %4431 = vmatpush3.bf16.msra.mxu1 %v2672_v13  ;;  %4432 = vmatprep.mubr.msk.bf16.mxu1 %vm5334_vm0, %v5332_v9 }
 0xcc1   : > { %4436 = vmatprep.subr.bf16.mxu1 %v5332_v9 }
 0xcc3   : > { %2830 = vrot.lane.b32.xlu1 %v2607_v61, %s5337_s9 }
 0xcc7   : > { %2828 = vrot.lane.b32.xlu1 %v2606_v1, %s5337_s9 }
 0xccb   : > { %2939 = vrot.lane.b32.xlu1 %v2606_v1, %s5336_s30 }
 0xd31   : > { %v2716_v14 = vpop.permute.xlu1 %2715 }
 0xd35   : > { %v2831_v15 = vpop.permute.xlu1 %2830 }
 0xd36   : > { %v2836_v16 = vsel %vm1733_vm3, %v2831_v15, 0 }
 0xd37   : > { %4449 = vmatpush3.bf16.xpose.msra.mxu0 %v2836_v16 }
 0xd38   : > { %4460 = vmatprep.subr.bf16.mxu0 %v5332_v9 }
 0xd39   : > { %v2829_v17 = vpop.permute.xlu1 %2828 }
 0xd3d   : > { %v2940_v44 = vpop.permute.xlu1 %2939 }
 0xd3e   : > { %4451 = vmatmul.mubr.msk.bf16.vlgmr.msra.gmra.mrb[20].mxu0 %vm1733_vm3, %v2829_v17 }
 0xd3f   : > { %4462 = vmatprep.mubr.msk.bf16.mxu0 %vm5334_vm0, %v5332_v9 }
 0xd92   : > { %v2649_v19 = vpop.f32.mrb[32].mxu1 }
 0xd93   : > { %v2655_v20 = vsel %vm2605_vm11, %v2649_v19, -1e+09  ;;  %v4428_v21 = vpop.f32.mrb[33].mxu1 }
 0xd94   : > { %v2652_v22 = vpop.f32.mrb[34].mxu1  ;;  %v2656_v24 = vsel %vm1781_vm6, %v2655_v20, -inf }
 0xd95   : > { %2657 = vmax.xlane.f32.xlu0 %v2656_v24  ;;  %v4429_v25 = vpop.f32.mrb[35].mxu1 }
 0xe11   : > { %v2872_v26 = vpop.f32.mrb[20].mxu0 }
 0xe12   : > { %v2878_v7 = vsel %vm2605_vm11, %v2872_v26, -1e+09  ;;  %v4452_v27 = vpop.f32.mrb[21].mxu0 }
 0xe13   : > { %v2875_v28 = vpop.f32.mrb[22].mxu0  ;;  %v2879_v29 = vsel %vm1781_vm6, %v2878_v7, -inf }
 0xe14   : > { %2880 = vmax.xlane.f32.xlu1 %v2879_v29  ;;  %v4453_v30 = vpop.f32.mrb[23].mxu0 }
 0xe22   : > { %v2658_v31 = vpop.xlane.xlu0 %2657 }
 0xe23   : > { %v2659_v32 = vsub.f32 %v2655_v20, %v2658_v31 }
 0xe25   : > { %v2660_v33 = vmul.f32 1.442695, %v2659_v32 }
 0xe27   : > { %4773 = vpow2.f32 %v2660_v33 }
 0xe31   : > { %v4774_v34 = vpop.eup %4773 }
 0xe32   : > { %v2662_v35 = vsel %vm1781_vm6, %v4774_v34, 0.0 }
 0xe33   : > { %2663 = vadd.xlane.f32.xlu0 %v2662_v35  ;;  %v4701_v35 = vld [vmem:[%s6099_s18] sm:$0xff]  }
 0xe49   : > { %2718 = vrot.lane.b32.xlu0 %v2607_v61, %s5335_s27 }
 0xe4d   : > { %2941 = vrot.lane.b32.xlu0 %v2607_v61, %s5336_s30 }
 0xea1   : > { %v2881_v46 = vpop.xlane.xlu1 %2880 }
 0xea2   : > { %v2882_v47 = vsub.f32 %v2878_v7, %v2881_v46  ;;  %v4708_v46 = vld [vmem:[%s6099_s18 + $0x38] sm:$0xff]  }
 0xea4   : > { %v2883_v50 = vmul.f32 1.442695, %v2882_v47 }
 0xec0   : > { %v2664_v36 = vpop.xlane.xlu0 %2663 }
 0xec1   : > { %4775 = vrcp.f32 %v2664_v36  ;;  %v4702_v36 = vld [vmem:[%s6099_s18 + $0x8] sm:$0xff]  }
 0xec2   : > { %4777 = vpow2.f32 %v2883_v50 }
 0xec4   : > { %v2719_v38 = vpop.permute.xlu0 %2718 }
 0xec5   : > { %v2724_v45 = vsel %vm1733_vm3, %v2719_v38, 0  ;;  %v4703_v38 = vld [vmem:[%s6099_s18 + $0x10] sm:$0xff]  }
 0xec8   : > { %v2942_v39 = vpop.permute.xlu0 %2941 }
 0xec9   : > { %v2947_v40 = vsel %vm1733_vm3, %v2942_v39, 0  ;;  %v4704_v39 = vld [vmem:[%s6099_s18 + $0x18] sm:$0xff]  }
 0xeca   : > { %4461 = vmatpush3.bf16.xpose.msra.mxu0 %v2947_v40  ;;  %v4705_v40 = vld [vmem:[%s6099_s18 + $0x20] sm:$0xff]  }
 0xecb   : > { %v4776_v41 = vpop.eup %4775  ;;  %4472 = vmatprep.subr.bf16.mxu0 %v5332_v9 }
 0xecc   : > { %v2666_v42 = vmul.f32 %v4776_v41, %v4774_v34  ;;  %v4778_v3 = vpop.eup %4777  ;;  %v4707_v41 = vld [vmem:[%s6099_s18 + $0x30] sm:$0xff]  }
 0xecd   : > { %v2885_v5 = vsel %vm1781_vm6, %v4778_v3, 0.0 }
 0xece   : > { %v2667_v43 = vpack.c.bf16 %v2666_v42, %v2666_v42 }
 0xed0   : > { %4433 = vmatmul.mubr.msk.bf16.vlgmr.msra.gmra.mrb[36].mxu1 %vm1781_vm6, %v2667_v43 }
 0xed1   : > { %4437 = vmatpush3.bf16.xpose.msra.mxu1 %v2724_v45  ;;  %4463 = vmatmul.mubr.msk.bf16.vlgmr.msra.gmra.mrb[24].mxu0 %vm1733_vm3, %v2940_v44 }
 0xed2   : > { %4438 = vmatprep.mubr.msk.bf16.mxu1 %vm5334_vm0, %v5332_v9  ;;  %4442 = vmatprep.subr.bf16.mxu1 %v5332_v9 }
 0xed3   : > { %4488 = vmatprep.mubr.msk.bf16.mxu0 %vm5334_vm0, %v5332_v9  ;;  %4473 = vmatpush3.bf16.msra.mxu0 %v4701_v35 }
 0xed4   : > { %4474 = vmatprep.subr.bf16.mxu0 %v5332_v9 }
 0xed7   : > { %4475 = vmatpush3.bf16.msra.mxu0 %v4702_v36 }
 0xed8   : > { %4439 = vmatmul.mubr.msk.bf16.vlgmr.msra.gmra.mrb[40].mxu1 %vm1733_vm3, %v2716_v14  ;;  %4476 = vmatprep.subr.bf16.mxu0 %v5332_v9 }
 0xed9   : > { %4444 = vmatprep.mubr.msk.bf16.mxu1 %vm5334_vm0, %v5332_v9 }
 0xedb   : > { %4477 = vmatpush3.bf16.msra.mxu0 %v4703_v38 }
 0xedc   : > { %4478 = vmatprep.subr.bf16.mxu0 %v5332_v9 }
 0xedf   : > { %4479 = vmatpush3.bf16.msra.mxu0 %v4704_v39 }
 0xee0   : > { %4480 = vmatprep.subr.bf16.mxu0 %v5332_v9 }
 0xee3   : > { %4481 = vmatpush3.bf16.msra.mxu0 %v4705_v40 }
 0xee4   : > { %4482 = vmatprep.subr.bf16.mxu0 %v5332_v9 }
 0xfa3   : > { %v6464_v48 = vpop.f32.mrb[36].mxu1 }
 0xfa4   : > { %v4434_v52 = vpop.f32.mrb[37].mxu1  ;;  %v2983_v53 = vpop.f32.mrb[24].mxu0 }
 0xfa5   : > { %v2711_v54 = vpop.f32.mrb[38].mxu1  ;;  %v4464_v55 = vpop.f32.mrb[25].mxu0  ;;  %v2989_v0 = vsel %vm2605_vm11, %v2983_v53, -1e+09 }
 0xfa6   : > { %v4435_v56 = vpop.f32.mrb[39].mxu1  ;;  %v2986_v57 = vpop.f32.mrb[26].mxu0  ;;  %v2990_v37 = vsel %vm1781_vm6, %v2989_v0, -inf }
 0xfa7   : > { %v4465_v58 = vpop.f32.mrb[27].mxu0 }
 0xfab   : > { %v2760_v59 = vpop.f32.mrb[40].mxu1 }
 0xfac   : > { %v2766_v60 = vsel %vm2605_vm11, %v2760_v59, -1e+09  ;;  %v4440_v61 = vpop.f32.mrb[41].mxu1 }
 0xfad   : > { %v2763_v62 = vpop.f32.mrb[42].mxu1  ;;  %v2767_v63 = vsel %vm1781_vm6, %v2766_v60, -inf }
 0xfae   : > { %2768 = vmax.xlane.f32.xlu0 %v2767_v63  ;;  %v4441_v2 = vpop.f32.mrb[43].mxu1 }
 0xfb2   : > { %2991 = vmax.xlane.f32.xlu0 %v2990_v37 }
 0xfb6   : > { %2886 = vadd.xlane.f32.xlu0 %v2885_v5 }
0x103b   : > { %v2769_v6 = vpop.xlane.xlu0 %2768 }
0x103c   : > { %v2770_v8 = vsub.f32 %v2766_v60, %v2769_v6 }
0x103e   : > { %v2771_v11 = vmul.f32 1.442695, %v2770_v8 }
0x103f   : > { %v2992_v12 = vpop.xlane.xlu0 %2991 }
0x1040   : > { %4779 = vpow2.f32 %v2771_v11  ;;  %v2993_v1 = vsub.f32 %v2989_v0, %v2992_v12  ;;  %v4168_v0 = vld [vmem:[%s6855_s6] ss:$0 sm:$0xff] }
0x1042   : > { %v2994_v13 = vmul.f32 1.442695, %v2993_v1 }
0x1043   : > { %v2887_v18 = vpop.xlane.xlu0 %2886 }
0x1044   : > { %4781 = vpow2.f32 %v2994_v13  ;;  %v4711_v13 = vld [vmem:[%s6854_s2 + $0x4] ss:$8 sps:$4 sm:$0xff]  }
0x104a   : > { %v4780_v14 = vpop.eup %4779 }
0x104b   : > { %v2773_v15 = vsel %vm1781_vm6, %v4780_v14, 0.0 }
0x104c   : > { %2774 = vadd.xlane.f32.xlu0 %v2773_v15  ;;  %v4712_v15 = vld [vmem:[%s6854_s2 + $0x10] ss:$8 sps:$4 sm:$0xff]  }
0x104e   : > { %v4782_v16 = vpop.eup %4781 }
0x104f   : > { %v2996_v17 = vsel %vm1781_vm6, %v4782_v16, 0.0 }
0x1050   : > { %2997 = vadd.xlane.f32.xlu1 %v2996_v17  ;;  %v4715_v17 = vld [vmem:[%s6854_s2 + $0x20] ss:$8 sps:$4 sm:$0xff]  }
0x1061   : > { %2891 = vrot.lane.b32.xlu1 %v6420_v10, %s5337_s9 }
0x1062   : > { %2780 = vrot.lane.b32.xlu0 %v6420_v10, %s5335_s27 }
0x1065   : > { %3002 = vrot.lane.b32.xlu1 %v6420_v10, %s5336_s30 }
0x10d9   : > { %v2775_v19 = vpop.xlane.xlu0 %2774 }
0x10da   : > { %4783 = vrcp.f32 %v2775_v19  ;;  %v4718_v19 = vld [vmem:[%s6854_s2 + $0x30] ss:$8 sps:$4 sm:$0xff]  }
0x10db   : > { %4785 = vrcp.f32 %v2887_v18  ;;  %v4720_v18 = vld [vmem:[%s6854_s2 + $0x34] ss:$8 sps:$4 sm:$0xff]  }
0x10dd   : > { %v2781_v20 = vpop.permute.xlu0 %2780  ;;  %v2998_v22 = vpop.xlane.xlu1 %2997 }
0x10de   : > { %v2786_v21 = vsel %vm1797_vm4, %v2781_v20, 0  ;;  %4787 = vrcp.f32 %v2998_v22  ;;  %v4721_v20 = vld [vmem:[%s6854_s2 + $0x40] ss:$8 sps:$4 sm:$0xff]   ;;  %v4726_v22 = vld [vmem:[%s6854_s2 + $0x54] ss:$8 sps:$4 sm:$0xff]  }
0x10df   : > { %4443 = vmatpush3.bf16.msra.mxu1 %v2786_v21  ;;  %v4723_v21 = vld [vmem:[%s6854_s2 + $0x44] ss:$8 sps:$4 sm:$0xff]  }
0x10e0   : > { %4454 = vmatprep.subr.bf16.mxu1 %v5332_v9 }
0x10e1   : > { %v2892_v26 = vpop.permute.xlu1 %2891 }
0x10e2   : > { %v2897_v28 = vsel %vm1797_vm4, %v2892_v26, 0  ;;  %v4727_v26 = vld [vmem:[%s6854_s2 + $0x60] ss:$8 sps:$4 sm:$0xff]  }
0x10e4   : > { %v4784_v24 = vpop.eup %4783 }
0x10e5   : > { %v2777_v25 = vmul.f32 %v4784_v24, %v4780_v14  ;;  %v4786_v27 = vpop.eup %4785  ;;  %v3003_v29 = vpop.permute.xlu1 %3002  ;;  %v4714_v14 = vld [vmem:[%s6854_s2 + $0x14] ss:$8 sps:$4 sm:$0xff]   ;;  %v4724_v24 = vld [vmem:[%s6854_s2 + $0x50] ss:$8 sps:$4 sm:$0xff]  }
0x10e6   : > { %v2889_v10 = vmul.f32 %v4786_v27, %v4778_v3  ;;  %v3008_v32 = vsel %vm1797_vm4, %v3003_v29, 0  ;;  %v4730_v27 = vld [vmem:[%s6854_s2 + $0x70] ss:$8 sps:$4 sm:$0xff]  }
0x10e7   : > { %v2778_v7 = vpack.c.bf16 %v2777_v25, %v2777_v25  ;;  %v4729_v25 = vld [vmem:[%s6854_s2 + $0x64] ss:$8 sps:$4 sm:$0xff]  }
0x10e8   : > { %v2890_v30 = vpack.c.bf16 %v2889_v10, %v2889_v10  ;;  %v4788_v31 = vpop.eup %4787 }
0x10e9   : > { %4445 = vmatmul.mubr.msk.bf16.vlgmr.msra.gmra.mrb[44].mxu1 %vm1781_vm6, %v2778_v7  ;;  %v3000_v33 = vmul.f32 %v4788_v31, %v4782_v16  ;;  %v4717_v16 = vld [vmem:[%s6854_s2 + $0x24] ss:$8 sps:$4 sm:$0xff]   ;;  %v4732_v7 = vld [vmem:[%s6854_s2 + $0x74] ss:$8 sps:$4 sm:$0xff]  }
0x10ea   : > { %4455 = vmatpush3.bf16.msra.mxu1 %v2897_v28  ;;  %4456 = vmatprep.mubr.msk.bf16.mxu1 %vm5334_vm0, %v5332_v9 }
0x10eb   : > { %4466 = vmatprep.subr.bf16.mxu1 %v5332_v9  ;;  %v3001_v34 = vpack.c.bf16 %v3000_v33, %v3000_v33 }
0x10f1   : > { %4457 = vmatmul.mubr.msk.bf16.vlgmr.msra.gmra.mrb[48].mxu1 %vm1781_vm6, %v2890_v30 }
0x10f2   : > { %4467 = vmatpush3.bf16.msra.mxu1 %v3008_v32  ;;  %4468 = vmatprep.mubr.msk.bf16.mxu1 %vm5334_vm0, %v5332_v9 }
0x10f3   : > { %3321 = vmatprep.subr.bf16.mxu1 %v4711_v13 }
0x10f9   : > { %4469 = vmatmul.mubr.msk.bf16.vlgmr.msra.gmra.mrb[52].mxu1 %vm1781_vm6, %v3001_v34 }
0x10fa   : > { %3353 = vmatprep.mubr.bf16.mxu1 %v5333_v23  ;;  %v4706_v23 = vld [vmem:[%s6099_s18 + $0x28] sm:$0xff]   ;;  %s6856_s18 = sld [smem:[#allocation54_spill]] }
0x10fb   : > { %4483 = vmatpush3.bf16.msra.mxu0 %v4706_v23 }
0x10fc   : > { %4484 = vmatprep.subr.bf16.mxu0 %v5332_v9 }
0x10ff   : > { %4485 = vmatpush3.bf16.msra.mxu0 %v4707_v41 }
0x1100   : > { %4486 = vmatprep.subr.bf16.mxu0 %v5332_v9  ;;  %v4733_v28 = vld [vmem:[%s6856_s18 + $0x40] sm:$0xff]   ;;  %v4735_v29 = vld [vmem:[%s6856_s18 + $0x48] sm:$0xff]   ;;  %v4737_v31 = vld [vmem:[%s6856_s18 + $0x50] sm:$0xff]  }
0x1101   : > { %v4734_v10 = vld [vmem:[%s6856_s18] sm:$0xff]   ;;  %v4736_v30 = vld [vmem:[%s6856_s18 + $0x8] sm:$0xff]   ;;  %v4738_v32 = vld [vmem:[%s6856_s18 + $0x10] sm:$0xff]  }
0x1102   : > { %v4739_v33 = vld [vmem:[%s6856_s18 + $0x58] sm:$0xff]   ;;  %v4741_v35 = vld [vmem:[%s6856_s18 + $0x60] sm:$0xff]   ;;  %v4743_v38 = vld [vmem:[%s6856_s18 + $0x68] sm:$0xff]  }
0x1103   : > { %4487 = vmatpush3.bf16.msra.mxu0 %v4708_v46  ;;  %v4740_v34 = vld [vmem:[%s6856_s18 + $0x18] sm:$0xff]   ;;  %v4742_v36 = vld [vmem:[%s6856_s18 + $0x20] sm:$0xff]   ;;  %v4744_v39 = vld [vmem:[%s6856_s18 + $0x28] sm:$0xff]  }
0x1104   : > { %4294 = vmatprep.subr.bf16.mxu0 %v4733_v28 }
0x11bc   : > { %v2822_v42 = vpop.f32.mrb[44].mxu1 }
0x11bd   : > { %3051 = vrot.lane.b32.xlu1 %v2822_v42, %s5336_s30  ;;  %v4446_v43 = vpop.f32.mrb[45].mxu1 }
0x11be   : > { %v2825_v44 = vpop.f32.mrb[46].mxu1 }
0x11bf   : > { %v4447_v45 = vpop.f32.mrb[47].mxu1 }
0x11c4   : > { %v2933_v47 = vpop.f32.mrb[48].mxu1 }
0x11c5   : > { %3055 = vrot.lane.b32.xlu0 %v2933_v47, %s5337_s9  ;;  %v4458_v50 = vpop.f32.mrb[49].mxu1  ;;  %v4177_v47 = vld [vmem:[%s1415_s16] ss:$0 sm:$0xff]  ;;  %s6859_s16 = sld [smem:[#allocation38_spill]] }
0x11c6   : > { %v2936_v52 = vpop.f32.mrb[50].mxu1 }
0x11c7   : > { %v4459_v53 = vpop.f32.mrb[51].mxu1 }
0x11c8   : > { %v4178_v53 = vld [vmem:[%s1418_s0] ss:$0 sm:$0xff] }
0x11cb   : > { %p4212_p2 = scmp.ne.s32.totalorder %s6859_s16, 1 }
0x11cc   : > { %v3044_v54 = vpop.f32.mrb[52].mxu1  ;;  %s6860_s11 = sld [smem:[#allocation79_spill]] (!%p4212_p2)  ;;  %s6861_s15 = sld [smem:[#allocation80_spill]] (!%p4212_p2) }
0x11cd   : > { %3059 = vrot.lane.b32.xlu1 %v3044_v54, %s5335_s27  ;;  %v4470_v55 = vpop.f32.mrb[53].mxu1 }
0x11ce   : > { %v3047_v56 = vpop.f32.mrb[54].mxu1 }
0x11cf   : > { %v4471_v57 = vpop.f32.mrb[55].mxu1 }
0x11d0   : > { %v4745_v57 = vld [vmem:[%s6856_s18 + $0x70] sm:$0xff]  }
0x11d2   : > { %v4213_v28 = vld [vmem:[%s6860_s11] ss:$0 sm:$0xff] (!%p4212_p2) }
0x122f   : > { %v3052_v58 = vpop.permute.xlu1 %3051 }
0x1230   : > { %v3062_v9 = vsel %vm1733_vm3, %v6464_v48, %v3052_v58  ;;  %v4746_v58 = vld [vmem:[%s6856_s18 + $0x30] sm:$0xff]  }
0x1237   : > { %v3056_v59 = vpop.permute.xlu0 %3055 }
0x1238   : > { %v3063_v60 = vsel %vm2190_vm7, %v3062_v9, %v3056_v59  ;;  %v4747_v59 = vld [vmem:[%s6856_s18 + $0x78] sm:$0xff]  }
0x1239   : > { %v4748_v9 = vld [vmem:[%s6856_s18 + $0x38] sm:$0xff]  }
0x123f   : > { %v3060_v61 = vpop.permute.xlu1 %3059 }
0x1240   : > { %v3064_v62 = vsel %vm2192_vm8, %v3063_v60, %v3060_v61  ;;  %v3229_v60 = vld [vmem:[%s6167_s4] sm:$0x3] }
0x1241   : > { %v3065_v63 = vpack.c.bf16 %v3064_v62, %v3064_v62  ;;  %v3234_v61 = vrot.slane %v3229_v60, %v6241_v51  ;;  %v3238_v62 = vrot.slane %v3229_v60, %v6238_v49  ;;  %v4211_v51 = vld [vmem:[%s1224_s17] ss:$0 sm:$0xff] }
0x1243   : > { %4489 = vmatmul.mubr.bf16.vlgmr.msra.gmra.mrb[28].mxu0 %v3065_v63 }
0x1244   : > { %4295 = vmatpush3.bf16.msra.mxu0 %v4734_v10 }
0x1245   : > { %4296 = vmatprep.subr.bf16.mxu0 %v4735_v29 }
0x1248   : > { %4297 = vmatpush3.bf16.msra.mxu0 %v4736_v30  ;;  %v4214_v30 = vld [vmem:[%s6861_s15] ss:$0 sm:$0xff] (!%p4212_p2) }
0x1249   : > { %4298 = vmatprep.subr.bf16.mxu0 %v4737_v31 }
0x124c   : > { %4299 = vmatpush3.bf16.msra.mxu0 %v4738_v32 }
0x124d   : > { %4300 = vmatprep.subr.bf16.mxu0 %v4739_v33 }
0x1250   : > { %4301 = vmatpush3.bf16.msra.mxu0 %v4740_v34 }
0x1251   : > { %4302 = vmatprep.subr.bf16.mxu0 %v4741_v35 }
0x1254   : > { %4303 = vmatpush3.bf16.msra.mxu0 %v4742_v36 }
0x1255   : > { %4304 = vmatprep.subr.bf16.mxu0 %v4743_v38 }
0x1258   : > { %4305 = vmatpush3.bf16.msra.mxu0 %v4744_v39 }
0x1259   : > { %4306 = vmatprep.subr.bf16.mxu0 %v4745_v57 }
0x125c   : > { %4307 = vmatpush3.bf16.msra.mxu0 %v4746_v58 }
0x125d   : > { %4308 = vmatprep.subr.bf16.mxu0 %v4747_v59 }
0x1260   : > { %4309 = vmatpush3.bf16.msra.mxu0 %v4748_v9 }
0x1316   : > { %v3171_v2 = vpop.f32.mrb[28].mxu0 }
0x1317   : > { %v3172_v37 = vadd.f32 %v4168_v0, %v3171_v2  ;;  %v4490_v3 = vpop.f32.mrb[29].mxu0 }
0x1318   : > { %v3174_v5 = vpop.f32.mrb[30].mxu0 }
0x1319   : > { %v6519_v6 = vadd.f32 %v3172_v37, %v6352_v4  ;;  %v4491_v48 = vpop.f32.mrb[31].mxu0  ;;  %v4709_v4 = vld [vmem:[%s6854_s2] ss:$8 sps:$4 sm:$0xff]  }
0x131a   : > { %3322 = vmatpush1.bf16.msra.mxu1 %v4709_v4 }
0x131b   : > { %3178 = vadd.xlane.f32.xlu0 %v6519_v6  ;;  %3323 = vmatprep.subr.bf16.mxu1 %v4714_v14 }
0x131e   : > { %3324 = vmatpush1.bf16.msra.mxu1 %v4712_v15 }
0x131f   : > { %3325 = vmatprep.subr.bf16.mxu1 %v4717_v16 }
0x1322   : > { %3326 = vmatpush1.bf16.msra.mxu1 %v4715_v17 }
0x1323   : > { %3327 = vmatprep.subr.bf16.mxu1 %v4720_v18 }
0x1326   : > { %3328 = vmatpush1.bf16.msra.mxu1 %v4718_v19 }
0x1327   : > { %3329 = vmatprep.subr.bf16.mxu1 %v4723_v21 }
0x132a   : > { %3330 = vmatpush1.bf16.msra.mxu1 %v4721_v20 }
0x132b   : > { %3331 = vmatprep.subr.bf16.mxu1 %v4726_v22 }
0x132e   : > { %3332 = vmatpush1.bf16.msra.mxu1 %v4724_v24 }
0x132f   : > { %3333 = vmatprep.subr.bf16.mxu1 %v4729_v25 }
0x1332   : > { %3334 = vmatpush1.bf16.msra.mxu1 %v4727_v26 }
0x1333   : > { %3335 = vmatprep.subr.bf16.mxu1 %v4732_v7 }
0x1336   : > { %3336 = vmatpush1.bf16.msra.mxu1 %v4730_v27 }
0x13a8   : > { %v3179_v8 = vpop.xlane.xlu0 %3178 }
0x13a9   : > { %v3180_v11 = vmul.f32 0.0078125, %v3179_v8 }
0x13ab   : > { %v6523_v12 = vsub.f32 %v6519_v6, %v3180_v11 }
0x13ad   : > { %v3182_v1 = vmul.f32 %v6523_v12, %v6523_v12  ;;  %v3202_v50 = vmul.f32 %v4177_v47, %v6523_v12 }
0x13af   : > { %3183 = vadd.xlane.f32.xlu1 %v3182_v1 }
0x143c   : > { %v3184_v40 = vpop.xlane.xlu1 %3183 }
0x143d   : > { %v3185_v23 = vmul.f32 0.007874016, %v3184_v40 }
0x143f   : > { %4789 = vrsqrt.f32 %v3185_v23  ;;  %vm3188_vm12 = vcmp.eq.f32.partialorder %v3185_v23, inf  ;;  %v3191_v43 = vand.u32 2147483648, %v3185_v23  ;;  %vm3190_vm13 = vcmp.eq.f32.partialorder %v3185_v23, 0.0 }
0x1449   : > { %v4790_v41 = vpop.eup %4789 }
0x144a   : > { %v3187_v42 = vmul.f32 %v4790_v41, %v3185_v23 }
0x144c   : > { %v3189_v44 = vsel %vm3188_vm12, %v3185_v23, %v3187_v42 }
0x144d   : > { %v3192_v45 = vsel %vm3190_vm13, %v3191_v43, %v3189_v44 }
0x144e   : > { %v3193_v46 = vadd.f32 1e-06, %v3192_v45 }
0x1450   : > { %4791 = vrcp.f32 %v3193_v46 }
0x145a   : > { %v4792_v52 = vpop.eup %4791 }
0x145b   : > { %v3203_v54 = vmul.f32 %v4792_v52, %v3202_v50 }
0x145d   : > { %v3211_v55 = vadd.f32 %v4178_v53, %v3203_v54 }
0x145f   : > { %v3212_v56 = vpack.c.bf16 %v3211_v55, %v3211_v55 }
0x1461   : > { %3354 = vmatmul.mubr.bf16.vlgmr.msra.gmra.mrb[56].mxu1 %v3212_v56 }
0x1534   : > { %v3355_v63 = vpop.f32.mrb[56].mxu1 }
0x1535   : > { %v3356_v0 = vadd.f32 %v3355_v63, %v3234_v61  ;;  %v3357_v2 = vpop.f32.mrb[57].mxu1 }
0x1536   : > { %v3358_v37 = vadd.f32 %v3357_v2, %v3238_v62  ;;  %v3359_v3 = vpop.f32.mrb[58].mxu1 }
0x1537   : > { %v3362_v5 = vmax.f32 %v3356_v0, 0.0  ;;  %v3360_v48 = vpop.f32.mrb[59].mxu1 }
0x1538   : > { %v3363_v8 = vmax.f32 %v3358_v37, 0.0 }
0x1539   : > { %v3364_v12 = vpack.c.bf16 %v3362_v5, %v3362_v5 }
0x153a   : > { %v3365_v11 = vpack.c.bf16 %v3363_v8, %v3363_v8 }
0x153c   : > { %3526 = vmatprep.mubr.bf16.mxu0 %v3365_v11 }
0x153d   : > { %3527 = vmatmul.mubr.bf16.vlgmr.msra.gmra.mrb[32].mxu0 %v3364_v12 }
0x1610   : > { %v4310_v1 = vpop.f32.mrb[32].mxu0  ;;  %3546 = sbr.rel (%p4212_p2) target bundleno = 5981 (0x175d), region = 184 }
0x1611   : > { %v4311_v13 = vpop.f32.mrb[33].mxu0 }
0x1612   : > { %v4312_v4 = vadd.f32 %v4311_v13, %v4310_v1  ;;  %v4313_v14 = vpop.f32.mrb[34].mxu0 }
0x1613   : > { %v4314_v49 = vpop.f32.mrb[35].mxu0 }
0x1614   : > { %v3534_v15 = vadd.f32 %v4312_v4, %v6519_v6 }
0x1616   : > { %v3542_v16 = vadd.f32 %v4211_v51, %v3534_v15 }
0x1618   : > { %3547 = vadd.xlane.f32.xlu0 %v3542_v16 }
0x16a5   : > { %v3548_v17 = vpop.xlane.xlu0 %3547 }
0x16a6   : > { %v3549_v18 = vmul.f32 0.0078125, %v3548_v17 }
0x16a8   : > { %v3550_v19 = vsub.f32 %v3542_v16, %v3549_v18 }
0x16aa   : > { %v3551_v20 = vmul.f32 %v3550_v19, %v3550_v19  ;;  %v3571_v10 = vmul.f32 %v4213_v28, %v3550_v19 }
0x16ac   : > { %3552 = vadd.xlane.f32.xlu0 %v3551_v20 }
0x1739   : > { %v3553_v21 = vpop.xlane.xlu0 %3552 }
0x173a   : > { %v3554_v22 = vmul.f32 0.007874016, %v3553_v21 }
0x173c   : > { %4793 = vrsqrt.f32 %v3554_v22  ;;  %vm3557_vm14 = vcmp.eq.f32.partialorder %v3554_v22, inf  ;;  %v3560_v26 = vand.u32 2147483648, %v3554_v22  ;;  %vm3559_vm15 = vcmp.eq.f32.partialorder %v3554_v22, 0.0 }
0x1746   : > { %v4794_v24 = vpop.eup %4793 }
0x1747   : > { %v3556_v25 = vmul.f32 %v4794_v24, %v3554_v22 }
0x1749   : > { %v3558_v7 = vsel %vm3557_vm14, %v3554_v22, %v3556_v25 }
0x174a   : > { %v3561_v6 = vsel %vm3559_vm15, %v3560_v26, %v3558_v7 }
0x174b   : > { %v3562_v27 = vadd.f32 1e-06, %v3561_v6 }
0x174d   : > { %4795 = vrcp.f32 %v3562_v27 }
0x1757   : > { %v4796_v29 = vpop.eup %4795 }
0x1758   : > { %v3572_v31 = vmul.f32 %v4796_v29, %v3571_v10 }
0x175a   : > { %v3580_v32 = vadd.f32 %v4214_v30, %v3572_v31 }
0x175c   : > { %3581 = vst [vmem:[%s6171_s14] sm:$0xff] %v3580_v32 }
0x175d PF: > { %s6862_s1 = sld [smem:[#allocation38_spill]] }
0x1763   : > { %p4215_p8 = scmp.eq.s32.totalorder %s6862_s1, 1 }
0x1764   : > { %3586 = vst [vmem:[%s6171_s14] sm:$0xff] (!%p4215_p8), %v3542_v16 }
0x1765   : > { %3585 = sbr.rel (%p4215_p8) target bundleno = 5996 (0x176c), region = 188 }
0x176c PF: > { %s6863_s13 = sld [smem:[#allocation39_spill]]  ;;  %s6864_s29 = sld [smem:[#allocation52_spill]] }
0x176d   : > { %s6865_s26 = sld [smem:[#allocation50_spill]]  ;;  %s6866_s3 = sld [smem:[#allocation81_spill]] }
0x176e   : > { %s3601_s19 = sshll.u32 %s6171_s14, 4  ;;  %s5338_s22 = smov [#allocation23]   ;;  %s3602_s19 = int_to_ptr.vmem [resolvable:$true] %s3601_s19 }
0x176f   : > { %s5161_s20 = scalar_lea.vmem %s3602_s19, 128  ;;  %s5165_s2 = sshll.u32 %s5338_s22, 4  ;;  %s5166_s2 = int_to_ptr.vmem [resolvable:$false] %s5165_s2 }
0x1770   : > { %p5162_p13 = scmp.ne.s32.totalorder %s3602_s19, %s5161_s20  ;;  %s5167_s6 = scalar_lea.vmem %s5166_s2, 256 }
0x1771   : > { %p5168_p5 = scmp.lt.s32.totalorder %s3602_s19, %s5166_s2  ;;  %p5169_p4 = scmp.lt.s32.totalorder %s5167_s6, %s5161_s20 }
0x1772   : > { %s4217_s21 = sshll.u32 %s6863_s13, 7  ;;  %s3588_s24 = scalar_lea.sflag [#allocation4], %s6864_s29 }
0x1773   : > { %s6867_s10 = smov %s6866_s3  ;;  %s6590_s12 = scalar_lea.hbm %s6866_s3, %s4217_s21 }
0x1774   : > { %p6868_p0 = scmp.ne.s32.totalorder %s6865_s26, 0  ;;  %p5170_p10 = por %p5169_p4, %p5168_p5 }
0x1776   : > { %p5163_p11 = pnand %p5162_p13, %p6868_p0 }
0x1778   : > { %p5164_p6 = pneg %p5163_p11 }
0x177a   : > { %p5171_p3 = pnand %p5170_p10, %p5164_p6 }
0x177c   : > { %5174 = shalt.err (!%p5171_p3)
}
0x177d   : > { %s5175_s14 = scalar_lea.hbm %s6590_s12, 128  ;;  %s5179_s30 = scalar_lea.hbm %s6867_s10, 256 }
0x177e   : > { %p5176_p9 = scmp.ne.s32.totalorder %s6590_s12, %s5175_s14  ;;  %p5180_p12 = scmp.lt.u32.totalorder %s6590_s12, %s6867_s10 }
0x177f   : > { %p5181_p2 = scmp.lt.u32.totalorder %s5179_s30, %s5175_s14  ;;  %p5183_p13 = scmp.lt.u32.totalorder %s5175_s14, %s6590_s12 }
0x1780   : > { %p5177_p1 = pnand %p5176_p9, %p6868_p0 }
0x1781   : > { %p5182_p8 = por %p5181_p2, %p5180_p12 }
0x1782   : > { %p5178_p7 = pneg %p5177_p1 }
0x1783   : > { %p5184_p11 = por %p5183_p13, %p5182_p8 }
0x1785   : > { %p5185_p6 = pnand %p5184_p11, %p5178_p7 }
0x1787   : > { %5188 = shalt.err (!%p5185_p6)
}
0x1788   : > { %4522 = dma.vmem_to_hbm [thread:$0]  (%p6868_p0), %s3602_s19, 128, %s6590_s12, %s3588_s24  }
0x1789 PF: > { %s6869_s8 = sld [smem:[#allocation42_spill]]  ;;  %s6870_s25 = sld [smem:[#allocation35_spill]] }
0x178a   : > { %s6871_s16 = sld [smem:[#allocation51_spill]] }
0x178f   : > { %p4528_p5 = scmp.ge.s32.totalorder %s6869_s8, 2  ;;  %s3613_s4 = sand.u32 1, %s6870_s25  }
0x1790   : > { %p6872_p4 = scmp.ne.s32.totalorder %s6871_s16, 0  ;;  %s3614_s7 = scalar_lea.sflag [#allocation4], %s3613_s4 }
0x1792   : > { %p4525_p10 = pnand %p4528_p5, %p6872_p4 }
0x1794   : > { %5266 = dma.done.wait (!%p4525_p10), %s3614_s7, 128  }
0x1795   : > { %5268 = vsyncadd (!%p4525_p10), %s3614_s7, 4294967168  ;;  %s60_s2 = sadd.s32 1, %s6869_s8   ;;  %s6873_s27 = sld [smem:[#allocation33_spill]] }
0x1796   : > { %p57_p3 = scmp.ge.s32.totalorder %s60_s2, 6   ;;  %s6874_s3 = sld [smem:[#allocation34_spill]] }
0x1797   : > { %s6875_s7 = sld [smem:[#allocation47_spill]]  ;;  %s6876_s28 = sld [smem:[#allocation36_spill]] }
0x1798   : > { %s6877_s8 = sld [smem:[#allocation37_spill]]  ;;  %s6878_s4 = sld [smem:[#allocation48_spill]] }
0x1799   : > { %s6879_s29 = sld [smem:[#allocation40_spill]]  ;;  %s6880_s0 = sld [smem:[#allocation41_spill]] }
0x179a   : > { %s6881_s9 = sld [smem:[#allocation44_spill]]  ;;  %s6882_s30 = sld [smem:[#allocation45_spill]] }
0x179b   :  { %59 = sbr.rel (!%p57_p3) target bundleno = 49 (0x31), region = 358 }
0x17a2   :  { %3619 = vsyncpa [#allocation3], 1 }
0x17a3   :  { %3621 = vsyncpa [#allocation3 + $0x1], 1 }
0x17a4   :  { %3622 = vsyncpa [#allocation6], 1 }
0x17a5   :  { %3624 = vsyncpa [#allocation6 + $0x1], 1 }
0x17a6   :  { %3625 = vsyncpa [#allocation9], 1 }
0x17a7   :  { %3627 = vsyncpa [#allocation9 + $0x1], 1 }
0x17a8   :  { %3628 = vsyncpa [#allocation12], 1 }
0x17a9   :  { %3630 = vsyncpa [#allocation12 + $0x1], 1 }
0x17aa   :  { %3631 = vsyncpa [#allocation15], 1 }
0x17ab   :  { %3633 = vsyncpa [#allocation15 + $0x1], 1 }
0x17ac   :  { %3634 = vsyncpa [#allocation18], 1 }
0x17ad   :  { %3636 = vsyncpa [#allocation18 + $0x1], 1 }
0x17ae   :  { %3637 = vsyncpa [#allocation21], 1 }
0x17af   :  { %3639 = vsyncpa [#allocation21 + $0x1], 1 }
0x17b0   :  { %3640 = vsyncpa [#allocation4], 1 }
0x17b1   :  { %3642 = vsyncpa [#allocation4 + $0x1], 1 }

</bundles_post_ra>
